<compile_context>
chip_gen: v5e
topology: v5e:2x2
jax: 0.10.0
libtpu: 0.0.40
codegen_flags: <defaults>
</compile_context>

<pallas_src>
import functools
import math

import numpy as np
import jax
import jax.numpy as jnp
from jax.experimental import pallas as pl
from jax.experimental.pallas import tpu as pltpu

LRELU_SLOPE = 0.1
_TM = 256  # GEMM M tile (output spatial positions / STFT frames per grid step)


def _round_up(a, b):
    return (a + b - 1) // b * b


# ----------------------------------------------------------------------------
# Pallas kernels
# ----------------------------------------------------------------------------
def _gemm_bias_act_kernel(x_ref, w_ref, b_ref, o_ref, *, slope, n_keep):
    """One (M, N) tile of: out = leaky_relu(x @ w + b). bf16 in, f32 accumulate."""
    acc = jnp.dot(x_ref[...], w_ref[...], preferred_element_type=jnp.float32)
    acc = acc + b_ref[...]                       # (1, TN) broadcasts over rows
    if slope is not None:
        acc = jnp.maximum(acc, slope * acc)      # leaky relu, single VPU op
    if n_keep is not None:                       # narrow output (e.g. Cout=1)
        acc = acc[:, :n_keep]
    o_ref[...] = acc.astype(o_ref.dtype)


def _stft_mag_kernel(x_ref, basis_ref, o_ref, *, tno):
    """One tile of |STFT|: single dot against a [cos | -sin] block, then magnitude."""
    z = jnp.dot(x_ref[...], basis_ref[...], preferred_element_type=jnp.float32)
    re = z[:, :tno]
    im = z[:, tno:]
    o_ref[...] = jnp.sqrt(re * re + im * im).astype(o_ref.dtype)


# ----------------------------------------------------------------------------
# pallas_call wrappers
# ----------------------------------------------------------------------------
def gemm_bias_act(x, w, b, slope, *, tm=_TM, out_dtype=jnp.float32):
    """x:(M,K) bf16, w:(K,N) bf16, b:(N,) f32 -> (M,N) out_dtype."""
    M, K = x.shape
    N = w.shape[1]
    Kp = _round_up(K, 128)
    Nr = _round_up(N, 128)
    # Keep the RHS fully resident while small; tile N for big RHS (VMEM safety
    # on v5e 16MiB / v7x 32MiB scoped defaults).
    tn = Nr if Kp * Nr * 2 <= (4 << 20) else 512
    tn = min(tn, Nr)
    Np = _round_up(Nr, tn)
    Mp = _round_up(M, tm)

    # Very narrow outputs (final Cout=1 conv): compute on a 128-wide padded RHS
    # but only write n_keep lanes to HBM instead of a 128x padded slab.
    n_keep = N if N < 32 else None
    n_out = N if n_keep is not None else Np
    out_block_n = N if n_keep is not None else tn

    xp = x if (M, K) == (Mp, Kp) else jnp.pad(x, ((0, Mp - M), (0, Kp - K)))
    wp = w if (K, N) == (Kp, Np) else jnp.pad(w, ((0, Kp - K), (0, Np - N)))
    bp = (b if N == Np else jnp.pad(b, (0, Np - N))).reshape(1, Np)

    out = pl.pallas_call(
        functools.partial(_gemm_bias_act_kernel, slope=slope, n_keep=n_keep),
        out_shape=jax.ShapeDtypeStruct((Mp, n_out), out_dtype),
        grid_spec=pltpu.PrefetchScalarGridSpec(
            num_scalar_prefetch=0,
            grid=(Mp // tm, Np // tn),
            in_specs=[
                pl.BlockSpec((tm, Kp), lambda i, j: (i, 0)),
                pl.BlockSpec((Kp, tn), lambda i, j: (0, j)),
                pl.BlockSpec((1, tn), lambda i, j: (0, j)),
            ],
            out_specs=pl.BlockSpec((tm, out_block_n), lambda i, j: (i, j)),
        ),
        compiler_params=pltpu.CompilerParams(
            dimension_semantics=("parallel", "parallel")),
    )(xp, wp, bp)
    if Mp != M or n_out != N:
        out = out[:M, :N]
    return out


def stft_magnitude(frames, basis, F_, Fp, tno, *, tm=_TM):
    """frames:(M,nfft) bf16, basis:(Kp, 2*Fp) bf16 block-interleaved -> |STFT| (M,F) f32."""
    M, K = frames.shape
    Kp = basis.shape[0]
    Mp = _round_up(M, tm)
    xp = frames if (M, K) == (Mp, Kp) else jnp.pad(frames, ((0, Mp - M), (0, Kp - K)))

    out = pl.pallas_call(
        functools.partial(_stft_mag_kernel, tno=tno),
        out_shape=jax.ShapeDtypeStruct((Mp, Fp), jnp.float32),
        grid_spec=pltpu.PrefetchScalarGridSpec(
            num_scalar_prefetch=0,
            grid=(Mp // tm, Fp // tno),
            in_specs=[
                pl.BlockSpec((tm, Kp), lambda i, t: (i, 0)),
                pl.BlockSpec((Kp, 2 * tno), lambda i, t: (0, t)),
            ],
            out_specs=pl.BlockSpec((tm, tno), lambda i, t: (i, t)),
        ),
        compiler_params=pltpu.CompilerParams(
            dimension_semantics=("parallel", "parallel")),
    )(xp, basis)
    return out[:M, :F_]


# ----------------------------------------------------------------------------
# Plain-JAX glue (NHWC, bf16 im2col feeding the Pallas GEMM)
# ----------------------------------------------------------------------------
def conv2d_lrelu_nhwc(x, w2, bias, k, s, p, slope, *, out_dtype, tm=_TM):
    """NHWC conv2d (+ optional LeakyReLU) via im2col + Pallas GEMM. Returns NHWC."""
    B, H, W, C = x.shape
    kh, kw = k
    sh, sw = s
    ph, pw = p
    Ho = (H + 2 * ph - kh) // sh + 1
    Wo = (W + 2 * pw - kw) // sw + 1
    xb = x.astype(jnp.bfloat16)
    xpad = jnp.pad(xb, ((0, 0), (ph, ph), (pw, pw), (0, 0)))
    cols = [
        xpad[:, i:i + sh * (Ho - 1) + 1:sh, j:j + sw * (Wo - 1) + 1:sw, :]
        for i in range(kh) for j in range(kw)
    ]
    col = jnp.concatenate(cols, axis=-1).reshape(B * Ho * Wo, kh * kw * C)
    out = gemm_bias_act(col, w2, bias, slope, tm=tm, out_dtype=out_dtype)
    return out.reshape(B, Ho, Wo, w2.shape[1])


def _mrd_forward(params, audio, *, specs, nfft, hop, fmt, F_, Fp, tno, tm):
    B, T = audio.shape
    pad = nfft // 2
    assert T > pad, "reflect padding requires T > nfft//2 (torch.stft would also fail)"

    # --- STFT (center=True, rectangular window, onesided) ---------------------
    xpad = jnp.pad(audio, ((0, 0), (pad, pad)), mode="reflect")
    n_frames = 1 + T // hop
    frame_index = np.arange(n_frames)[:, None] * hop + np.arange(nfft)[None, :]
    frames = xpad[:, frame_index]                                   # (B, n_frames, nfft)
    frames2 = frames.reshape(B * n_frames, nfft).astype(jnp.bfloat16)

    if fmt == "mag":
        spec = stft_magnitude(frames2, params["basis_mag"], F_, Fp, tno, tm=tm)
    else:
        zb = jnp.zeros((F_,), jnp.float32)
        re = gemm_bias_act(frames2, params["cos"], zb, None, tm=tm)
        im = gemm_bias_act(frames2, params["nsin"], zb, None, tm=tm)
        # TODO(synk): atan2 for the 'angle' format runs outside the Pallas kernel.
        spec = jnp.arctan2(im, re)

    spec = spec.reshape(B, n_frames, F_).transpose(0, 2, 1)         # (B, F, frames)
    x = spec[..., None]                                             # NHWC (B, F, frames, 1)

    # --- conv stack (NHWC between layers, NCHW only for fmap outputs) ---------
    fmap = []
    n_layers = len(specs)
    for li, ((cin, cout, k, s, p), (w2, bias)) in enumerate(zip(specs, params["conv"])):
        last = li == n_layers - 1
        slope = None if last else LRELU_SLOPE
        out_dtype = jnp.float32 if last else jnp.bfloat16
        x = conv2d_lrelu_nhwc(x, w2, bias, k, s, p, slope, out_dtype=out_dtype, tm=tm)
        fmap.append(jnp.transpose(x, (0, 3, 1, 2)).astype(jnp.float32))  # NCHW fmap
    flat = x.reshape(x.shape[0], -1)                                # Cout=1: NHWC==NCHW flatten
    return flat, fmap


# ----------------------------------------------------------------------------
class MRDPallas:
    """JAX/Pallas re-implementation of the PyTorch MRD forward pass."""

    def __init__(self, nfft, hopsize, fmt, key):
        self.nfft = nfft
        self.hopsize = hopsize
        self.format = fmt

        klist = [(5, 3), (5, 3), (3, 3), (3, 3)]
        slist = [(2, 1), (2, 2), (2, 1), (2, 2)]
        plist = [(2, 1), (2, 1), (1, 1), (1, 1)]
        specs = [(1, 64, (7, 5), (2, 2), (3, 2))]
        specs += [(64, 64, klist[i], slist[i], plist[i]) for i in range(4)]
        specs += [(64, 1, (3, 3), (1, 1), (1, 1))]
        self.specs = tuple(specs)

        keys = jax.random.split(key, 2 * len(specs))
        conv_params = []
        for idx, (cin, cout, k, _, _) in enumerate(specs):
            fan_in = cin * k[0] * k[1]
            bound = 1.0 / math.sqrt(fan_in)
            v = jax.random.uniform(keys[2 * idx], (cout, cin, k[0], k[1]),
                                   minval=-bound, maxval=bound, dtype=jnp.float32)
            b = jax.random.uniform(keys[2 * idx + 1], (cout,),
                                   minval=-bound, maxval=bound, dtype=jnp.float32)
            # weight_norm: w = g * v / ||v||, g initialized to ||v|| per out-channel.
            norm = jnp.sqrt(jnp.sum(v * v, axis=(1, 2, 3), keepdims=True))
            w = norm * v / norm
            # (Cout, Cin, kh, kw) -> (kh*kw*Cin, Cout) to match NHWC im2col order.
            w2 = jnp.transpose(w, (2, 3, 1, 0)).reshape(k[0] * k[1] * cin, cout)
            conv_params.append((w2.astype(jnp.bfloat16), b))

        # DFT bases (rectangular window, onesided). Block-interleaved [cos|-sin]
        # so a single MXU dot per N-tile yields matched re/im halves.
        F_ = nfft // 2 + 1
        tno = min(512, _round_up(F_, 128))
        Fp = _round_up(F_, tno)
        Kp = _round_up(nfft, 128)
        n = np.arange(nfft, dtype=np.float64)[:, None]
        kk = np.arange(F_, dtype=np.float64)[None, :]
        ang = 2.0 * np.pi * n * kk / nfft
        cos = np.zeros((Kp, Fp), np.float32)
        nsin = np.zeros((Kp, Fp), np.float32)
        cos[:nfft, :F_] = np.cos(ang)
        nsin[:nfft, :F_] = -np.sin(ang)
        blocks = []
        for t in range(Fp // tno):
            blocks.append(cos[:, t * tno:(t + 1) * tno])
            blocks.append(nsin[:, t * tno:(t + 1) * tno])
        basis_mag = np.concatenate(blocks, axis=1)                  # (Kp, 2*Fp)

        self.params = {
            "conv": conv_params,
            "basis_mag": jnp.asarray(basis_mag, dtype=jnp.bfloat16),
            "cos": jnp.asarray(cos[:nfft, :F_], dtype=jnp.bfloat16),
            "nsin": jnp.asarray(nsin[:nfft, :F_], dtype=jnp.bfloat16),
        }
        self._forward = jax.jit(functools.partial(
            _mrd_forward, specs=self.specs, nfft=nfft, hop=hopsize, fmt=fmt,
            F_=F_, Fp=Fp, tno=tno, tm=_TM))

    def __call__(self, audio):
        return self._forward(self.params, audio)


# ----------------------------------------------------------------------------
if __name__ == "__main__":
    key = jax.random.PRNGKey(0)
    k_param, k_audio = jax.random.split(key)

    nfft, hopsize, fmt = 32, 8, "mag"
    B, T = 2, 256
    audio = jax.random.normal(k_audio, (B, T), dtype=jnp.float32)

    model = MRDPallas(nfft, hopsize, fmt, k_param)
    out, fmap = model(audio)

    jax.block_until_ready(out)
    for f in fmap:
        jax.block_until_ready(f)

    assert out.shape[0] == B and out.ndim == 2
    assert len(fmap) == 6
    print("KERNEL_OK")
</pallas_src>

<mosaic_0001>
module attributes {stable_mosaic.version = 11 : i64} {
  func.func @_stft_mag_kernel(%arg0: i32, %arg1: i32, %arg2: memref<256x128xbf16, #tpu.memory_space<vmem>>, %arg3: memref<128x256xbf16, #tpu.memory_space<vmem>>, %arg4: memref<256x128xf32, #tpu.memory_space<vmem>>) attributes {dimension_semantics = [#tpu.dimension_semantics<parallel>, #tpu.dimension_semantics<parallel>], iteration_bounds = array<i64: 1, 1>, scalar_prefetch = 0 : i64, scratch_operands = 0 : i64, tpu.core_type = #tpu.core_type<tc>, window_params = [{transform_indices = @transform_0, window_bounds = array<i64: 256, 128>}, {transform_indices = @transform_1, window_bounds = array<i64: 128, 256>}, {transform_indices = @transform_2, window_bounds = array<i64: 256, 128>}]} {
    %c0 = arith.constant 0 : index
    %c0_0 = arith.constant 0 : index
    %0 = vector.load %arg2[%c0, %c0_0] : memref<256x128xbf16, #tpu.memory_space<vmem>>, vector<256x128xbf16>
    %c0_1 = arith.constant 0 : index
    %c0_2 = arith.constant 0 : index
    %1 = vector.load %arg3[%c0_1, %c0_2] : memref<128x256xbf16, #tpu.memory_space<vmem>>, vector<128x256xbf16>
    %cst = arith.constant dense<0.000000e+00> : vector<256x256xf32>
    %2 = tpu.matmul %0, %1, %cst {dimension_numbers = #tpu.dot_dimension_numbers<[1], [0], [0], [1], [0, 0, 1, 1], [], []>} : vector<256x128xbf16>, vector<128x256xbf16>, vector<256x256xf32> -> vector<256x256xf32>
    %3 = vector.extract_strided_slice %2 {offsets = [0, 0], sizes = [256, 128], strides = [1, 1]} : vector<256x256xf32> to vector<256x128xf32>
    %4 = vector.extract_strided_slice %2 {offsets = [0, 128], sizes = [256, 128], strides = [1, 1]} : vector<256x256xf32> to vector<256x128xf32>
    %5 = arith.mulf %3, %3 : vector<256x128xf32>
    %6 = arith.mulf %4, %4 : vector<256x128xf32>
    %7 = arith.addf %5, %6 : vector<256x128xf32>
    %8 = math.sqrt %7 : vector<256x128xf32>
    %c0_3 = arith.constant 0 : index
    %c0_4 = arith.constant 0 : index
    %9 = vector.load %arg4[%c0_3, %c0_4] : memref<256x128xf32, #tpu.memory_space<vmem>>, vector<256x128xf32>
    tpu.vector_store %arg4[%c0_3, %c0_4], %8 {strides = array<i32>} : memref<256x128xf32, #tpu.memory_space<vmem>>, vector<256x128xf32>,
    return
  }
  func.func @transform_0(%arg0: i32, %arg1: i32) -> (i32, i32) {
    %c0_i32 = arith.constant 0 : i32
    %c0_i32_0 = arith.constant 0 : i32
    return %arg0, %c0_i32 : i32, i32
  }
  func.func @transform_1(%arg0: i32, %arg1: i32) -> (i32, i32) {
    %c0_i32 = arith.constant 0 : i32
    %c0_i32_0 = arith.constant 0 : i32
    return %c0_i32, %arg1 : i32, i32
  }
  func.func @transform_2(%arg0: i32, %arg1: i32) -> (i32, i32) {
    %c0_i32 = arith.constant 0 : i32
    return %arg0, %arg1 : i32, i32
  }
}

module attributes {stable_mosaic.version = 11 : i64} {
  func.func @_gemm_bias_act_kernel(%arg0: i32, %arg1: i32, %arg2: memref<256x128xbf16, #tpu.memory_space<vmem>>, %arg3: memref<128x128xbf16, #tpu.memory_space<vmem>>, %arg4: memref<1x128xf32, #tpu.memory_space<vmem>>, %arg5: memref<256x128xbf16, #tpu.memory_space<vmem>>) attributes {dimension_semantics = [#tpu.dimension_semantics<parallel>, #tpu.dimension_semantics<parallel>], iteration_bounds = array<i64: 2, 1>, scalar_prefetch = 0 : i64, scratch_operands = 0 : i64, tpu.core_type = #tpu.core_type<tc>, window_params = [{transform_indices = @transform_0, window_bounds = array<i64: 256, 128>}, {transform_indices = @transform_1, window_bounds = array<i64: 128, 128>}, {transform_indices = @transform_2, window_bounds = array<i64: 1, 128>}, {transform_indices = @transform_3, window_bounds = array<i64: 256, 128>}]} {
    %c0 = arith.constant 0 : index
    %c0_0 = arith.constant 0 : index
    %0 = vector.load %arg2[%c0, %c0_0] : memref<256x128xbf16, #tpu.memory_space<vmem>>, vector<256x128xbf16>
    %c0_1 = arith.constant 0 : index
    %c0_2 = arith.constant 0 : index
    %1 = vector.load %arg3[%c0_1, %c0_2] : memref<128x128xbf16, #tpu.memory_space<vmem>>, vector<128x128xbf16>
    %cst = arith.constant dense<0.000000e+00> : vector<256x128xf32>
    %2 = tpu.matmul %0, %1, %cst {dimension_numbers = #tpu.dot_dimension_numbers<[1], [0], [0], [1], [0, 0, 1, 1], [], []>} : vector<256x128xbf16>, vector<128x128xbf16>, vector<256x128xf32> -> vector<256x128xf32>
    %c0_3 = arith.constant 0 : index
    %c0_4 = arith.constant 0 : index
    %3 = vector.load %arg4[%c0_3, %c0_4] : memref<1x128xf32, #tpu.memory_space<vmem>>, vector<1x128xf32>
    %4 = vector.broadcast %3 : vector<1x128xf32> to vector<256x128xf32>
    %5 = arith.addf %2, %4 : vector<256x128xf32>
    %cst_5 = arith.constant 1.000000e-01 : f32
    %6 = vector.broadcast %cst_5 : f32 to vector<256x128xf32>
    %7 = arith.mulf %6, %5 : vector<256x128xf32>
    %8 = arith.maximumf %5, %7 : vector<256x128xf32>
    %9 = arith.truncf %8 : vector<256x128xf32> to vector<256x128xbf16>
    %c0_6 = arith.constant 0 : index
    %c0_7 = arith.constant 0 : index
    %10 = vector.load %arg5[%c0_6, %c0_7] : memref<256x128xbf16, #tpu.memory_space<vmem>>, vector<256x128xbf16>
    tpu.vector_store %arg5[%c0_6, %c0_7], %9 {strides = array<i32>} : memref<256x128xbf16, #tpu.memory_space<vmem>>, vector<256x128xbf16>,
    return
  }
  func.func @transform_0(%arg0: i32, %arg1: i32) -> (i32, i32) {
    %c0_i32 = arith.constant 0 : i32
    %c0_i32_0 = arith.constant 0 : i32
    return %arg0, %c0_i32 : i32, i32
  }
  func.func @transform_1(%arg0: i32, %arg1: i32) -> (i32, i32) {
    %c0_i32 = arith.constant 0 : i32
    %c0_i32_0 = arith.constant 0 : i32
    return %c0_i32, %arg1 : i32, i32
  }
  func.func @transform_2(%arg0: i32, %arg1: i32) -> (i32, i32) {
    %c0_i32 = arith.constant 0 : i32
    %c0_i32_0 = arith.constant 0 : i32
    return %c0_i32, %arg1 : i32, i32
  }
  func.func @transform_3(%arg0: i32, %arg1: i32) -> (i32, i32) {
    %c0_i32 = arith.constant 0 : i32
    return %arg0, %arg1 : i32, i32
  }
}

module attributes {stable_mosaic.version = 11 : i64} {
  func.func @_gemm_bias_act_kernel(%arg0: i32, %arg1: i32, %arg2: memref<256x1024xbf16, #tpu.memory_space<vmem>>, %arg3: memref<1024x128xbf16, #tpu.memory_space<vmem>>, %arg4: memref<1x128xf32, #tpu.memory_space<vmem>>, %arg5: memref<256x128xbf16, #tpu.memory_space<vmem>>) attributes {dimension_semantics = [#tpu.dimension_semantics<parallel>, #tpu.dimension_semantics<parallel>], iteration_bounds = array<i64: 1, 1>, scalar_prefetch = 0 : i64, scratch_operands = 0 : i64, tpu.core_type = #tpu.core_type<tc>, window_params = [{transform_indices = @transform_0, window_bounds = array<i64: 256, 1024>}, {transform_indices = @transform_1, window_bounds = array<i64: 1024, 128>}, {transform_indices = @transform_2, window_bounds = array<i64: 1, 128>}, {transform_indices = @transform_3, window_bounds = array<i64: 256, 128>}]} {
    %c0 = arith.constant 0 : index
    %c0_0 = arith.constant 0 : index
    %0 = vector.load %arg2[%c0, %c0_0] : memref<256x1024xbf16, #tpu.memory_space<vmem>>, vector<256x1024xbf16>
    %c0_1 = arith.constant 0 : index
    %c0_2 = arith.constant 0 : index
    %1 = vector.load %arg3[%c0_1, %c0_2] : memref<1024x128xbf16, #tpu.memory_space<vmem>>, vector<1024x128xbf16>
    %cst = arith.constant dense<0.000000e+00> : vector<256x128xf32>
    %2 = tpu.matmul %0, %1, %cst {dimension_numbers = #tpu.dot_dimension_numbers<[1], [0], [0], [1], [0, 0, 1, 1], [], []>} : vector<256x1024xbf16>, vector<1024x128xbf16>, vector<256x128xf32> -> vector<256x128xf32>
    %c0_3 = arith.constant 0 : index
    %c0_4 = arith.constant 0 : index
    %3 = vector.load %arg4[%c0_3, %c0_4] : memref<1x128xf32, #tpu.memory_space<vmem>>, vector<1x128xf32>
    %4 = vector.broadcast %3 : vector<1x128xf32> to vector<256x128xf32>
    %5 = arith.addf %2, %4 : vector<256x128xf32>
    %cst_5 = arith.constant 1.000000e-01 : f32
    %6 = vector.broadcast %cst_5 : f32 to vector<256x128xf32>
    %7 = arith.mulf %6, %5 : vector<256x128xf32>
    %8 = arith.maximumf %5, %7 : vector<256x128xf32>
    %9 = arith.truncf %8 : vector<256x128xf32> to vector<256x128xbf16>
    %c0_6 = arith.constant 0 : index
    %c0_7 = arith.constant 0 : index
    %10 = vector.load %arg5[%c0_6, %c0_7] : memref<256x128xbf16, #tpu.memory_space<vmem>>, vector<256x128xbf16>
    tpu.vector_store %arg5[%c0_6, %c0_7], %9 {strides = array<i32>} : memref<256x128xbf16, #tpu.memory_space<vmem>>, vector<256x128xbf16>,
    return
  }
  func.func @transform_0(%arg0: i32, %arg1: i32) -> (i32, i32) {
    %c0_i32 = arith.constant 0 : i32
    %c0_i32_0 = arith.constant 0 : i32
    return %arg0, %c0_i32 : i32, i32
  }
  func.func @transform_1(%arg0: i32, %arg1: i32) -> (i32, i32) {
    %c0_i32 = arith.constant 0 : i32
    %c0_i32_0 = arith.constant 0 : i32
    return %c0_i32, %arg1 : i32, i32
  }
  func.func @transform_2(%arg0: i32, %arg1: i32) -> (i32, i32) {
    %c0_i32 = arith.constant 0 : i32
    %c0_i32_0 = arith.constant 0 : i32
    return %c0_i32, %arg1 : i32, i32
  }
  func.func @transform_3(%arg0: i32, %arg1: i32) -> (i32, i32) {
    %c0_i32 = arith.constant 0 : i32
    return %arg0, %arg1 : i32, i32
  }
}

module attributes {stable_mosaic.version = 11 : i64} {
  func.func @_gemm_bias_act_kernel(%arg0: i32, %arg1: i32, %arg2: memref<256x640xbf16, #tpu.memory_space<vmem>>, %arg3: memref<640x128xbf16, #tpu.memory_space<vmem>>, %arg4: memref<1x128xf32, #tpu.memory_space<vmem>>, %arg5: memref<256x128xbf16, #tpu.memory_space<vmem>>) attributes {dimension_semantics = [#tpu.dimension_semantics<parallel>, #tpu.dimension_semantics<parallel>], iteration_bounds = array<i64: 1, 1>, scalar_prefetch = 0 : i64, scratch_operands = 0 : i64, tpu.core_type = #tpu.core_type<tc>, window_params = [{transform_indices = @transform_0, window_bounds = array<i64: 256, 640>}, {transform_indices = @transform_1, window_bounds = array<i64: 640, 128>}, {transform_indices = @transform_2, window_bounds = array<i64: 1, 128>}, {transform_indices = @transform_3, window_bounds = array<i64: 256, 128>}]} {
    %c0 = arith.constant 0 : index
    %c0_0 = arith.constant 0 : index
    %0 = vector.load %arg2[%c0, %c0_0] : memref<256x640xbf16, #tpu.memory_space<vmem>>, vector<256x640xbf16>
    %c0_1 = arith.constant 0 : index
    %c0_2 = arith.constant 0 : index
    %1 = vector.load %arg3[%c0_1, %c0_2] : memref<640x128xbf16, #tpu.memory_space<vmem>>, vector<640x128xbf16>
    %cst = arith.constant dense<0.000000e+00> : vector<256x128xf32>
    %2 = tpu.matmul %0, %1, %cst {dimension_numbers = #tpu.dot_dimension_numbers<[1], [0], [0], [1], [0, 0, 1, 1], [], []>} : vector<256x640xbf16>, vector<640x128xbf16>, vector<256x128xf32> -> vector<256x128xf32>
    %c0_3 = arith.constant 0 : index
    %c0_4 = arith.constant 0 : index
    %3 = vector.load %arg4[%c0_3, %c0_4] : memref<1x128xf32, #tpu.memory_space<vmem>>, vector<1x128xf32>
    %4 = vector.broadcast %3 : vector<1x128xf32> to vector<256x128xf32>
    %5 = arith.addf %2, %4 : vector<256x128xf32>
    %cst_5 = arith.constant 1.000000e-01 : f32
    %6 = vector.broadcast %cst_5 : f32 to vector<256x128xf32>
    %7 = arith.mulf %6, %5 : vector<256x128xf32>
    %8 = arith.maximumf %5, %7 : vector<256x128xf32>
    %9 = arith.truncf %8 : vector<256x128xf32> to vector<256x128xbf16>
    %c0_6 = arith.constant 0 : index
    %c0_7 = arith.constant 0 : index
    %10 = vector.load %arg5[%c0_6, %c0_7] : memref<256x128xbf16, #tpu.memory_space<vmem>>, vector<256x128xbf16>
    tpu.vector_store %arg5[%c0_6, %c0_7], %9 {strides = array<i32>} : memref<256x128xbf16, #tpu.memory_space<vmem>>, vector<256x128xbf16>,
    return
  }
  func.func @transform_0(%arg0: i32, %arg1: i32) -> (i32, i32) {
    %c0_i32 = arith.constant 0 : i32
    %c0_i32_0 = arith.constant 0 : i32
    return %arg0, %c0_i32 : i32, i32
  }
  func.func @transform_1(%arg0: i32, %arg1: i32) -> (i32, i32) {
    %c0_i32 = arith.constant 0 : i32
    %c0_i32_0 = arith.constant 0 : i32
    return %c0_i32, %arg1 : i32, i32
  }
  func.func @transform_2(%arg0: i32, %arg1: i32) -> (i32, i32) {
    %c0_i32 = arith.constant 0 : i32
    %c0_i32_0 = arith.constant 0 : i32
    return %c0_i32, %arg1 : i32, i32
  }
  func.func @transform_3(%arg0: i32, %arg1: i32) -> (i32, i32) {
    %c0_i32 = arith.constant 0 : i32
    return %arg0, %arg1 : i32, i32
  }
}

module attributes {stable_mosaic.version = 11 : i64} {
  func.func @_gemm_bias_act_kernel(%arg0: i32, %arg1: i32, %arg2: memref<256x640xbf16, #tpu.memory_space<vmem>>, %arg3: memref<640x128xbf16, #tpu.memory_space<vmem>>, %arg4: memref<1x128xf32, #tpu.memory_space<vmem>>, %arg5: memref<256x1xf32, #tpu.memory_space<vmem>>) attributes {dimension_semantics = [#tpu.dimension_semantics<parallel>, #tpu.dimension_semantics<parallel>], iteration_bounds = array<i64: 1, 1>, scalar_prefetch = 0 : i64, scratch_operands = 0 : i64, tpu.core_type = #tpu.core_type<tc>, window_params = [{transform_indices = @transform_0, window_bounds = array<i64: 256, 640>}, {transform_indices = @transform_1, window_bounds = array<i64: 640, 128>}, {transform_indices = @transform_2, window_bounds = array<i64: 1, 128>}, {transform_indices = @transform_3, window_bounds = array<i64: 256, 1>}]} {
    %c0 = arith.constant 0 : index
    %c0_0 = arith.constant 0 : index
    %0 = vector.load %arg2[%c0, %c0_0] : memref<256x640xbf16, #tpu.memory_space<vmem>>, vector<256x640xbf16>
    %c0_1 = arith.constant 0 : index
    %c0_2 = arith.constant 0 : index
    %1 = vector.load %arg3[%c0_1, %c0_2] : memref<640x128xbf16, #tpu.memory_space<vmem>>, vector<640x128xbf16>
    %cst = arith.constant dense<0.000000e+00> : vector<256x128xf32>
    %2 = tpu.matmul %0, %1, %cst {dimension_numbers = #tpu.dot_dimension_numbers<[1], [0], [0], [1], [0, 0, 1, 1], [], []>} : vector<256x640xbf16>, vector<640x128xbf16>, vector<256x128xf32> -> vector<256x128xf32>
    %c0_3 = arith.constant 0 : index
    %c0_4 = arith.constant 0 : index
    %3 = vector.load %arg4[%c0_3, %c0_4] : memref<1x128xf32, #tpu.memory_space<vmem>>, vector<1x128xf32>
    %4 = vector.broadcast %3 : vector<1x128xf32> to vector<256x128xf32>
    %5 = arith.addf %2, %4 : vector<256x128xf32>
    %6 = vector.extract_strided_slice %5 {offsets = [0, 0], sizes = [256, 1], strides = [1, 1]} : vector<256x128xf32> to vector<256x1xf32>
    %c0_5 = arith.constant 0 : index
    %c0_6 = arith.constant 0 : index
    %7 = vector.load %arg5[%c0_5, %c0_6] : memref<256x1xf32, #tpu.memory_space<vmem>>, vector<256x1xf32>
    tpu.vector_store %arg5[%c0_5, %c0_6], %6 {strides = array<i32>} : memref<256x1xf32, #tpu.memory_space<vmem>>, vector<256x1xf32>,
    return
  }
  func.func @transform_0(%arg0: i32, %arg1: i32) -> (i32, i32) {
    %c0_i32 = arith.constant 0 : i32
    %c0_i32_0 = arith.constant 0 : i32
    return %arg0, %c0_i32 : i32, i32
  }
  func.func @transform_1(%arg0: i32, %arg1: i32) -> (i32, i32) {
    %c0_i32 = arith.constant 0 : i32
    %c0_i32_0 = arith.constant 0 : i32
    return %c0_i32, %arg1 : i32, i32
  }
  func.func @transform_2(%arg0: i32, %arg1: i32) -> (i32, i32) {
    %c0_i32 = arith.constant 0 : i32
    %c0_i32_0 = arith.constant 0 : i32
    return %c0_i32, %arg1 : i32, i32
  }
  func.func @transform_3(%arg0: i32, %arg1: i32) -> (i32, i32) {
    %c0_i32 = arith.constant 0 : i32
    return %arg0, %arg1 : i32, i32
  }
}

</mosaic_0001>

<bundles_post_ra>
// kernel: _mrd_forward.7
= control target key start
LH: loop header
LB: loop body
LE: loop exit
PB: predicated region body
PF: predicated region fallthrough
CT: control target
= control target key end

     0   :  { %s1756_s1 = inlined_call_operand.vmem [shape: bf16[128,256], index: 1, kind: input, shape index: {}]   ;;  %s1757_s0 = inlined_call_operand.vmem [shape: bf16[256,128], index: 0, kind: input, shape index: {}]   ;;  %s1758_s2 = inlined_call_operand.vmem [shape: f32[256,128], index: 2, kind: output, shape index: {}]  }
   0x1   :  { %v1051_v0 = vld [vmem:[%s1756_s1 + $0x70] sm:$0xf]  ;;  %v1088_v1 = vld [vmem:[%s1756_s1 + $0x74] sm:$0xf0]  ;;  %v1087_v2 = vld [vmem:[%s1756_s1 + $0x74] sm:$0xf] }
   0x2   :  { %v1052_v3 = vor.u32 %v1088_v1, %v1051_v0  ;;  %v1053_v4 = vld [vmem:[%s1756_s1 + $0x78] sm:$0xf0]  ;;  %v1043_v5 = vld [vmem:[%s1756_s1 + $0x60] sm:$0xf]  ;;  %v1086_v6 = vld [vmem:[%s1756_s1 + $0x64] sm:$0xf0] }
   0x3   :  { %v1056_v7 = vor.u32 %v1087_v2, %v1053_v4  ;;  %v1085_v8 = vld [vmem:[%s1756_s1 + $0x64] sm:$0xf]  ;;  %v1045_v9 = vld [vmem:[%s1756_s1 + $0x68] sm:$0xf0]  ;;  %v1044_v10 = vor.u32 %v1086_v6, %v1043_v5  ;;  %v1035_v12 = vld [vmem:[%s1756_s1 + $0x50] sm:$0xf] }
   0x4   :  { %235 = vmatpush.bf16.msra.mxu0 %v1052_v3  ;;  %1089 = vmatpush.bf16.msra.mxu2 %v1052_v3  ;;  %v1048_v11 = vor.u32 %v1085_v8, %v1045_v9  ;;  %v1084_v13 = vld [vmem:[%s1756_s1 + $0x54] sm:$0xf0]  ;;  %v1083_v14 = vld [vmem:[%s1756_s1 + $0x54] sm:$0xf]  ;;  %v1037_v15 = vld [vmem:[%s1756_s1 + $0x58] sm:$0xf0] }
   0x5   :  { %324 = vmatpush.bf16.msra.mxu1 %v1056_v7  ;;  %1097 = vmatpush.bf16.msra.mxu3 %v1056_v7  ;;  %v1036_v16 = vor.u32 %v1084_v13, %v1035_v12  ;;  %v1040_v17 = vor.u32 %v1083_v14, %v1037_v15  ;;  %v1027_v18 = vld [vmem:[%s1756_s1 + $0x40] sm:$0xf]  ;;  %v1082_v19 = vld [vmem:[%s1756_s1 + $0x44] sm:$0xf0]  ;;  %v1081_v20 = vld [vmem:[%s1756_s1 + $0x44] sm:$0xf] }
   0x6   :  { %v1029_v21 = vld [vmem:[%s1756_s1 + $0x48] sm:$0xf0]  ;;  %v1028_v22 = vor.u32 %v1082_v19, %v1027_v18  ;;  %v1019_v24 = vld [vmem:[%s1756_s1 + $0x30] sm:$0xf]  ;;  %v1080_v25 = vld [vmem:[%s1756_s1 + $0x34] sm:$0xf0] }
   0x7   :  { %v1032_v23 = vor.u32 %v1081_v20, %v1029_v21  ;;  %v1079_v26 = vld [vmem:[%s1756_s1 + $0x34] sm:$0xf]  ;;  %v1021_v27 = vld [vmem:[%s1756_s1 + $0x38] sm:$0xf0]  ;;  %v1020_v28 = vor.u32 %v1080_v25, %v1019_v24  ;;  %v1011_v30 = vld [vmem:[%s1756_s1 + $0x20] sm:$0xf] }
   0x8   :  { %236 = vmatpush.bf16.msra.mxu0 %v1044_v10  ;;  %1090 = vmatpush.bf16.msra.mxu2 %v1044_v10  ;;  %v1024_v29 = vor.u32 %v1079_v26, %v1021_v27  ;;  %v1078_v31 = vld [vmem:[%s1756_s1 + $0x24] sm:$0xf0]  ;;  %v1077_v32 = vld [vmem:[%s1756_s1 + $0x24] sm:$0xf]  ;;  %v1013_v33 = vld [vmem:[%s1756_s1 + $0x28] sm:$0xf0] }
   0x9   :  { %325 = vmatpush.bf16.msra.mxu1 %v1048_v11  ;;  %1098 = vmatpush.bf16.msra.mxu3 %v1048_v11  ;;  %v1012_v34 = vor.u32 %v1078_v31, %v1011_v30  ;;  %v1016_v35 = vor.u32 %v1077_v32, %v1013_v33  ;;  %v1003_v36 = vld [vmem:[%s1756_s1 + $0x10] sm:$0xf]  ;;  %v1076_v37 = vld [vmem:[%s1756_s1 + $0x14] sm:$0xf0]  ;;  %v1075_v38 = vld [vmem:[%s1756_s1 + $0x14] sm:$0xf] }
   0xa   :  { %v1005_v39 = vld [vmem:[%s1756_s1 + $0x18] sm:$0xf0]  ;;  %v1004_v40 = vor.u32 %v1076_v37, %v1003_v36  ;;  %v995_v42 = vld [vmem:[%s1756_s1] sm:$0xf]  ;;  %v1074_v43 = vld [vmem:[%s1756_s1 + $0x4] sm:$0xf0] }
   0xb   :  { %v1008_v41 = vor.u32 %v1075_v38, %v1005_v39  ;;  %v1073_v44 = vld [vmem:[%s1756_s1 + $0x4] sm:$0xf]  ;;  %v997_v45 = vld [vmem:[%s1756_s1 + $0x8] sm:$0xf0]  ;;  %v996_v46 = vor.u32 %v1074_v43, %v995_v42  ;;  %v1059_v52 = vld [vmem:[%s1757_s0 + $0x10] sm:$0xff] }
   0xc   :  { %237 = vmatpush.bf16.msra.mxu0 %v1036_v16  ;;  %1091 = vmatpush.bf16.msra.mxu2 %v1036_v16  ;;  %v1000_v47 = vor.u32 %v1073_v44, %v997_v45  ;;  %v1057_v48 = vld [vmem:[%s1757_s0] sm:$0xff]  ;;  %v1058_v50 = vld [vmem:[%s1757_s0 + $0x8] sm:$0xff]  ;;  %v1067_v53 = vld [vmem:[%s1757_s0 + $0x50] sm:$0xff] }
   0xd   :  { %326 = vmatpush.bf16.msra.mxu1 %v1040_v17  ;;  %1099 = vmatpush.bf16.msra.mxu3 %v1040_v17  ;;  %v1065_v49 = vld [vmem:[%s1757_s0 + $0x40] sm:$0xff]  ;;  %v1066_v51 = vld [vmem:[%s1757_s0 + $0x48] sm:$0xff]  ;;  %v1060_v54 = vld [vmem:[%s1757_s0 + $0x18] sm:$0xff] }
   0xe   :  { %v1068_v55 = vld [vmem:[%s1757_s0 + $0x58] sm:$0xff]  ;;  %v1061_v56 = vld [vmem:[%s1757_s0 + $0x20] sm:$0xff]  ;;  %v1062_v58 = vld [vmem:[%s1757_s0 + $0x28] sm:$0xff] }
   0xf   :  { %v1069_v57 = vld [vmem:[%s1757_s0 + $0x60] sm:$0xff]  ;;  %v1070_v59 = vld [vmem:[%s1757_s0 + $0x68] sm:$0xff]  ;;  %v1063_v60 = vld [vmem:[%s1757_s0 + $0x30] sm:$0xff] }
  0x10   :  { %238 = vmatpush.bf16.msra.mxu0 %v1028_v22  ;;  %1092 = vmatpush.bf16.msra.mxu2 %v1028_v22  ;;  %v1071_v61 = vld [vmem:[%s1757_s0 + $0x70] sm:$0xff]  ;;  %v1064_v62 = vld [vmem:[%s1757_s0 + $0x38] sm:$0xff] }
  0x11   :  { %327 = vmatpush.bf16.msra.mxu1 %v1032_v23  ;;  %1100 = vmatpush.bf16.msra.mxu3 %v1032_v23  ;;  %v1072_v63 = vld [vmem:[%s1757_s0 + $0x78] sm:$0xff] }
  0x14   :  { %239 = vmatpush.bf16.msra.mxu0 %v1020_v28  ;;  %1093 = vmatpush.bf16.msra.mxu2 %v1020_v28 }
  0x15   :  { %328 = vmatpush.bf16.msra.mxu1 %v1024_v29  ;;  %1101 = vmatpush.bf16.msra.mxu3 %v1024_v29 }
  0x18   :  { %240 = vmatpush.bf16.msra.mxu0 %v1012_v34  ;;  %1094 = vmatpush.bf16.msra.mxu2 %v1012_v34 }
  0x19   :  { %329 = vmatpush.bf16.msra.mxu1 %v1016_v35  ;;  %1102 = vmatpush.bf16.msra.mxu3 %v1016_v35 }
  0x1c   :  { %241 = vmatpush.bf16.msra.mxu0 %v1004_v40  ;;  %1095 = vmatpush.bf16.msra.mxu2 %v1004_v40 }
  0x1d   :  { %330 = vmatpush.bf16.msra.mxu1 %v1008_v41  ;;  %1103 = vmatpush.bf16.msra.mxu3 %v1008_v41 }
  0x20   :  { %242 = vmatpush.bf16.msra.mxu0 %v996_v46  ;;  %1096 = vmatpush.bf16.msra.mxu2 %v996_v46 }
  0x21   :  { %331 = vmatpush.bf16.msra.mxu1 %v1000_v47  ;;  %1104 = vmatpush.bf16.msra.mxu3 %v1000_v47 }
  0x23   :  { %243 = vmatmul.bf16.vlgmr.msra.gmra.mxu0 %v1057_v48  ;;  %283 = vmatmul.bf16.vlgmr.msra.gmra.mxu2 %v1065_v49 }
  0x24   :  { %332 = vmatmul.bf16.vlgmr.msra.gmra.mxu1 %v1057_v48  ;;  %372 = vmatmul.bf16.vlgmr.msra.gmra.mxu3 %v1065_v49 }
  0x33   :  { %248 = vmatmul.bf16.gmra.mxu0 %v1058_v50  ;;  %288 = vmatmul.bf16.gmra.mxu2 %v1066_v51 }
  0x34   :  { %337 = vmatmul.bf16.gmra.mxu1 %v1058_v50  ;;  %377 = vmatmul.bf16.gmra.mxu3 %v1066_v51 }
  0x43   :  { %253 = vmatmul.bf16.gmra.mxu0 %v1059_v52  ;;  %293 = vmatmul.bf16.gmra.mxu2 %v1067_v53 }
  0x44   :  { %342 = vmatmul.bf16.gmra.mxu1 %v1059_v52  ;;  %382 = vmatmul.bf16.gmra.mxu3 %v1067_v53 }
  0x53   :  { %258 = vmatmul.bf16.gmra.mxu0 %v1060_v54  ;;  %298 = vmatmul.bf16.gmra.mxu2 %v1068_v55 }
  0x54   :  { %347 = vmatmul.bf16.gmra.mxu1 %v1060_v54  ;;  %387 = vmatmul.bf16.gmra.mxu3 %v1068_v55 }
  0x63   :  { %263 = vmatmul.bf16.gmra.mxu0 %v1061_v56  ;;  %303 = vmatmul.bf16.gmra.mxu2 %v1069_v57 }
  0x64   :  { %352 = vmatmul.bf16.gmra.mxu1 %v1061_v56  ;;  %392 = vmatmul.bf16.gmra.mxu3 %v1069_v57 }
  0x73   :  { %268 = vmatmul.bf16.gmra.mxu0 %v1062_v58  ;;  %308 = vmatmul.bf16.gmra.mxu2 %v1070_v59 }
  0x74   :  { %357 = vmatmul.bf16.gmra.mxu1 %v1062_v58  ;;  %397 = vmatmul.bf16.gmra.mxu3 %v1070_v59 }
  0x83   :  { %273 = vmatmul.bf16.gmra.mxu0 %v1063_v60  ;;  %313 = vmatmul.bf16.gmra.mxu2 %v1071_v61 }
  0x84   :  { %362 = vmatmul.bf16.gmra.mxu1 %v1063_v60  ;;  %402 = vmatmul.bf16.gmra.mxu3 %v1071_v61 }
  0x93   :  { %278 = vmatmul.bf16.gmra.mxu0 %v1064_v62  ;;  %318 = vmatmul.bf16.gmra.mxu2 %v1072_v63 }
  0x94   :  { %367 = vmatmul.bf16.gmra.mxu1 %v1064_v62  ;;  %407 = vmatmul.bf16.gmra.mxu3 %v1072_v63 }
  0xa0   :  { %v244_v0 = vpop.f32.mrf.mxu0 }
  0xa1   :  { %v413_v1 = vmul.f32 %v244_v0, %v244_v0  ;;  %v333_v2 = vpop.f32.mrf.mxu1 }
  0xa2   :  { %v445_v3 = vmul.f32 %v333_v2, %v333_v2 }
  0xa4   :  { %v477_v4 = vadd.f32 %v445_v3, %v413_v1 }
  0xa6   :  { %1105 = vrsqrt.f32 %v477_v4  ;;  %v284_v5 = vpop.f32.mrf.mxu2  ;;  %vm516_vm0 = vcmp.eq.f32.partialorder %v477_v4, inf  ;;  %vm518_vm1 = vcmp.eq.f32.partialorder %v477_v4, 0.0  ;;  %v519_v40 = vand.u32 2147483648, %v477_v4 }
  0xa7   :  { %v429_v6 = vmul.f32 %v284_v5, %v284_v5  ;;  %v373_v7 = vpop.f32.mrf.mxu3 }
  0xa8   :  { %v461_v8 = vmul.f32 %v373_v7, %v373_v7  ;;  %v246_v9 = vpop.f32.mrf.mxu0 }
  0xa9   :  { %v414_v10 = vmul.f32 %v246_v9, %v246_v9  ;;  %v335_v11 = vpop.f32.mrf.mxu1 }
  0xaa   :  { %v1328_v12 = vadd.f32 %v461_v8, %v429_v6  ;;  %v446_v13 = vmul.f32 %v335_v11, %v335_v11 }
  0xac   :  { %v1106_v14 = vpop.eup %1105  ;;  %1107 = vrsqrt.f32 %v1328_v12  ;;  %v1331_v16 = vadd.f32 %v446_v13, %v414_v10  ;;  %vm708_vm2 = vcmp.eq.f32.partialorder %v1328_v12, inf  ;;  %vm710_vm3 = vcmp.eq.f32.partialorder %v1328_v12, 0.0 }
  0xad   :  { %v510_v15 = vmul.f32 %v1106_v14, %v477_v4  ;;  %v711_v61 = vand.u32 2147483648, %v1328_v12 }
  0xae   :  { %v286_v17 = vpop.f32.mrf.mxu2  ;;  %1109 = vrsqrt.f32 %v1331_v16  ;;  %vm528_vm4 = vcmp.eq.f32.partialorder %v1331_v16, inf  ;;  %vm530_vm5 = vcmp.eq.f32.partialorder %v1331_v16, 0.0  ;;  %v531_v8 = vand.u32 2147483648, %v1331_v16 }
  0xaf   :  { %v511_v18 = vmul.f32 %v1106_v14, %v510_v15  ;;  %v375_v19 = vpop.f32.mrf.mxu3  ;;  %v430_v20 = vmul.f32 %v286_v17, %v286_v17 }
  0xb0   :  { %v462_v21 = vmul.f32 %v375_v19, %v375_v19  ;;  %v249_v22 = vpop.f32.mrf.mxu0 }
  0xb1   :  { %v512_v23 = vmul.f32 0.5, %v511_v18  ;;  %v415_v24 = vmul.f32 %v249_v22, %v249_v22  ;;  %v338_v25 = vpop.f32.mrf.mxu1 }
  0xb2   :  { %v1108_v26 = vpop.eup %1107  ;;  %v1334_v27 = vadd.f32 %v462_v21, %v430_v20  ;;  %v447_v28 = vmul.f32 %v338_v25, %v338_v25 }
  0xb3   :  { %v513_v29 = vsub.f32 1.5, %v512_v23  ;;  %v702_v30 = vmul.f32 %v1108_v26, %v1328_v12 }
  0xb4   :  { %1111 = vrsqrt.f32 %v1334_v27  ;;  %v1110_v31 = vpop.eup %1109  ;;  %v1338_v34 = vadd.f32 %v447_v28, %v415_v24  ;;  %vm720_vm6 = vcmp.eq.f32.partialorder %v1334_v27, inf  ;;  %vm722_vm7 = vcmp.eq.f32.partialorder %v1334_v27, 0.0 }
  0xb5   :  { %v514_v32 = vmul.f32 %v1106_v14, %v513_v29  ;;  %v703_v33 = vmul.f32 %v1108_v26, %v702_v30  ;;  %v522_v35 = vmul.f32 %v1110_v31, %v1331_v16 }
  0xb6   :  { %v289_v36 = vpop.f32.mrf.mxu2  ;;  %1113 = vrsqrt.f32 %v1338_v34  ;;  %vm540_vm8 = vcmp.eq.f32.partialorder %v1338_v34, inf  ;;  %vm542_vm9 = vcmp.eq.f32.partialorder %v1338_v34, 0.0 }
  0xb7   :  { %v515_v37 = vmul.f32 %v514_v32, %v477_v4  ;;  %v704_v38 = vmul.f32 0.5, %v703_v33  ;;  %v378_v39 = vpop.f32.mrf.mxu3  ;;  %v523_v41 = vmul.f32 %v1110_v31, %v522_v35  ;;  %v431_v42 = vmul.f32 %v289_v36, %v289_v36 }
  0xb8   :  { %v251_v43 = vpop.f32.mrf.mxu0  ;;  %v463_v46 = vmul.f32 %v378_v39, %v378_v39 }
  0xb9   :  { %v517_v44 = vsel %vm516_vm0, %v477_v4, %v515_v37  ;;  %v705_v45 = vsub.f32 1.5, %v704_v38  ;;  %v416_v47 = vmul.f32 %v251_v43, %v251_v43  ;;  %v340_v48 = vpop.f32.mrf.mxu1  ;;  %v524_v51 = vmul.f32 0.5, %v523_v41 }
  0xba   :  { %v1112_v49 = vpop.eup %1111  ;;  %v520_v50 = vsel %vm518_vm1, %v519_v40, %v517_v44  ;;  %v448_v52 = vmul.f32 %v340_v48, %v340_v48  ;;  %v1346_v55 = vadd.f32 %v463_v46, %v431_v42  ;;  %v543_v40 = vand.u32 2147483648, %v1338_v34 }
  0xbb   :  { %893 = vst [vmem:[%s1758_s2] sm:$0xff] %v520_v50  ;;  %v706_v53 = vmul.f32 %v1108_v26, %v705_v45  ;;  %v714_v54 = vmul.f32 %v1112_v49, %v1334_v27  ;;  %v525_v56 = vsub.f32 1.5, %v524_v51  ;;  %v723_v26 = vand.u32 2147483648, %v1334_v27 }
  0xbc   :  { %v1348_v57 = vadd.f32 %v448_v52, %v416_v47  ;;  %v1114_v58 = vpop.eup %1113  ;;  %1115 = vrsqrt.f32 %v1346_v55  ;;  %vm732_vm10 = vcmp.eq.f32.partialorder %v1346_v55, inf  ;;  %vm734_vm11 = vcmp.eq.f32.partialorder %v1346_v55, 0.0 }
  0xbd   :  { %v707_v59 = vmul.f32 %v706_v53, %v1328_v12  ;;  %v715_v60 = vmul.f32 %v1112_v49, %v714_v54  ;;  %v526_v62 = vmul.f32 %v1110_v31, %v525_v56  ;;  %v534_v63 = vmul.f32 %v1114_v58, %v1338_v34 }
  0xbe   :  { %v291_v0 = vpop.f32.mrf.mxu2  ;;  %1117 = vrsqrt.f32 %v1348_v57  ;;  %vm552_vm12 = vcmp.eq.f32.partialorder %v1348_v57, inf  ;;  %vm554_vm13 = vcmp.eq.f32.partialorder %v1348_v57, 0.0 }
  0xbf   :  { %v709_v1 = vsel %vm708_vm2, %v1328_v12, %v707_v59  ;;  %v716_v2 = vmul.f32 0.5, %v715_v60  ;;  %v380_v3 = vpop.f32.mrf.mxu3  ;;  %v527_v5 = vmul.f32 %v526_v62, %v1331_v16  ;;  %v535_v6 = vmul.f32 %v1114_v58, %v534_v63 }
  0xc0   :  { %v712_v4 = vsel %vm710_vm3, %v711_v61, %v709_v1  ;;  %v254_v7 = vpop.f32.mrf.mxu0  ;;  %v432_v10 = vmul.f32 %v291_v0, %v291_v0  ;;  %v464_v11 = vmul.f32 %v380_v3, %v380_v3  ;;  %v555_v63 = vand.u32 2147483648, %v1348_v57 }
  0xc1   :  { %909 = vst [vmem:[%s1758_s2 + $0x80] sm:$0xff] %v712_v4  ;;  %v717_v9 = vsub.f32 1.5, %v716_v2  ;;  %v343_v12 = vpop.f32.mrf.mxu1  ;;  %v529_v13 = vsel %vm528_vm4, %v1331_v16, %v527_v5  ;;  %v536_v14 = vmul.f32 0.5, %v535_v6  ;;  %v417_v15 = vmul.f32 %v254_v7, %v254_v7 }
  0xc2   :  { %v449_v17 = vmul.f32 %v343_v12, %v343_v12  ;;  %v1116_v18 = vpop.eup %1115  ;;  %v532_v19 = vsel %vm530_vm5, %v531_v8, %v529_v13  ;;  %v1366_v21 = vadd.f32 %v464_v11, %v432_v10 }
  0xc3   :  { %v718_v20 = vmul.f32 %v1112_v49, %v717_v9  ;;  %894 = vst [vmem:[%s1758_s2 + $0x8] sm:$0xff] %v532_v19  ;;  %v537_v22 = vsub.f32 1.5, %v536_v14  ;;  %v726_v23 = vmul.f32 %v1116_v18, %v1346_v55 }
  0xc4   :  { %v1372_v24 = vadd.f32 %v449_v17, %v417_v15  ;;  %v1118_v25 = vpop.eup %1117  ;;  %1119 = vrsqrt.f32 %v1366_v21  ;;  %vm744_vm14 = vcmp.eq.f32.partialorder %v1366_v21, inf  ;;  %vm746_vm15 = vcmp.eq.f32.partialorder %v1366_v21, 0.0 }
  0xc5   :  { %v719_v16 = vmul.f32 %v718_v20, %v1334_v27  ;;  %v538_v28 = vmul.f32 %v1114_v58, %v537_v22  ;;  %v727_v29 = vmul.f32 %v1116_v18, %v726_v23  ;;  %v546_v30 = vmul.f32 %v1118_v25, %v1348_v57 }
  0xc6   :  { %v294_v31 = vpop.f32.mrf.mxu2  ;;  %1121 = vrsqrt.f32 %v1372_v24  ;;  %vm564_vm0 = vcmp.eq.f32.partialorder %v1372_v24, inf  ;;  %vm566_vm1 = vcmp.eq.f32.partialorder %v1372_v24, 0.0 }
  0xc7   :  { %v721_v32 = vsel %vm720_vm6, %v1334_v27, %v719_v16  ;;  %v383_v33 = vpop.f32.mrf.mxu3  ;;  %v539_v36 = vmul.f32 %v538_v28, %v1338_v34  ;;  %v728_v37 = vmul.f32 0.5, %v727_v29  ;;  %v547_v38 = vmul.f32 %v1118_v25, %v546_v30 }
  0xc8   :  { %v724_v35 = vsel %vm722_vm7, %v723_v26, %v721_v32  ;;  %v256_v39 = vpop.f32.mrf.mxu0  ;;  %v433_v27 = vmul.f32 %v294_v31, %v294_v31  ;;  %v465_v41 = vmul.f32 %v383_v33, %v383_v33  ;;  %v567_v30 = vand.u32 2147483648, %v1372_v24 }
  0xc9   :  { %910 = vst [vmem:[%s1758_s2 + $0x88] sm:$0xff] %v724_v35  ;;  %v418_v42 = vmul.f32 %v256_v39, %v256_v39  ;;  %v345_v43 = vpop.f32.mrf.mxu1  ;;  %v541_v44 = vsel %vm540_vm8, %v1338_v34, %v539_v36  ;;  %v729_v45 = vsub.f32 1.5, %v728_v37  ;;  %v548_v46 = vmul.f32 0.5, %v547_v38 }
  0xca   :  { %v450_v47 = vmul.f32 %v345_v43, %v345_v43  ;;  %v1120_v48 = vpop.eup %1119  ;;  %v544_v49 = vsel %vm542_vm9, %v543_v40, %v541_v44  ;;  %v1392_v50 = vadd.f32 %v465_v41, %v433_v27  ;;  %v735_v34 = vand.u32 2147483648, %v1346_v55 }
  0xcb   :  { %895 = vst [vmem:[%s1758_s2 + $0x10] sm:$0xff] %v544_v49  ;;  %v730_v51 = vmul.f32 %v1116_v18, %v729_v45  ;;  %v549_v52 = vsub.f32 1.5, %v548_v46  ;;  %v738_v53 = vmul.f32 %v1120_v48, %v1366_v21 }
  0xcc   :  { %v1398_v54 = vadd.f32 %v450_v47, %v418_v42  ;;  %v1122_v56 = vpop.eup %1121  ;;  %1123 = vrsqrt.f32 %v1392_v50  ;;  %vm756_vm2 = vcmp.eq.f32.partialorder %v1392_v50, inf  ;;  %vm758_vm3 = vcmp.eq.f32.partialorder %v1392_v50, 0.0 }
  0xcd   :  { %v731_v58 = vmul.f32 %v730_v51, %v1346_v55  ;;  %v550_v59 = vmul.f32 %v1118_v25, %v549_v52  ;;  %v739_v60 = vmul.f32 %v1120_v48, %v738_v53  ;;  %v558_v61 = vmul.f32 %v1122_v56, %v1372_v24 }
  0xce   :  { %v296_v62 = vpop.f32.mrf.mxu2  ;;  %1125 = vrsqrt.f32 %v1398_v54  ;;  %vm576_vm4 = vcmp.eq.f32.partialorder %v1398_v54, inf  ;;  %vm578_vm5 = vcmp.eq.f32.partialorder %v1398_v54, 0.0 }
  0xcf   :  { %v385_v0 = vpop.f32.mrf.mxu3  ;;  %v733_v1 = vsel %vm732_vm10, %v1346_v55, %v731_v58  ;;  %v551_v2 = vmul.f32 %v550_v59, %v1348_v57  ;;  %v740_v3 = vmul.f32 0.5, %v739_v60  ;;  %v559_v4 = vmul.f32 %v1122_v56, %v558_v61 }
  0xd0   :  { %v259_v5 = vpop.f32.mrf.mxu0  ;;  %v736_v6 = vsel %vm734_vm11, %v735_v34, %v733_v1  ;;  %v434_v7 = vmul.f32 %v296_v62, %v296_v62  ;;  %v466_v8 = vmul.f32 %v385_v0, %v385_v0  ;;  %v579_v61 = vand.u32 2147483648, %v1398_v54 }
  0xd1   :  { %v419_v9 = vmul.f32 %v259_v5, %v259_v5  ;;  %v348_v10 = vpop.f32.mrf.mxu1  ;;  %911 = vst [vmem:[%s1758_s2 + $0x90] sm:$0xff] %v736_v6  ;;  %v553_v11 = vsel %vm552_vm12, %v1348_v57, %v551_v2  ;;  %v741_v12 = vsub.f32 1.5, %v740_v3  ;;  %v560_v13 = vmul.f32 0.5, %v559_v4 }
  0xd2   :  { %v451_v14 = vmul.f32 %v348_v10, %v348_v10  ;;  %v1124_v15 = vpop.eup %1123  ;;  %v556_v55 = vsel %vm554_vm13, %v555_v63, %v553_v11  ;;  %v1422_v17 = vadd.f32 %v466_v8, %v434_v7  ;;  %v747_v57 = vand.u32 2147483648, %v1366_v21 }
  0xd3   :  { %896 = vst [vmem:[%s1758_s2 + $0x18] sm:$0xff] %v556_v55  ;;  %v742_v18 = vmul.f32 %v1120_v48, %v741_v12  ;;  %v561_v19 = vsub.f32 1.5, %v560_v13  ;;  %v750_v20 = vmul.f32 %v1124_v15, %v1392_v50 }
  0xd4   :  { %v1428_v22 = vadd.f32 %v451_v14, %v419_v9  ;;  %v1126_v23 = vpop.eup %1125  ;;  %1127 = vrsqrt.f32 %v1422_v17  ;;  %vm768_vm6 = vcmp.eq.f32.partialorder %v1422_v17, inf  ;;  %vm770_vm7 = vcmp.eq.f32.partialorder %v1422_v17, 0.0 }
  0xd5   :  { %v743_v25 = vmul.f32 %v742_v18, %v1366_v21  ;;  %v562_v16 = vmul.f32 %v1122_v56, %v561_v19  ;;  %v751_v26 = vmul.f32 %v1124_v15, %v750_v20  ;;  %v570_v28 = vmul.f32 %v1126_v23, %v1398_v54 }
  0xd6   :  { %v299_v29 = vpop.f32.mrf.mxu2  ;;  %1129 = vrsqrt.f32 %v1428_v22  ;;  %vm588_vm8 = vcmp.eq.f32.partialorder %v1428_v22, inf  ;;  %vm590_vm9 = vcmp.eq.f32.partialorder %v1428_v22, 0.0 }
  0xd7   :  { %v388_v31 = vpop.f32.mrf.mxu3  ;;  %v745_v32 = vsel %vm744_vm14, %v1366_v21, %v743_v25  ;;  %v563_v33 = vmul.f32 %v562_v16, %v1372_v24  ;;  %v752_v35 = vmul.f32 0.5, %v751_v26  ;;  %v571_v36 = vmul.f32 %v1126_v23, %v570_v28 }
  0xd8   :  { %v261_v37 = vpop.f32.mrf.mxu0  ;;  %v748_v38 = vsel %vm746_vm15, %v747_v57, %v745_v32  ;;  %v435_v39 = vmul.f32 %v299_v29, %v299_v29  ;;  %v467_v40 = vmul.f32 %v388_v31, %v388_v31  ;;  %v591_v28 = vand.u32 2147483648, %v1428_v22 }
  0xd9   :  { %v420_v27 = vmul.f32 %v261_v37, %v261_v37  ;;  %v350_v41 = vpop.f32.mrf.mxu1  ;;  %912 = vst [vmem:[%s1758_s2 + $0x98] sm:$0xff] %v748_v38  ;;  %v565_v42 = vsel %vm564_vm0, %v1372_v24, %v563_v33  ;;  %v753_v43 = vsub.f32 1.5, %v752_v35  ;;  %v572_v44 = vmul.f32 0.5, %v571_v36 }
  0xda   :  { %v452_v45 = vmul.f32 %v350_v41, %v350_v41  ;;  %v1128_v46 = vpop.eup %1127  ;;  %v568_v21 = vsel %vm566_vm1, %v567_v30, %v565_v42  ;;  %v1452_v47 = vadd.f32 %v467_v40, %v435_v39  ;;  %v759_v24 = vand.u32 2147483648, %v1392_v50 }
  0xdb   :  { %897 = vst [vmem:[%s1758_s2 + $0x20] sm:$0xff] %v568_v21  ;;  %v754_v48 = vmul.f32 %v1124_v15, %v753_v43  ;;  %v573_v49 = vsub.f32 1.5, %v572_v44  ;;  %v762_v51 = vmul.f32 %v1128_v46, %v1422_v17 }
  0xdc   :  { %v1458_v52 = vadd.f32 %v452_v45, %v420_v27  ;;  %v1130_v53 = vpop.eup %1129  ;;  %1131 = vrsqrt.f32 %v1452_v47  ;;  %vm780_vm10 = vcmp.eq.f32.partialorder %v1452_v47, inf  ;;  %vm782_vm11 = vcmp.eq.f32.partialorder %v1452_v47, 0.0 }
  0xdd   :  { %v755_v56 = vmul.f32 %v754_v48, %v1392_v50  ;;  %v574_v34 = vmul.f32 %v1126_v23, %v573_v49  ;;  %v763_v58 = vmul.f32 %v1128_v46, %v762_v51  ;;  %v582_v59 = vmul.f32 %v1130_v53, %v1428_v22 }
  0xde   :  { %v301_v60 = vpop.f32.mrf.mxu2  ;;  %1133 = vrsqrt.f32 %v1458_v52  ;;  %vm600_vm12 = vcmp.eq.f32.partialorder %v1458_v52, inf  ;;  %vm602_vm13 = vcmp.eq.f32.partialorder %v1458_v52, 0.0 }
  0xdf   :  { %v390_v62 = vpop.f32.mrf.mxu3  ;;  %v757_v63 = vsel %vm756_vm2, %v1392_v50, %v755_v56  ;;  %v575_v0 = vmul.f32 %v574_v34, %v1398_v54  ;;  %v764_v1 = vmul.f32 0.5, %v763_v58  ;;  %v583_v2 = vmul.f32 %v1130_v53, %v582_v59 }
  0xe0   :  { %v264_v3 = vpop.f32.mrf.mxu0  ;;  %v760_v4 = vsel %vm758_vm3, %v759_v24, %v757_v63  ;;  %v436_v5 = vmul.f32 %v301_v60, %v301_v60  ;;  %v468_v6 = vmul.f32 %v390_v62, %v390_v62  ;;  %v603_v59 = vand.u32 2147483648, %v1458_v52 }
  0xe1   :  { %v421_v7 = vmul.f32 %v264_v3, %v264_v3  ;;  %v353_v8 = vpop.f32.mrf.mxu1  ;;  %913 = vst [vmem:[%s1758_s2 + $0xa0] sm:$0xff] %v760_v4  ;;  %v577_v9 = vsel %vm576_vm4, %v1398_v54, %v575_v0  ;;  %v765_v10 = vsub.f32 1.5, %v764_v1  ;;  %v584_v11 = vmul.f32 0.5, %v583_v2 }
  0xe2   :  { %v453_v12 = vmul.f32 %v353_v8, %v353_v8  ;;  %v1132_v13 = vpop.eup %1131  ;;  %v580_v50 = vsel %vm578_vm5, %v579_v61, %v577_v9  ;;  %v1482_v14 = vadd.f32 %v468_v6, %v436_v5  ;;  %v771_v54 = vand.u32 2147483648, %v1422_v17 }
  0xe3   :  { %898 = vst [vmem:[%s1758_s2 + $0x28] sm:$0xff] %v580_v50  ;;  %v766_v15 = vmul.f32 %v1128_v46, %v765_v10  ;;  %v585_v55 = vsub.f32 1.5, %v584_v11  ;;  %v774_v18 = vmul.f32 %v1132_v13, %v1452_v47 }
  0xe4   :  { %v1488_v19 = vadd.f32 %v453_v12, %v421_v7  ;;  %v1134_v20 = vpop.eup %1133  ;;  %1135 = vrsqrt.f32 %v1482_v14  ;;  %vm792_vm14 = vcmp.eq.f32.partialorder %v1482_v14, inf  ;;  %vm794_vm15 = vcmp.eq.f32.partialorder %v1482_v14, 0.0 }
  0xe5   :  { %v767_v23 = vmul.f32 %v766_v15, %v1422_v17  ;;  %v586_v57 = vmul.f32 %v1130_v53, %v585_v55  ;;  %v775_v25 = vmul.f32 %v1132_v13, %v774_v18  ;;  %v594_v16 = vmul.f32 %v1134_v20, %v1458_v52 }
  0xe6   :  { %v304_v26 = vpop.f32.mrf.mxu2  ;;  %1137 = vrsqrt.f32 %v1488_v19  ;;  %vm612_vm0 = vcmp.eq.f32.partialorder %v1488_v19, inf  ;;  %vm614_vm1 = vcmp.eq.f32.partialorder %v1488_v19, 0.0 }
  0xe7   :  { %v393_v29 = vpop.f32.mrf.mxu3  ;;  %v769_v30 = vsel %vm768_vm6, %v1422_v17, %v767_v23  ;;  %v587_v31 = vmul.f32 %v586_v57, %v1428_v22  ;;  %v776_v32 = vmul.f32 0.5, %v775_v25  ;;  %v595_v33 = vmul.f32 %v1134_v20, %v594_v16 }
  0xe8   :  { %v266_v35 = vpop.f32.mrf.mxu0  ;;  %v772_v36 = vsel %vm770_vm7, %v771_v54, %v769_v30  ;;  %v437_v37 = vmul.f32 %v304_v26, %v304_v26  ;;  %v469_v38 = vmul.f32 %v393_v29, %v393_v29  ;;  %v615_v16 = vand.u32 2147483648, %v1488_v19 }
  0xe9   :  { %v422_v39 = vmul.f32 %v266_v35, %v266_v35  ;;  %v355_v40 = vpop.f32.mrf.mxu1  ;;  %914 = vst [vmem:[%s1758_s2 + $0xa8] sm:$0xff] %v772_v36  ;;  %v589_v27 = vsel %vm588_vm8, %v1428_v22, %v587_v31  ;;  %v777_v41 = vsub.f32 1.5, %v776_v32  ;;  %v596_v42 = vmul.f32 0.5, %v595_v33 }
  0xea   :  { %v454_v43 = vmul.f32 %v355_v40, %v355_v40  ;;  %v1136_v44 = vpop.eup %1135  ;;  %v592_v17 = vsel %vm590_vm9, %v591_v28, %v589_v27  ;;  %v1512_v45 = vadd.f32 %v469_v38, %v437_v37  ;;  %v783_v22 = vand.u32 2147483648, %v1452_v47 }
  0xeb   :  { %899 = vst [vmem:[%s1758_s2 + $0x30] sm:$0xff] %v592_v17  ;;  %v778_v46 = vmul.f32 %v1132_v13, %v777_v41  ;;  %v597_v21 = vsub.f32 1.5, %v596_v42  ;;  %v786_v48 = vmul.f32 %v1136_v44, %v1482_v14 }
  0xec   :  { %v1518_v49 = vadd.f32 %v454_v43, %v422_v39  ;;  %v1138_v51 = vpop.eup %1137  ;;  %1139 = vrsqrt.f32 %v1512_v45  ;;  %vm804_vm2 = vcmp.eq.f32.partialorder %v1512_v45, inf  ;;  %vm806_vm3 = vcmp.eq.f32.partialorder %v1512_v45, 0.0 }
  0xed   :  { %v779_v53 = vmul.f32 %v778_v46, %v1452_v47  ;;  %v598_v24 = vmul.f32 %v1134_v20, %v597_v21  ;;  %v787_v56 = vmul.f32 %v1136_v44, %v786_v48  ;;  %v606_v34 = vmul.f32 %v1138_v51, %v1488_v19 }
  0xee   :  { %v306_v58 = vpop.f32.mrf.mxu2  ;;  %1141 = vrsqrt.f32 %v1518_v49  ;;  %vm624_vm4 = vcmp.eq.f32.partialorder %v1518_v49, inf  ;;  %vm626_vm5 = vcmp.eq.f32.partialorder %v1518_v49, 0.0 }
  0xef   :  { %v395_v60 = vpop.f32.mrf.mxu3  ;;  %v781_v61 = vsel %vm780_vm10, %v1452_v47, %v779_v53  ;;  %v599_v62 = vmul.f32 %v598_v24, %v1458_v52  ;;  %v788_v63 = vmul.f32 0.5, %v787_v56  ;;  %v607_v0 = vmul.f32 %v1138_v51, %v606_v34 }
  0xf0   :  { %v269_v1 = vpop.f32.mrf.mxu0  ;;  %v784_v2 = vsel %vm782_vm11, %v783_v22, %v781_v61  ;;  %v438_v3 = vmul.f32 %v306_v58, %v306_v58  ;;  %v470_v4 = vmul.f32 %v395_v60, %v395_v60  ;;  %v627_v34 = vand.u32 2147483648, %v1518_v49 }
  0xf1   :  { %v423_v5 = vmul.f32 %v269_v1, %v269_v1  ;;  %v358_v6 = vpop.f32.mrf.mxu1  ;;  %915 = vst [vmem:[%s1758_s2 + $0xb0] sm:$0xff] %v784_v2  ;;  %v601_v7 = vsel %vm600_vm12, %v1458_v52, %v599_v62  ;;  %v789_v8 = vsub.f32 1.5, %v788_v63  ;;  %v608_v9 = vmul.f32 0.5, %v607_v0 }
  0xf2   :  { %v455_v10 = vmul.f32 %v358_v6, %v358_v6  ;;  %v1140_v11 = vpop.eup %1139  ;;  %v604_v47 = vsel %vm602_vm13, %v603_v59, %v601_v7  ;;  %v1542_v12 = vadd.f32 %v470_v4, %v438_v3  ;;  %v795_v52 = vand.u32 2147483648, %v1482_v14 }
  0xf3   :  { %900 = vst [vmem:[%s1758_s2 + $0x38] sm:$0xff] %v604_v47  ;;  %v790_v13 = vmul.f32 %v1136_v44, %v789_v8  ;;  %v609_v50 = vsub.f32 1.5, %v608_v9  ;;  %v798_v15 = vmul.f32 %v1140_v11, %v1512_v45 }
  0xf4   :  { %v1548_v55 = vadd.f32 %v455_v10, %v423_v5  ;;  %v1142_v18 = vpop.eup %1141  ;;  %1143 = vrsqrt.f32 %v1542_v12  ;;  %vm816_vm6 = vcmp.eq.f32.partialorder %v1542_v12, inf  ;;  %vm818_vm7 = vcmp.eq.f32.partialorder %v1542_v12, 0.0 }
  0xf5   :  { %v791_v20 = vmul.f32 %v790_v13, %v1482_v14  ;;  %v610_v54 = vmul.f32 %v1138_v51, %v609_v50  ;;  %v799_v23 = vmul.f32 %v1140_v11, %v798_v15  ;;  %v618_v57 = vmul.f32 %v1142_v18, %v1518_v49 }
  0xf6   :  { %v309_v25 = vpop.f32.mrf.mxu2  ;;  %1145 = vrsqrt.f32 %v1548_v55  ;;  %vm636_vm8 = vcmp.eq.f32.partialorder %v1548_v55, inf  ;;  %vm638_vm9 = vcmp.eq.f32.partialorder %v1548_v55, 0.0 }
  0xf7   :  { %v398_v26 = vpop.f32.mrf.mxu3  ;;  %v793_v28 = vsel %vm792_vm14, %v1482_v14, %v791_v20  ;;  %v611_v29 = vmul.f32 %v610_v54, %v1488_v19  ;;  %v800_v30 = vmul.f32 0.5, %v799_v23  ;;  %v619_v31 = vmul.f32 %v1142_v18, %v618_v57 }
  0xf8   :  { %v271_v32 = vpop.f32.mrf.mxu0  ;;  %v796_v33 = vsel %vm794_vm15, %v795_v52, %v793_v28  ;;  %v439_v35 = vmul.f32 %v309_v25, %v309_v25  ;;  %v471_v36 = vmul.f32 %v398_v26, %v398_v26  ;;  %v639_v57 = vand.u32 2147483648, %v1548_v55 }
  0xf9   :  { %v424_v37 = vmul.f32 %v271_v32, %v271_v32  ;;  %v360_v38 = vpop.f32.mrf.mxu1  ;;  %916 = vst [vmem:[%s1758_s2 + $0xb8] sm:$0xff] %v796_v33  ;;  %v613_v39 = vsel %vm612_vm0, %v1488_v19, %v611_v29  ;;  %v801_v40 = vsub.f32 1.5, %v800_v30  ;;  %v620_v27 = vmul.f32 0.5, %v619_v31 }
  0xfa   :  { %v456_v41 = vmul.f32 %v360_v38, %v360_v38  ;;  %v1144_v42 = vpop.eup %1143  ;;  %v616_v14 = vsel %vm614_vm1, %v615_v16, %v613_v39  ;;  %v1572_v43 = vadd.f32 %v471_v36, %v439_v35  ;;  %v807_v19 = vand.u32 2147483648, %v1512_v45 }
  0xfb   :  { %901 = vst [vmem:[%s1758_s2 + $0x40] sm:$0xff] %v616_v14  ;;  %v802_v44 = vmul.f32 %v1140_v11, %v801_v40  ;;  %v621_v17 = vsub.f32 1.5, %v620_v27  ;;  %v810_v46 = vmul.f32 %v1144_v42, %v1542_v12 }
  0xfc   :  { %v1578_v21 = vadd.f32 %v456_v41, %v424_v37  ;;  %v1146_v48 = vpop.eup %1145  ;;  %1147 = vrsqrt.f32 %v1572_v43  ;;  %vm828_vm10 = vcmp.eq.f32.partialorder %v1572_v43, inf  ;;  %vm830_vm11 = vcmp.eq.f32.partialorder %v1572_v43, 0.0 }
  0xfd   :  { %v803_v51 = vmul.f32 %v802_v44, %v1512_v45  ;;  %v622_v22 = vmul.f32 %v1142_v18, %v621_v17  ;;  %v811_v53 = vmul.f32 %v1144_v42, %v810_v46  ;;  %v630_v24 = vmul.f32 %v1146_v48, %v1548_v55 }
  0xfe   :  { %v311_v56 = vpop.f32.mrf.mxu2  ;;  %1149 = vrsqrt.f32 %v1578_v21  ;;  %vm648_vm12 = vcmp.eq.f32.partialorder %v1578_v21, inf  ;;  %vm650_vm13 = vcmp.eq.f32.partialorder %v1578_v21, 0.0 }
  0xff   :  { %v400_v58 = vpop.f32.mrf.mxu3  ;;  %v805_v59 = vsel %vm804_vm2, %v1512_v45, %v803_v51  ;;  %v623_v60 = vmul.f32 %v622_v22, %v1518_v49  ;;  %v812_v61 = vmul.f32 0.5, %v811_v53  ;;  %v631_v62 = vmul.f32 %v1146_v48, %v630_v24 }
 0x100   :  { %v274_v63 = vpop.f32.mrf.mxu0  ;;  %v808_v0 = vsel %vm806_vm3, %v807_v19, %v805_v59  ;;  %v440_v1 = vmul.f32 %v311_v56, %v311_v56  ;;  %v472_v2 = vmul.f32 %v400_v58, %v400_v58  ;;  %v651_v24 = vand.u32 2147483648, %v1578_v21 }
 0x101   :  { %v425_v3 = vmul.f32 %v274_v63, %v274_v63  ;;  %v363_v4 = vpop.f32.mrf.mxu1  ;;  %917 = vst [vmem:[%s1758_s2 + $0xc0] sm:$0xff] %v808_v0  ;;  %v625_v5 = vsel %vm624_vm4, %v1518_v49, %v623_v60  ;;  %v813_v6 = vsub.f32 1.5, %v812_v61  ;;  %v632_v7 = vmul.f32 0.5, %v631_v62 }
 0x102   :  { %v457_v8 = vmul.f32 %v363_v4, %v363_v4  ;;  %v1148_v9 = vpop.eup %1147  ;;  %v628_v45 = vsel %vm626_vm5, %v627_v34, %v625_v5  ;;  %v1602_v10 = vadd.f32 %v472_v2, %v440_v1  ;;  %v819_v49 = vand.u32 2147483648, %v1542_v12 }
 0x103   :  { %902 = vst [vmem:[%s1758_s2 + $0x48] sm:$0xff] %v628_v45  ;;  %v814_v11 = vmul.f32 %v1144_v42, %v813_v6  ;;  %v633_v47 = vsub.f32 1.5, %v632_v7  ;;  %v822_v13 = vmul.f32 %v1148_v9, %v1572_v43 }
 0x104   :  { %v1608_v50 = vadd.f32 %v457_v8, %v425_v3  ;;  %v1150_v15 = vpop.eup %1149  ;;  %1151 = vrsqrt.f32 %v1602_v10  ;;  %vm840_vm14 = vcmp.eq.f32.partialorder %v1602_v10, inf  ;;  %vm842_vm15 = vcmp.eq.f32.partialorder %v1602_v10, 0.0 }
 0x105   :  { %v815_v18 = vmul.f32 %v814_v11, %v1542_v12  ;;  %v634_v52 = vmul.f32 %v1146_v48, %v633_v47  ;;  %v823_v20 = vmul.f32 %v1148_v9, %v822_v13  ;;  %v642_v54 = vmul.f32 %v1150_v15, %v1578_v21 }
 0x106   :  { %v314_v23 = vpop.f32.mrf.mxu2  ;;  %1153 = vrsqrt.f32 %v1608_v50  ;;  %vm660_vm0 = vcmp.eq.f32.partialorder %v1608_v50, inf  ;;  %vm662_vm1 = vcmp.eq.f32.partialorder %v1608_v50, 0.0 }
 0x107   :  { %v403_v25 = vpop.f32.mrf.mxu3  ;;  %v817_v16 = vsel %vm816_vm6, %v1542_v12, %v815_v18  ;;  %v635_v26 = vmul.f32 %v634_v52, %v1548_v55  ;;  %v824_v28 = vmul.f32 0.5, %v823_v20  ;;  %v643_v29 = vmul.f32 %v1150_v15, %v642_v54 }
 0x108   :  { %v276_v30 = vpop.f32.mrf.mxu0  ;;  %v820_v31 = vsel %vm818_vm7, %v819_v49, %v817_v16  ;;  %v441_v32 = vmul.f32 %v314_v23, %v314_v23  ;;  %v473_v33 = vmul.f32 %v403_v25, %v403_v25  ;;  %v663_v54 = vand.u32 2147483648, %v1608_v50 }
 0x109   :  { %v426_v35 = vmul.f32 %v276_v30, %v276_v30  ;;  %v365_v36 = vpop.f32.mrf.mxu1  ;;  %918 = vst [vmem:[%s1758_s2 + $0xc8] sm:$0xff] %v820_v31  ;;  %v637_v37 = vsel %vm636_vm8, %v1548_v55, %v635_v26  ;;  %v825_v38 = vsub.f32 1.5, %v824_v28  ;;  %v644_v39 = vmul.f32 0.5, %v643_v29 }
 0x10a   :  { %v458_v40 = vmul.f32 %v365_v36, %v365_v36  ;;  %v1152_v27 = vpop.eup %1151  ;;  %v640_v12 = vsel %vm638_vm9, %v639_v57, %v637_v37  ;;  %v1632_v41 = vadd.f32 %v473_v33, %v441_v32  ;;  %v831_v55 = vand.u32 2147483648, %v1572_v43 }
 0x10b   :  { %903 = vst [vmem:[%s1758_s2 + $0x50] sm:$0xff] %v640_v12  ;;  %v826_v42 = vmul.f32 %v1148_v9, %v825_v38  ;;  %v645_v14 = vsub.f32 1.5, %v644_v39  ;;  %v834_v44 = vmul.f32 %v1152_v27, %v1602_v10 }
 0x10c   :  { %v1638_v17 = vadd.f32 %v458_v40, %v426_v35  ;;  %v1154_v46 = vpop.eup %1153  ;;  %1155 = vrsqrt.f32 %v1632_v41  ;;  %vm852_vm2 = vcmp.eq.f32.partialorder %v1632_v41, inf  ;;  %vm854_vm3 = vcmp.eq.f32.partialorder %v1632_v41, 0.0 }
 0x10d   :  { %v827_v48 = vmul.f32 %v826_v42, %v1572_v43  ;;  %v646_v19 = vmul.f32 %v1150_v15, %v645_v14  ;;  %v835_v51 = vmul.f32 %v1152_v27, %v834_v44  ;;  %v654_v22 = vmul.f32 %v1154_v46, %v1608_v50 }
 0x10e   :  { %v316_v53 = vpop.f32.mrf.mxu2  ;;  %1157 = vrsqrt.f32 %v1638_v17  ;;  %vm672_vm4 = vcmp.eq.f32.partialorder %v1638_v17, inf  ;;  %vm674_vm5 = vcmp.eq.f32.partialorder %v1638_v17, 0.0 }
 0x10f   :  { %v405_v56 = vpop.f32.mrf.mxu3  ;;  %v829_v34 = vsel %vm828_vm10, %v1572_v43, %v827_v48  ;;  %v647_v58 = vmul.f32 %v646_v19, %v1578_v21  ;;  %v836_v59 = vmul.f32 0.5, %v835_v51  ;;  %v655_v60 = vmul.f32 %v1154_v46, %v654_v22 }
 0x110   :  { %v279_v61 = vpop.f32.mrf.mxu0  ;;  %v832_v62 = vsel %vm830_vm11, %v831_v55, %v829_v34  ;;  %v442_v63 = vmul.f32 %v316_v53, %v316_v53  ;;  %v474_v0 = vmul.f32 %v405_v56, %v405_v56  ;;  %v855_v51 = vand.u32 2147483648, %v1632_v41 }
 0x111   :  { %v427_v1 = vmul.f32 %v279_v61, %v279_v61  ;;  %v368_v2 = vpop.f32.mrf.mxu1  ;;  %919 = vst [vmem:[%s1758_s2 + $0xd0] sm:$0xff] %v832_v62  ;;  %v649_v3 = vsel %vm648_vm12, %v1578_v21, %v647_v58  ;;  %v837_v4 = vsub.f32 1.5, %v836_v59  ;;  %v656_v5 = vmul.f32 0.5, %v655_v60 }
 0x112   :  { %v459_v6 = vmul.f32 %v368_v2, %v368_v2  ;;  %v1156_v7 = vpop.eup %1155  ;;  %v652_v43 = vsel %vm650_vm13, %v651_v24, %v649_v3  ;;  %v1662_v8 = vadd.f32 %v474_v0, %v442_v63  ;;  %v843_v21 = vand.u32 2147483648, %v1602_v10 }
 0x113   :  { %904 = vst [vmem:[%s1758_s2 + $0x58] sm:$0xff] %v652_v43  ;;  %v838_v9 = vmul.f32 %v1152_v27, %v837_v4  ;;  %v657_v45 = vsub.f32 1.5, %v656_v5  ;;  %v846_v11 = vmul.f32 %v1156_v7, %v1632_v41  ;;  %v675_v59 = vand.u32 2147483648, %v1638_v17 }
 0x114   :  { %v1668_v47 = vadd.f32 %v459_v6, %v427_v1  ;;  %v1158_v13 = vpop.eup %1157  ;;  %1159 = vrsqrt.f32 %v1662_v8  ;;  %vm864_vm6 = vcmp.eq.f32.partialorder %v1662_v8, inf  ;;  %vm866_vm7 = vcmp.eq.f32.partialorder %v1662_v8, 0.0 }
 0x115   :  { %v839_v15 = vmul.f32 %v838_v9, %v1602_v10  ;;  %v658_v49 = vmul.f32 %v1154_v46, %v657_v45  ;;  %v847_v18 = vmul.f32 %v1156_v7, %v846_v11  ;;  %v666_v52 = vmul.f32 %v1158_v13, %v1638_v17 }
 0x116   :  { %v319_v20 = vpop.f32.mrf.mxu2  ;;  %1161 = vrsqrt.f32 %v1668_v47  ;;  %v867_v45 = vand.u32 2147483648, %v1662_v8  ;;  %vm684_vm8 = vcmp.eq.f32.partialorder %v1668_v47, inf  ;;  %vm686_vm9 = vcmp.eq.f32.partialorder %v1668_v47, 0.0 }
 0x117   :  { %v408_v23 = vpop.f32.mrf.mxu3  ;;  %v841_v57 = vsel %vm840_vm14, %v1602_v10, %v839_v15  ;;  %v659_v25 = vmul.f32 %v658_v49, %v1608_v50  ;;  %v848_v16 = vmul.f32 0.5, %v847_v18  ;;  %v667_v26 = vmul.f32 %v1158_v13, %v666_v52 }
 0x118   :  { %v281_v28 = vpop.f32.mrf.mxu0  ;;  %v844_v29 = vsel %vm842_vm15, %v843_v21, %v841_v57  ;;  %v443_v30 = vmul.f32 %v319_v20, %v319_v20  ;;  %v475_v31 = vmul.f32 %v408_v23, %v408_v23  ;;  %v687_v18 = vand.u32 2147483648, %v1668_v47 }
 0x119   :  { %v428_v32 = vmul.f32 %v281_v28, %v281_v28  ;;  %v370_v33 = vpop.f32.mrf.mxu1  ;;  %920 = vst [vmem:[%s1758_s2 + $0xd8] sm:$0xff] %v844_v29  ;;  %v661_v35 = vsel %vm660_vm0, %v1608_v50, %v659_v25  ;;  %v849_v36 = vsub.f32 1.5, %v848_v16  ;;  %v668_v37 = vmul.f32 0.5, %v667_v26 }
 0x11a   :  { %v460_v38 = vmul.f32 %v370_v33, %v370_v33  ;;  %v1160_v39 = vpop.eup %1159  ;;  %v664_v10 = vsel %vm662_vm1, %v663_v54, %v661_v35  ;;  %v1692_v40 = vadd.f32 %v475_v31, %v443_v30 }
 0x11b   :  { %905 = vst [vmem:[%s1758_s2 + $0x60] sm:$0xff] %v664_v10  ;;  %v850_v27 = vmul.f32 %v1156_v7, %v849_v36  ;;  %v669_v12 = vsub.f32 1.5, %v668_v37  ;;  %v858_v42 = vmul.f32 %v1160_v39, %v1662_v8 }
 0x11c   :  { %v1698_v14 = vadd.f32 %v460_v38, %v428_v32  ;;  %v1162_v44 = vpop.eup %1161  ;;  %1163 = vrsqrt.f32 %v1692_v40  ;;  %vm876_vm10 = vcmp.eq.f32.partialorder %v1692_v40, inf  ;;  %v879_v30 = vand.u32 2147483648, %v1692_v40 }
 0x11d   :  { %v851_v50 = vmul.f32 %v850_v27, %v1632_v41  ;;  %v670_v46 = vmul.f32 %v1158_v13, %v669_v12  ;;  %v859_v55 = vmul.f32 %v1160_v39, %v858_v42  ;;  %v678_v48 = vmul.f32 %v1162_v44, %v1668_v47 }
 0x11e   :  { %v321_v19 = vpop.f32.mrf.mxu2  ;;  %1165 = vrsqrt.f32 %v1698_v14  ;;  %vm878_vm11 = vcmp.eq.f32.partialorder %v1692_v40, 0.0  ;;  %vm696_vm12 = vcmp.eq.f32.partialorder %v1698_v14, inf  ;;  %v699_v35 = vand.u32 2147483648, %v1698_v14 }
 0x11f   :  { %v410_v22 = vpop.f32.mrf.mxu3  ;;  %v853_v53 = vsel %vm852_vm2, %v1632_v41, %v851_v50  ;;  %v671_v24 = vmul.f32 %v670_v46, %v1638_v17  ;;  %v860_v56 = vmul.f32 0.5, %v859_v55  ;;  %v679_v34 = vmul.f32 %v1162_v44, %v678_v48 }
 0x120   :  { %v856_v58 = vsel %vm854_vm3, %v855_v51, %v853_v53  ;;  %v444_v60 = vmul.f32 %v321_v19, %v321_v19  ;;  %v476_v61 = vmul.f32 %v410_v22, %v410_v22  ;;  %vm698_vm13 = vcmp.eq.f32.partialorder %v1698_v14, 0.0 }
 0x121   :  { %921 = vst [vmem:[%s1758_s2 + $0xe0] sm:$0xff] %v856_v58  ;;  %v673_v62 = vsel %vm672_vm4, %v1638_v17, %v671_v24  ;;  %v861_v63 = vsub.f32 1.5, %v860_v56  ;;  %v680_v0 = vmul.f32 0.5, %v679_v34 }
 0x122   :  { %v1164_v41 = vpop.eup %1163  ;;  %v676_v1 = vsel %vm674_vm5, %v675_v59, %v673_v62  ;;  %v508_v2 = vadd.f32 %v476_v61, %v444_v60 }
 0x123   :  { %906 = vst [vmem:[%s1758_s2 + $0x68] sm:$0xff] %v676_v1  ;;  %v862_v3 = vmul.f32 %v1160_v39, %v861_v63  ;;  %v681_v4 = vsub.f32 1.5, %v680_v0  ;;  %v870_v5 = vmul.f32 %v1164_v41, %v1692_v40 }
 0x124   :  { %v1166_v6 = vpop.eup %1165  ;;  %1167 = vrsqrt.f32 %v508_v2  ;;  %vm888_vm14 = vcmp.eq.f32.partialorder %v508_v2, inf  ;;  %vm890_vm15 = vcmp.eq.f32.partialorder %v508_v2, 0.0 }
 0x125   :  { %v863_v7 = vmul.f32 %v862_v3, %v1662_v8  ;;  %v682_v43 = vmul.f32 %v1162_v44, %v681_v4  ;;  %v871_v9 = vmul.f32 %v1164_v41, %v870_v5  ;;  %v690_v17 = vmul.f32 %v1166_v6, %v1698_v14 }
 0x127   :  { %v865_v11 = vsel %vm864_vm6, %v1662_v8, %v863_v7  ;;  %v683_v13 = vmul.f32 %v682_v43, %v1668_v47  ;;  %v872_v21 = vmul.f32 0.5, %v871_v9  ;;  %v691_v15 = vmul.f32 %v1166_v6, %v690_v17 }
 0x128   :  { %v868_v49 = vsel %vm866_vm7, %v867_v45, %v865_v11 }
 0x129   :  { %922 = vst [vmem:[%s1758_s2 + $0xe8] sm:$0xff] %v868_v49  ;;  %v685_v52 = vsel %vm684_vm8, %v1668_v47, %v683_v13  ;;  %v873_v20 = vsub.f32 1.5, %v872_v21  ;;  %v692_v54 = vmul.f32 0.5, %v691_v15 }
 0x12a   :  { %v1168_v8 = vpop.eup %1167  ;;  %v688_v23 = vsel %vm686_vm9, %v687_v18, %v685_v52 }
 0x12b   :  { %907 = vst [vmem:[%s1758_s2 + $0x70] sm:$0xff] %v688_v23  ;;  %v874_v57 = vmul.f32 %v1164_v41, %v873_v20  ;;  %v693_v25 = vsub.f32 1.5, %v692_v54  ;;  %v882_v16 = vmul.f32 %v1168_v8, %v508_v2 }
 0x12d   :  { %v875_v26 = vmul.f32 %v874_v57, %v1692_v40  ;;  %v694_v28 = vmul.f32 %v1166_v6, %v693_v25  ;;  %v883_v29 = vmul.f32 %v1168_v8, %v882_v16 }
 0x12f   :  { %v877_v47 = vsel %vm876_vm10, %v1692_v40, %v875_v26  ;;  %v695_v31 = vmul.f32 %v694_v28, %v1698_v14  ;;  %v884_v32 = vmul.f32 0.5, %v883_v29  ;;  %v891_v40 = vand.u32 2147483648, %v508_v2 }
 0x130   :  { %v880_v33 = vsel %vm878_vm11, %v879_v30, %v877_v47 }
 0x131   :  { %923 = vst [vmem:[%s1758_s2 + $0xf0] sm:$0xff] %v880_v33  ;;  %v697_v36 = vsel %vm696_vm12, %v1698_v14, %v695_v31  ;;  %v885_v37 = vsub.f32 1.5, %v884_v32 }
 0x132   :  { %v700_v38 = vsel %vm698_vm13, %v699_v35, %v697_v36 }
 0x133   :  { %908 = vst [vmem:[%s1758_s2 + $0x78] sm:$0xff] %v700_v38  ;;  %v886_v39 = vmul.f32 %v1168_v8, %v885_v37 }
 0x135   :  { %v887_v10 = vmul.f32 %v886_v39, %v508_v2 }
 0x137   :  { %v889_v27 = vsel %vm888_vm14, %v508_v2, %v887_v10 }
 0x138   :  { %v892_v12 = vsel %vm890_vm15, %v891_v40, %v889_v27 }
 0x139   :  { %924 = vst [vmem:[%s1758_s2 + $0xf8] sm:$0xff] %v892_v12 }

// kernel: _mrd_forward.8
= control target key start
LH: loop header
LB: loop body
LE: loop exit
PB: predicated region body
PF: predicated region fallthrough
CT: control target
= control target key end

     0   :  { %s1061_s12 = smov 0   ;;  %s1063_s13 = smov 0   ;;  %s1201_s0 = inlined_call_operand.vmem [shape: bf16[512,128], index: 0, kind: input, shape index: {}]   ;;  %s1202_s1 = inlined_call_operand.vmem [shape: bf16[128,128], index: 1, kind: input, shape index: {}]   ;;  %s1203_s2 = inlined_call_operand.vmem [shape: f32[1,128], index: 2, kind: input, shape index: {}]   ;;  %s1204_s3 = inlined_call_operand.vmem [shape: bf16[512,128], index: 3, kind: output, shape index: {}]  }
   0x1   :  { %s1065_s14 = smov 0  }
   0x2 LB: > { %s25_s15 = sadd.s32 1, %s1035_s13  ;;  %p746_p0 = scmp.ge.s32.totalorder %s1039_s14, 1  ;;  %s1039_s14 = sphi %s1065_s14, %s13_s14   ;;  %s1035_s13 = sphi %s1063_s13, %s1206_s13   ;;  %s1031_s12 = sphi %s1061_s12, %s1205_s12  }
   0x3   : > { %p27_p1 = scmp.ge.s32.totalorder %s25_s15, 2  ;;  %p169_p2 = scmp.lt.s32.totalorder %s1039_s14, 3 }
   0x5   : > { %s1208_s15 = smov (%p27_p1, %s25_s15), 0  ;;  %p170_p3 = pnand %p746_p0, %p169_p2 }
   0x6   : > { %s747_s24 = sshll.u32 (!%p170_p3), %s1031_s12, 5 }
   0x7   : > { %173 = sbr.rel (%p170_p3) target bundleno = 243 (0xf3), region = 32  ;;  %p204_p4 = scmp.lt.s32.totalorder (!%p170_p3), %s747_s24, 63 }
   0xc   : > { %v872_v0 = vld [vmem:[%s1202_s1 + $0x38] sm:$0xff]  ;;  %v871_v1 = vld [vmem:[%s1202_s1 + $0x30] sm:$0xff]  ;;  %v870_v2 = vld [vmem:[%s1202_s1 + $0x28] sm:$0xff]  ;;  %s1210_s24 = smov (!%p204_p4, %s747_s24), 63 }
   0xd   : > { %421 = vmatpush.bf16.msra.mxu0 %v872_v0  ;;  %968 = vmatpush.bf16.msra.mxu1 %v872_v0  ;;  %v869_v3 = vld [vmem:[%s1202_s1 + $0x20] sm:$0xff]  ;;  %v868_v4 = vld [vmem:[%s1202_s1 + $0x18] sm:$0xff]  ;;  %v867_v5 = vld [vmem:[%s1202_s1 + $0x10] sm:$0xff]  ;;  %s748_s4 = sshll.u32 %s1210_s24, 2 }
   0xe   : > { %969 = vmatpush.bf16.msra.mxu2 %v872_v0  ;;  %970 = vmatpush.bf16.msra.mxu3 %v872_v0  ;;  %v866_v6 = vld [vmem:[%s1202_s1 + $0x8] sm:$0xff]  ;;  %v865_v7 = vld [vmem:[%s1202_s1] sm:$0xff]  ;;  %s1114_s9 = scalar_lea.vmem %s1201_s0, %s748_s4  ;;  %s1148_s17 = scalar_lea.vmem %s1204_s3, %s748_s4 }
   0xf   : > { %v849_v8 = vld [vmem:[%s1114_s9] sm:$0xff]  ;;  %v850_v12 = vld [vmem:[%s1114_s9 + $0x8] sm:$0xff]  ;;  %v851_v16 = vld [vmem:[%s1114_s9 + $0x10] sm:$0xff] }
  0x10   : > { %v853_v9 = vld [vmem:[%s1114_s9 + $0x20] sm:$0xff]  ;;  %v854_v13 = vld [vmem:[%s1114_s9 + $0x28] sm:$0xff]  ;;  %v855_v17 = vld [vmem:[%s1114_s9 + $0x30] sm:$0xff] }
  0x11   : > { %422 = vmatpush.bf16.msra.mxu0 %v871_v1  ;;  %971 = vmatpush.bf16.msra.mxu1 %v871_v1  ;;  %v857_v10 = vld [vmem:[%s1114_s9 + $0x40] sm:$0xff]  ;;  %v858_v14 = vld [vmem:[%s1114_s9 + $0x48] sm:$0xff]  ;;  %v859_v18 = vld [vmem:[%s1114_s9 + $0x50] sm:$0xff] }
  0x12   : > { %972 = vmatpush.bf16.msra.mxu2 %v871_v1  ;;  %973 = vmatpush.bf16.msra.mxu3 %v871_v1  ;;  %v861_v11 = vld [vmem:[%s1114_s9 + $0x60] sm:$0xff]  ;;  %v862_v15 = vld [vmem:[%s1114_s9 + $0x68] sm:$0xff]  ;;  %v863_v19 = vld [vmem:[%s1114_s9 + $0x70] sm:$0xff] }
  0x13   : > { %v852_v20 = vld [vmem:[%s1114_s9 + $0x18] sm:$0xff]  ;;  %v1135_v26 = vld [vmem:[%s1203_s2] ss:$0 sm:$0xff] }
  0x14   : > { %v856_v21 = vld [vmem:[%s1114_s9 + $0x38] sm:$0xff] }
  0x15   : > { %423 = vmatpush.bf16.msra.mxu0 %v870_v2  ;;  %974 = vmatpush.bf16.msra.mxu1 %v870_v2  ;;  %v860_v22 = vld [vmem:[%s1114_s9 + $0x58] sm:$0xff] }
  0x16   : > { %975 = vmatpush.bf16.msra.mxu2 %v870_v2  ;;  %976 = vmatpush.bf16.msra.mxu3 %v870_v2  ;;  %v864_v23 = vld [vmem:[%s1114_s9 + $0x78] sm:$0xff] }
  0x19   : > { %424 = vmatpush.bf16.msra.mxu0 %v869_v3  ;;  %977 = vmatpush.bf16.msra.mxu1 %v869_v3 }
  0x1a   : > { %978 = vmatpush.bf16.msra.mxu2 %v869_v3  ;;  %979 = vmatpush.bf16.msra.mxu3 %v869_v3 }
  0x1d   : > { %425 = vmatpush.bf16.msra.mxu0 %v868_v4  ;;  %980 = vmatpush.bf16.msra.mxu1 %v868_v4 }
  0x1e   : > { %981 = vmatpush.bf16.msra.mxu2 %v868_v4  ;;  %982 = vmatpush.bf16.msra.mxu3 %v868_v4 }
  0x21   : > { %426 = vmatpush.bf16.msra.mxu0 %v867_v5  ;;  %983 = vmatpush.bf16.msra.mxu1 %v867_v5 }
  0x22   : > { %984 = vmatpush.bf16.msra.mxu2 %v867_v5  ;;  %985 = vmatpush.bf16.msra.mxu3 %v867_v5 }
  0x25   : > { %427 = vmatpush.bf16.msra.mxu0 %v866_v6  ;;  %986 = vmatpush.bf16.msra.mxu1 %v866_v6 }
  0x26   : > { %987 = vmatpush.bf16.msra.mxu2 %v866_v6  ;;  %988 = vmatpush.bf16.msra.mxu3 %v866_v6 }
  0x29   : > { %428 = vmatpush.bf16.msra.mxu0 %v865_v7  ;;  %989 = vmatpush.bf16.msra.mxu1 %v865_v7 }
  0x2a   : > { %990 = vmatpush.bf16.msra.mxu2 %v865_v7  ;;  %991 = vmatpush.bf16.msra.mxu3 %v865_v7 }
  0x2c   : > { %429 = vmatmul.bf16.vlgmr.msra.gmra.mxu0 %v849_v8  ;;  %449 = vmatmul.bf16.vlgmr.msra.gmra.mxu1 %v853_v9 }
  0x2d   : > { %469 = vmatmul.bf16.vlgmr.msra.gmra.mxu2 %v857_v10  ;;  %489 = vmatmul.bf16.vlgmr.msra.gmra.mxu3 %v861_v11 }
  0x3c   : > { %434 = vmatmul.bf16.gmra.mxu0 %v850_v12  ;;  %454 = vmatmul.bf16.gmra.mxu1 %v854_v13 }
  0x3d   : > { %474 = vmatmul.bf16.gmra.mxu2 %v858_v14  ;;  %494 = vmatmul.bf16.gmra.mxu3 %v862_v15 }
  0x4c   : > { %439 = vmatmul.bf16.gmra.mxu0 %v851_v16  ;;  %459 = vmatmul.bf16.gmra.mxu1 %v855_v17 }
  0x4d   : > { %479 = vmatmul.bf16.gmra.mxu2 %v859_v18  ;;  %499 = vmatmul.bf16.gmra.mxu3 %v863_v19 }
  0x5c   : > { %444 = vmatmul.bf16.gmra.mxu0 %v852_v20  ;;  %464 = vmatmul.bf16.gmra.mxu1 %v856_v21 }
  0x5d   : > { %484 = vmatmul.bf16.gmra.mxu2 %v860_v22  ;;  %504 = vmatmul.bf16.gmra.mxu3 %v864_v23 }
  0xa9   : > { %v430_v24 = vpop.f32.mrf.mxu0  ;;  %v450_v25 = vpop.f32.mrf.mxu1 }
  0xaa   : > { %v431_v27 = vadd.f32 %v1135_v26, %v430_v24  ;;  %v451_v28 = vadd.f32 %v1135_v26, %v450_v25 }
  0xac   : > { %v510_v33 = vmul.f32 0.1, %v431_v27  ;;  %v518_v34 = vmul.f32 0.1, %v451_v28 }
  0xae   : > { %v542_v41 = vmax.f32 %v431_v27, %v510_v33  ;;  %v550_v42 = vmax.f32 %v451_v28, %v518_v34 }
  0xb0   : > { %v470_v29 = vpop.f32.mrf.mxu2  ;;  %v490_v30 = vpop.f32.mrf.mxu3 }
  0xb1   : > { %v432_v31 = vpop.f32.mrf.mxu0  ;;  %v452_v32 = vpop.f32.mrf.mxu1  ;;  %v471_v39 = vadd.f32 %v1135_v26, %v470_v29  ;;  %v491_v40 = vadd.f32 %v1135_v26, %v490_v30 }
  0xb2   : > { %v433_v35 = vadd.f32 %v1135_v26, %v432_v31  ;;  %v453_v36 = vadd.f32 %v1135_v26, %v452_v32 }
  0xb3   : > { %v526_v49 = vmul.f32 0.1, %v471_v39  ;;  %v534_v50 = vmul.f32 0.1, %v491_v40 }
  0xb4   : > { %v511_v37 = vmul.f32 0.1, %v433_v35  ;;  %v519_v38 = vmul.f32 0.1, %v453_v36 }
  0xb5   : > { %v558_v57 = vmax.f32 %v471_v39, %v526_v49  ;;  %v566_v58 = vmax.f32 %v491_v40, %v534_v50 }
  0xb6   : > { %v543_v43 = vmax.f32 %v433_v35, %v511_v37  ;;  %v551_v44 = vmax.f32 %v453_v36, %v519_v38 }
  0xb8   : > { %v876_v45 = vpack.c.bf16 %v543_v43, %v542_v41  ;;  %v896_v46 = vpack.c.bf16 %v551_v44, %v550_v42  ;;  %v472_v47 = vpop.f32.mrf.mxu2  ;;  %v492_v48 = vpop.f32.mrf.mxu3 }
  0xb9   : > { %v473_v51 = vadd.f32 %v1135_v26, %v472_v47  ;;  %v493_v52 = vadd.f32 %v1135_v26, %v492_v48  ;;  %v435_v53 = vpop.f32.mrf.mxu0  ;;  %v455_v54 = vpop.f32.mrf.mxu1 }
  0xba   : > { %877 = vst [vmem:[%s1148_s17] sm:$0xff] %v876_v45   ;;  %v436_v61 = vadd.f32 %v1135_v26, %v435_v53  ;;  %v456_v62 = vadd.f32 %v1135_v26, %v455_v54 }
  0xbb   : > { %956 = vst [vmem:[%s1148_s17 + $0x20] sm:$0xff] %v896_v46   ;;  %v527_v55 = vmul.f32 0.1, %v473_v51  ;;  %v535_v56 = vmul.f32 0.1, %v493_v52 }
  0xbc   : > { %v512_v5 = vmul.f32 0.1, %v436_v61  ;;  %v520_v6 = vmul.f32 0.1, %v456_v62 }
  0xbd   : > { %v559_v59 = vmax.f32 %v473_v51, %v527_v55  ;;  %v567_v60 = vmax.f32 %v493_v52, %v535_v56 }
  0xbe   : > { %v544_v13 = vmax.f32 %v436_v61, %v512_v5  ;;  %v552_v14 = vmax.f32 %v456_v62, %v520_v6 }
  0xbf   : > { %v916_v63 = vpack.c.bf16 %v559_v59, %v558_v57  ;;  %v936_v0 = vpack.c.bf16 %v567_v60, %v566_v58 }
  0xc0   : > { %v475_v1 = vpop.f32.mrf.mxu2  ;;  %v495_v2 = vpop.f32.mrf.mxu3 }
  0xc1   : > { %960 = vst [vmem:[%s1148_s17 + $0x40] sm:$0xff] %v916_v63   ;;  %v437_v3 = vpop.f32.mrf.mxu0  ;;  %v457_v4 = vpop.f32.mrf.mxu1  ;;  %v476_v11 = vadd.f32 %v1135_v26, %v475_v1  ;;  %v496_v12 = vadd.f32 %v1135_v26, %v495_v2 }
  0xc2   : > { %964 = vst [vmem:[%s1148_s17 + $0x60] sm:$0xff] %v936_v0   ;;  %v438_v7 = vadd.f32 %v1135_v26, %v437_v3  ;;  %v458_v8 = vadd.f32 %v1135_v26, %v457_v4 }
  0xc3   : > { %v528_v21 = vmul.f32 0.1, %v476_v11  ;;  %v536_v22 = vmul.f32 0.1, %v496_v12 }
  0xc4   : > { %v513_v9 = vmul.f32 0.1, %v438_v7  ;;  %v521_v10 = vmul.f32 0.1, %v458_v8 }
  0xc5   : > { %v560_v30 = vmax.f32 %v476_v11, %v528_v21  ;;  %v568_v31 = vmax.f32 %v496_v12, %v536_v22 }
  0xc6   : > { %v545_v15 = vmax.f32 %v438_v7, %v513_v9  ;;  %v553_v16 = vmax.f32 %v458_v8, %v521_v10 }
  0xc8   : > { %v881_v17 = vpack.c.bf16 %v545_v15, %v544_v13  ;;  %v901_v18 = vpack.c.bf16 %v553_v16, %v552_v14  ;;  %v477_v19 = vpop.f32.mrf.mxu2  ;;  %v497_v20 = vpop.f32.mrf.mxu3 }
  0xc9   : > { %v478_v23 = vadd.f32 %v1135_v26, %v477_v19  ;;  %v498_v24 = vadd.f32 %v1135_v26, %v497_v20  ;;  %v440_v25 = vpop.f32.mrf.mxu0  ;;  %v460_v27 = vpop.f32.mrf.mxu1 }
  0xca   : > { %953 = vst [vmem:[%s1148_s17 + $0x8] sm:$0xff] %v881_v17   ;;  %v441_v34 = vadd.f32 %v1135_v26, %v440_v25  ;;  %v461_v35 = vadd.f32 %v1135_v26, %v460_v27 }
  0xcb   : > { %957 = vst [vmem:[%s1148_s17 + $0x28] sm:$0xff] %v901_v18   ;;  %v529_v28 = vmul.f32 0.1, %v478_v23  ;;  %v537_v29 = vmul.f32 0.1, %v498_v24 }
  0xcc   : > { %v514_v42 = vmul.f32 0.1, %v441_v34  ;;  %v522_v43 = vmul.f32 0.1, %v461_v35 }
  0xcd   : > { %v561_v32 = vmax.f32 %v478_v23, %v529_v28  ;;  %v569_v33 = vmax.f32 %v498_v24, %v537_v29 }
  0xce   : > { %v546_v50 = vmax.f32 %v441_v34, %v514_v42  ;;  %v554_v51 = vmax.f32 %v461_v35, %v522_v43 }
  0xcf   : > { %v921_v36 = vpack.c.bf16 %v561_v32, %v560_v30  ;;  %v941_v37 = vpack.c.bf16 %v569_v33, %v568_v31 }
  0xd0   : > { %v480_v38 = vpop.f32.mrf.mxu2  ;;  %v500_v39 = vpop.f32.mrf.mxu3 }
  0xd1   : > { %961 = vst [vmem:[%s1148_s17 + $0x48] sm:$0xff] %v921_v36   ;;  %v442_v40 = vpop.f32.mrf.mxu0  ;;  %v462_v41 = vpop.f32.mrf.mxu1  ;;  %v481_v48 = vadd.f32 %v1135_v26, %v480_v38  ;;  %v501_v49 = vadd.f32 %v1135_v26, %v500_v39 }
  0xd2   : > { %965 = vst [vmem:[%s1148_s17 + $0x68] sm:$0xff] %v941_v37   ;;  %v443_v44 = vadd.f32 %v1135_v26, %v442_v40  ;;  %v463_v45 = vadd.f32 %v1135_v26, %v462_v41 }
  0xd3   : > { %v530_v58 = vmul.f32 0.1, %v481_v48  ;;  %v538_v59 = vmul.f32 0.1, %v501_v49 }
  0xd4   : > { %v515_v46 = vmul.f32 0.1, %v443_v44  ;;  %v523_v47 = vmul.f32 0.1, %v463_v45 }
  0xd5   : > { %v562_v2 = vmax.f32 %v481_v48, %v530_v58  ;;  %v570_v3 = vmax.f32 %v501_v49, %v538_v59 }
  0xd6   : > { %v547_v52 = vmax.f32 %v443_v44, %v515_v46  ;;  %v555_v53 = vmax.f32 %v463_v45, %v523_v47 }
  0xd8   : > { %v886_v54 = vpack.c.bf16 %v547_v52, %v546_v50  ;;  %v906_v55 = vpack.c.bf16 %v555_v53, %v554_v51  ;;  %v482_v56 = vpop.f32.mrf.mxu2  ;;  %v502_v57 = vpop.f32.mrf.mxu3 }
  0xd9   : > { %v483_v60 = vadd.f32 %v1135_v26, %v482_v56  ;;  %v503_v61 = vadd.f32 %v1135_v26, %v502_v57  ;;  %v445_v62 = vpop.f32.mrf.mxu0  ;;  %v465_v63 = vpop.f32.mrf.mxu1 }
  0xda   : > { %954 = vst [vmem:[%s1148_s17 + $0x10] sm:$0xff] %v886_v54   ;;  %v446_v6 = vadd.f32 %v1135_v26, %v445_v62  ;;  %v466_v7 = vadd.f32 %v1135_v26, %v465_v63 }
  0xdb   : > { %958 = vst [vmem:[%s1148_s17 + $0x30] sm:$0xff] %v906_v55   ;;  %v531_v0 = vmul.f32 0.1, %v483_v60  ;;  %v539_v1 = vmul.f32 0.1, %v503_v61 }
  0xdc   : > { %v516_v14 = vmul.f32 0.1, %v446_v6  ;;  %v524_v15 = vmul.f32 0.1, %v466_v7 }
  0xdd   : > { %v563_v4 = vmax.f32 %v483_v60, %v531_v0  ;;  %v571_v5 = vmax.f32 %v503_v61, %v539_v1 }
  0xde   : > { %v548_v22 = vmax.f32 %v446_v6, %v516_v14  ;;  %v556_v23 = vmax.f32 %v466_v7, %v524_v15 }
  0xdf   : > { %v926_v8 = vpack.c.bf16 %v563_v4, %v562_v2  ;;  %v946_v9 = vpack.c.bf16 %v571_v5, %v570_v3 }
  0xe0   : > { %v485_v10 = vpop.f32.mrf.mxu2  ;;  %v505_v11 = vpop.f32.mrf.mxu3 }
  0xe1   : > { %962 = vst [vmem:[%s1148_s17 + $0x50] sm:$0xff] %v926_v8   ;;  %v447_v12 = vpop.f32.mrf.mxu0  ;;  %v467_v13 = vpop.f32.mrf.mxu1  ;;  %v486_v20 = vadd.f32 %v1135_v26, %v485_v10  ;;  %v506_v21 = vadd.f32 %v1135_v26, %v505_v11 }
  0xe2   : > { %966 = vst [vmem:[%s1148_s17 + $0x70] sm:$0xff] %v946_v9   ;;  %v448_v16 = vadd.f32 %v1135_v26, %v447_v12  ;;  %v468_v17 = vadd.f32 %v1135_v26, %v467_v13 }
  0xe3   : > { %v532_v31 = vmul.f32 0.1, %v486_v20  ;;  %v540_v32 = vmul.f32 0.1, %v506_v21 }
  0xe4   : > { %v517_v18 = vmul.f32 0.1, %v448_v16  ;;  %v525_v19 = vmul.f32 0.1, %v468_v17 }
  0xe5   : > { %v564_v37 = vmax.f32 %v486_v20, %v532_v31  ;;  %v572_v38 = vmax.f32 %v506_v21, %v540_v32 }
  0xe6   : > { %v549_v24 = vmax.f32 %v448_v16, %v517_v18  ;;  %v557_v25 = vmax.f32 %v468_v17, %v525_v19 }
  0xe8   : > { %v891_v27 = vpack.c.bf16 %v549_v24, %v548_v22  ;;  %v911_v28 = vpack.c.bf16 %v557_v25, %v556_v23  ;;  %v487_v29 = vpop.f32.mrf.mxu2  ;;  %v507_v30 = vpop.f32.mrf.mxu3 }
  0xe9   : > { %v488_v33 = vadd.f32 %v1135_v26, %v487_v29  ;;  %v508_v34 = vadd.f32 %v1135_v26, %v507_v30 }
  0xea   : > { %955 = vst [vmem:[%s1148_s17 + $0x18] sm:$0xff] %v891_v27  }
  0xeb   : > { %959 = vst [vmem:[%s1148_s17 + $0x38] sm:$0xff] %v911_v28   ;;  %v533_v35 = vmul.f32 0.1, %v488_v33  ;;  %v541_v36 = vmul.f32 0.1, %v508_v34 }
  0xed   : > { %v565_v39 = vmax.f32 %v488_v33, %v533_v35  ;;  %v573_v40 = vmax.f32 %v508_v34, %v541_v36 }
  0xef   : > { %v931_v41 = vpack.c.bf16 %v565_v39, %v564_v37  ;;  %v951_v42 = vpack.c.bf16 %v573_v40, %v572_v38 }
  0xf1   : > { %963 = vst [vmem:[%s1148_s17 + $0x58] sm:$0xff] %v931_v41  }
  0xf2   : > { %967 = vst [vmem:[%s1148_s17 + $0x78] sm:$0xff] %v951_v42  }
  0xf3 PF: > { %s13_s14 = sadd.s32 1, %s1039_s14   ;;  %s1205_s12 = smov %s1035_s13 }
  0xf4   : > { %p10_p5 = scmp.ge.s32.totalorder %s13_s14, 4   ;;  %s1206_s13 = smov %s1208_s15 }
  0xf6   :  { %12 = sbr.rel (!%p10_p5) target bundleno = 2 (0x2), region = 68 }

// kernel: _mrd_forward.9
= control target key start
LH: loop header
LB: loop body
LE: loop exit
PB: predicated region body
PF: predicated region fallthrough
CT: control target
= control target key end

     0   :  { %s4361_s1 = inlined_call_operand.vmem [shape: bf16[1024,128], index: 1, kind: input, shape index: {}]   ;;  %s4362_s2 = inlined_call_operand.vmem [shape: f32[1,128], index: 2, kind: input, shape index: {}]   ;;  %s4363_s0 = inlined_call_operand.vmem [shape: bf16[256,1024], index: 0, kind: input, shape index: {}]   ;;  %s4364_s3 = inlined_call_operand.vmem [shape: bf16[256,128], index: 3, kind: output, shape index: {}]  }
   0x1   :  { %v3045_v0 = vld [vmem:[%s4361_s1 + $0x38] sm:$0xff]  ;;  %v3044_v4 = vld [vmem:[%s4361_s1 + $0x30] sm:$0xff]  ;;  %v3043_v8 = vld [vmem:[%s4361_s1 + $0x28] sm:$0xff] }
   0x2   :  { %v3053_v1 = vld [vmem:[%s4361_s1 + $0x78] sm:$0xff]  ;;  %1298 = vmatpush.bf16.msra.mxu0 %v3045_v0  ;;  %v3052_v5 = vld [vmem:[%s4361_s1 + $0x70] sm:$0xff]  ;;  %v3051_v9 = vld [vmem:[%s4361_s1 + $0x68] sm:$0xff] }
   0x3   :  { %v3061_v2 = vld [vmem:[%s4361_s1 + $0xb8] sm:$0xff]  ;;  %1387 = vmatpush.bf16.msra.mxu1 %v3053_v1  ;;  %v3060_v6 = vld [vmem:[%s4361_s1 + $0xb0] sm:$0xff]  ;;  %v3059_v10 = vld [vmem:[%s4361_s1 + $0xa8] sm:$0xff] }
   0x4   :  { %v3069_v3 = vld [vmem:[%s4361_s1 + $0xf8] sm:$0xff]  ;;  %1476 = vmatpush.bf16.msra.mxu2 %v3061_v2  ;;  %v3068_v7 = vld [vmem:[%s4361_s1 + $0xf0] sm:$0xff]  ;;  %v3067_v11 = vld [vmem:[%s4361_s1 + $0xe8] sm:$0xff] }
   0x5   :  { %1565 = vmatpush.bf16.msra.mxu3 %v3069_v3  ;;  %v3042_v12 = vld [vmem:[%s4361_s1 + $0x20] sm:$0xff]  ;;  %v3041_v16 = vld [vmem:[%s4361_s1 + $0x18] sm:$0xff]  ;;  %v3040_v20 = vld [vmem:[%s4361_s1 + $0x10] sm:$0xff] }
   0x6   :  { %1299 = vmatpush.bf16.msra.mxu0 %v3044_v4  ;;  %v3050_v13 = vld [vmem:[%s4361_s1 + $0x60] sm:$0xff]  ;;  %v3049_v17 = vld [vmem:[%s4361_s1 + $0x58] sm:$0xff]  ;;  %v3048_v21 = vld [vmem:[%s4361_s1 + $0x50] sm:$0xff] }
   0x7   :  { %1388 = vmatpush.bf16.msra.mxu1 %v3052_v5  ;;  %v3058_v14 = vld [vmem:[%s4361_s1 + $0xa0] sm:$0xff]  ;;  %v3057_v18 = vld [vmem:[%s4361_s1 + $0x98] sm:$0xff]  ;;  %v3056_v22 = vld [vmem:[%s4361_s1 + $0x90] sm:$0xff] }
   0x8   :  { %1477 = vmatpush.bf16.msra.mxu2 %v3060_v6  ;;  %v3066_v15 = vld [vmem:[%s4361_s1 + $0xe0] sm:$0xff]  ;;  %v3065_v19 = vld [vmem:[%s4361_s1 + $0xd8] sm:$0xff]  ;;  %v3064_v23 = vld [vmem:[%s4361_s1 + $0xd0] sm:$0xff] }
   0x9   :  { %1566 = vmatpush.bf16.msra.mxu3 %v3068_v7  ;;  %v3039_v24 = vld [vmem:[%s4361_s1 + $0x8] sm:$0xff]  ;;  %v3038_v28 = vld [vmem:[%s4361_s1] sm:$0xff]  ;;  %v3093_v40 = vld [vmem:[%s4361_s1 + $0x1b8] sm:$0xff] }
   0xa   :  { %1300 = vmatpush.bf16.msra.mxu0 %v3043_v8  ;;  %v3047_v25 = vld [vmem:[%s4361_s1 + $0x48] sm:$0xff]  ;;  %v3046_v29 = vld [vmem:[%s4361_s1 + $0x40] sm:$0xff]  ;;  %v3077_v41 = vld [vmem:[%s4361_s1 + $0x138] sm:$0xff] }
   0xb   :  { %1389 = vmatpush.bf16.msra.mxu1 %v3051_v9  ;;  %v3055_v26 = vld [vmem:[%s4361_s1 + $0x88] sm:$0xff]  ;;  %v3054_v30 = vld [vmem:[%s4361_s1 + $0x80] sm:$0xff]  ;;  %v3101_v46 = vld [vmem:[%s4361_s1 + $0x1f8] sm:$0xff] }
   0xc   :  { %1478 = vmatpush.bf16.msra.mxu2 %v3059_v10  ;;  %v3063_v27 = vld [vmem:[%s4361_s1 + $0xc8] sm:$0xff]  ;;  %v3062_v31 = vld [vmem:[%s4361_s1 + $0xc0] sm:$0xff]  ;;  %v3085_v47 = vld [vmem:[%s4361_s1 + $0x178] sm:$0xff] }
   0xd   :  { %1567 = vmatpush.bf16.msra.mxu3 %v3067_v11  ;;  %v2144_v32 = vld [vmem:[%s4363_s0] sm:$0xf]  ;;  %v2910_v34 = vld [vmem:[%s4363_s0 + $0x4] sm:$0xf]  ;;  %v2152_v36 = vld [vmem:[%s4363_s0 + $0x8] sm:$0xf] }
   0xe   :  { %1301 = vmatpush.bf16.msra.mxu0 %v3042_v12  ;;  %v2914_v33 = vld [vmem:[%s4363_s0 + $0x1c] sm:$0xf0]  ;;  %v2146_v35 = vld [vmem:[%s4363_s0 + $0x20] sm:$0xf0]  ;;  %v2915_v37 = vld [vmem:[%s4363_s0 + $0x24] sm:$0xf0] }
   0xf   :  { %1390 = vmatpush.bf16.msra.mxu1 %v3050_v13  ;;  %v2911_v38 = vld [vmem:[%s4363_s0 + $0xc] sm:$0xf]  ;;  %v2145_v42 = vor.u32 %v2914_v33, %v2144_v32  ;;  %v2149_v43 = vor.u32 %v2910_v34, %v2146_v35  ;;  %v2153_v44 = vor.u32 %v2915_v37, %v2152_v36  ;;  %v3092_v48 = vld [vmem:[%s4361_s1 + $0x1b0] sm:$0xff]  ;;  %v2176_v52 = vld [vmem:[%s4363_s0 + $0x40] sm:$0xf] }
  0x10   :  { %1479 = vmatpush.bf16.msra.mxu2 %v3058_v14  ;;  %v2154_v39 = vld [vmem:[%s4363_s0 + $0x28] sm:$0xf0]  ;;  %v3076_v49 = vld [vmem:[%s4361_s1 + $0x130] sm:$0xff]  ;;  %v2922_v53 = vld [vmem:[%s4363_s0 + $0x5c] sm:$0xf0] }
  0x11   :  { %1568 = vmatpush.bf16.msra.mxu3 %v3066_v15  ;;  %v2157_v45 = vor.u32 %v2911_v38, %v2154_v39  ;;  %v3100_v50 = vld [vmem:[%s4361_s1 + $0x1f0] sm:$0xff]  ;;  %v2918_v54 = vld [vmem:[%s4363_s0 + $0x44] sm:$0xf]  ;;  %v2184_v56 = vld [vmem:[%s4363_s0 + $0x48] sm:$0xf]  ;;  %v2177_v60 = vor.u32 %v2922_v53, %v2176_v52 }
  0x12   :  { %1302 = vmatpush.bf16.msra.mxu0 %v3041_v16  ;;  %v3084_v51 = vld [vmem:[%s4361_s1 + $0x170] sm:$0xff]  ;;  %v2178_v55 = vld [vmem:[%s4363_s0 + $0x60] sm:$0xf0]  ;;  %v2923_v57 = vld [vmem:[%s4363_s0 + $0x64] sm:$0xf0] }
  0x13   :  { %1391 = vmatpush.bf16.msra.mxu1 %v3049_v17  ;;  %v2919_v58 = vld [vmem:[%s4363_s0 + $0x4c] sm:$0xf]  ;;  %v2181_v61 = vor.u32 %v2918_v54, %v2178_v55  ;;  %v2185_v62 = vor.u32 %v2923_v57, %v2184_v56  ;;  %v2208_v0 = vld [vmem:[%s4363_s0 + $0x80] sm:$0xf]  ;;  %v2926_v2 = vld [vmem:[%s4363_s0 + $0x84] sm:$0xf] }
  0x14   :  { %1480 = vmatpush.bf16.msra.mxu2 %v3057_v18  ;;  %v2186_v59 = vld [vmem:[%s4363_s0 + $0x68] sm:$0xf0]  ;;  %v2930_v1 = vld [vmem:[%s4363_s0 + $0x9c] sm:$0xf0]  ;;  %v2210_v3 = vld [vmem:[%s4363_s0 + $0xa0] sm:$0xf0] }
  0x15   :  { %1569 = vmatpush.bf16.msra.mxu3 %v3065_v19  ;;  %v2189_v63 = vor.u32 %v2919_v58, %v2186_v59  ;;  %v2216_v4 = vld [vmem:[%s4363_s0 + $0x88] sm:$0xf]  ;;  %v2927_v6 = vld [vmem:[%s4363_s0 + $0x8c] sm:$0xf]  ;;  %v2209_v8 = vor.u32 %v2930_v1, %v2208_v0  ;;  %v2213_v9 = vor.u32 %v2926_v2, %v2210_v3  ;;  %v2240_v16 = vld [vmem:[%s4363_s0 + $0xc0] sm:$0xf] }
  0x16   :  { %1303 = vmatpush.bf16.msra.mxu0 %v3040_v20  ;;  %v2931_v5 = vld [vmem:[%s4363_s0 + $0xa4] sm:$0xf0]  ;;  %v2218_v7 = vld [vmem:[%s4363_s0 + $0xa8] sm:$0xf0]  ;;  %v2938_v17 = vld [vmem:[%s4363_s0 + $0xdc] sm:$0xf0] }
  0x17   :  { %1392 = vmatpush.bf16.msra.mxu1 %v3048_v21  ;;  %v2217_v10 = vor.u32 %v2931_v5, %v2216_v4  ;;  %v2221_v11 = vor.u32 %v2927_v6, %v2218_v7  ;;  %v3091_v12 = vld [vmem:[%s4361_s1 + $0x1a8] sm:$0xff]  ;;  %v2934_v18 = vld [vmem:[%s4363_s0 + $0xc4] sm:$0xf]  ;;  %v2336_v56 = vld [vmem:[%s4363_s0 + $0x180] sm:$0xf] }
  0x18   :  { %1481 = vmatpush.bf16.msra.mxu2 %v3056_v22  ;;  %v3075_v13 = vld [vmem:[%s4361_s1 + $0x128] sm:$0xff]  ;;  %v2242_v19 = vld [vmem:[%s4363_s0 + $0xe0] sm:$0xf0]  ;;  %v2962_v57 = vld [vmem:[%s4363_s0 + $0x19c] sm:$0xf0] }
  0x19   :  { %1570 = vmatpush.bf16.msra.mxu3 %v3064_v23  ;;  %v3099_v14 = vld [vmem:[%s4361_s1 + $0x1e8] sm:$0xff]  ;;  %v2958_v58 = vld [vmem:[%s4363_s0 + $0x184] sm:$0xf]  ;;  %v2337_v0 = vor.u32 %v2962_v57, %v2336_v56  ;;  %v3089_v4 = vld [vmem:[%s4361_s1 + $0x198] sm:$0xff] }
  0x1a   :  { %1304 = vmatpush.bf16.msra.mxu0 %v3039_v24  ;;  %v3083_v15 = vld [vmem:[%s4361_s1 + $0x168] sm:$0xff]  ;;  %v2241_v24 = vor.u32 %v2938_v17, %v2240_v16  ;;  %v2338_v59 = vld [vmem:[%s4363_s0 + $0x1a0] sm:$0xf0]  ;;  %v3073_v5 = vld [vmem:[%s4361_s1 + $0x118] sm:$0xff] }
  0x1b   :  { %1393 = vmatpush.bf16.msra.mxu1 %v3047_v25  ;;  %v2248_v20 = vld [vmem:[%s4363_s0 + $0xc8] sm:$0xf]  ;;  %v2935_v22 = vld [vmem:[%s4363_s0 + $0xcc] sm:$0xf]  ;;  %v2245_v25 = vor.u32 %v2934_v18, %v2242_v19  ;;  %v2341_v1 = vor.u32 %v2958_v58, %v2338_v59  ;;  %v3097_v6 = vld [vmem:[%s4361_s1 + $0x1d8] sm:$0xff] }
  0x1c   :  { %1482 = vmatpush.bf16.msra.mxu2 %v3055_v26  ;;  %v2939_v21 = vld [vmem:[%s4363_s0 + $0xe4] sm:$0xf0]  ;;  %v2250_v23 = vld [vmem:[%s4363_s0 + $0xe8] sm:$0xf0]  ;;  %v3081_v7 = vld [vmem:[%s4361_s1 + $0x158] sm:$0xff] }
  0x1d   :  { %1571 = vmatpush.bf16.msra.mxu3 %v3063_v27  ;;  %v2249_v26 = vor.u32 %v2939_v21, %v2248_v20  ;;  %v2253_v27 = vor.u32 %v2935_v22, %v2250_v23  ;;  %v2280_v32 = vld [vmem:[%s4363_s0 + $0x108] sm:$0xf]  ;;  %v2943_v34 = vld [vmem:[%s4363_s0 + $0x10c] sm:$0xf]  ;;  %v3570_v20 = vld [vmem:[%s4362_s2] ss:$0 sm:$0xff] }
  0x1e   :  { %1305 = vmatpush.bf16.msra.mxu0 %v3038_v28  ;;  %v2272_v28 = vld [vmem:[%s4363_s0 + $0x100] sm:$0xf]  ;;  %v2947_v33 = vld [vmem:[%s4363_s0 + $0x124] sm:$0xf0]  ;;  %v2282_v35 = vld [vmem:[%s4363_s0 + $0x128] sm:$0xf0] }
  0x1f   :  { %1394 = vmatpush.bf16.msra.mxu1 %v3046_v29  ;;  %v2946_v29 = vld [vmem:[%s4363_s0 + $0x11c] sm:$0xf0]  ;;  %v2281_v38 = vor.u32 %v2947_v33, %v2280_v32  ;;  %v2285_v39 = vor.u32 %v2943_v34, %v2282_v35  ;;  %v2974_v23 = vld [vmem:[%s4363_s0 + $0x204] sm:$0xf]  ;;  %v2442_v56 = vld [vmem:[%s4363_s0 + $0x268] sm:$0xf0] }
  0x20   :  { %1483 = vmatpush.bf16.msra.mxu2 %v3054_v30  ;;  %v2942_v30 = vld [vmem:[%s4363_s0 + $0x104] sm:$0xf]  ;;  %v2273_v36 = vor.u32 %v2946_v29, %v2272_v28  ;;  %v2400_v21 = vld [vmem:[%s4363_s0 + $0x200] sm:$0xf]  ;;  %v2410_v28 = vld [vmem:[%s4363_s0 + $0x228] sm:$0xf0] }
  0x21   :  { %1572 = vmatpush.bf16.msra.mxu3 %v3062_v31  ;;  %1306 = vmatmul.bf16.vlgmr.msra.gmra.mxu0 %v2145_v42  ;;  %v2274_v31 = vld [vmem:[%s4363_s0 + $0x120] sm:$0xf0]  ;;  %v2978_v22 = vld [vmem:[%s4363_s0 + $0x21c] sm:$0xf0] }
  0x22   :  { %1654 = vmatpush.bf16.msrb.mxu0 %v3077_v41  ;;  %1395 = vmatmul.bf16.vlgmr.msra.gmra.mxu1 %v2149_v43  ;;  %v2277_v37 = vor.u32 %v2942_v30, %v2274_v31  ;;  %v3074_v41 = vld [vmem:[%s4361_s1 + $0x120] sm:$0xff]  ;;  %v2401_v29 = vor.u32 %v2978_v22, %v2400_v21  ;;  %v2474_v21 = vld [vmem:[%s4363_s0 + $0x2a8] sm:$0xf0] }
  0x23   :  { %1484 = vmatmul.bf16.vlgmr.msra.gmra.mxu2 %v2153_v44  ;;  %1743 = vmatpush.bf16.msrb.mxu1 %v3085_v47  ;;  %v3098_v42 = vld [vmem:[%s4361_s1 + $0x1e0] sm:$0xff] }
  0x24   :  { %1832 = vmatpush.bf16.msrb.mxu2 %v3093_v40  ;;  %1573 = vmatmul.bf16.vlgmr.msra.gmra.mxu3 %v2157_v45  ;;  %v3090_v40 = vld [vmem:[%s4361_s1 + $0x1a0] sm:$0xff] }
  0x25   :  { %1921 = vmatpush.bf16.msrb.mxu3 %v3101_v46  ;;  %v3082_v43 = vld [vmem:[%s4361_s1 + $0x160] sm:$0xff] }
  0x26   :  { %1655 = vmatpush.bf16.msrb.mxu0 %v3076_v49  ;;  %v2304_v44 = vld [vmem:[%s4363_s0 + $0x140] sm:$0xf]  ;;  %v2950_v46 = vld [vmem:[%s4363_s0 + $0x144] sm:$0xf]  ;;  %v2955_v49 = vld [vmem:[%s4363_s0 + $0x164] sm:$0xf0] }
  0x27   :  { %1744 = vmatpush.bf16.msrb.mxu1 %v3084_v51  ;;  %v2954_v45 = vld [vmem:[%s4363_s0 + $0x15c] sm:$0xf0]  ;;  %v2306_v47 = vld [vmem:[%s4363_s0 + $0x160] sm:$0xf0]  ;;  %v2314_v51 = vld [vmem:[%s4363_s0 + $0x168] sm:$0xf0] }
  0x28   :  { %1833 = vmatpush.bf16.msrb.mxu2 %v3092_v48  ;;  %v2312_v48 = vld [vmem:[%s4363_s0 + $0x148] sm:$0xf]  ;;  %v2305_v52 = vor.u32 %v2954_v45, %v2304_v44  ;;  %v2309_v53 = vor.u32 %v2950_v46, %v2306_v47  ;;  %v3080_v47 = vld [vmem:[%s4361_s1 + $0x150] sm:$0xff] }
  0x29   :  { %1922 = vmatpush.bf16.msrb.mxu3 %v3100_v50  ;;  %v2951_v50 = vld [vmem:[%s4363_s0 + $0x14c] sm:$0xf]  ;;  %v2313_v54 = vor.u32 %v2955_v49, %v2312_v48  ;;  %v2432_v49 = vld [vmem:[%s4363_s0 + $0x240] sm:$0xf] }
  0x2a   :  { %1656 = vmatpush.bf16.msrb.mxu0 %v3075_v13  ;;  %v2317_v55 = vor.u32 %v2951_v50, %v2314_v51  ;;  %v2971_v13 = vld [vmem:[%s4363_s0 + $0x1e4] sm:$0xf0]  ;;  %v2986_v50 = vld [vmem:[%s4363_s0 + $0x25c] sm:$0xf0]  ;;  %v2982_v51 = vld [vmem:[%s4363_s0 + $0x244] sm:$0xf] }
  0x2b   :  { %1745 = vmatpush.bf16.msrb.mxu1 %v3083_v15  ;;  %v2378_v15 = vld [vmem:[%s4363_s0 + $0x1e8] sm:$0xf0]  ;;  %v2433_v59 = vor.u32 %v2986_v50, %v2432_v49  ;;  %v2998_v49 = vld [vmem:[%s4363_s0 + $0x2c4] sm:$0xf] }
  0x2c   :  { %1834 = vmatpush.bf16.msrb.mxu2 %v3091_v12  ;;  %v2376_v12 = vld [vmem:[%s4363_s0 + $0x1c8] sm:$0xf]  ;;  %v2498_v50 = vld [vmem:[%s4363_s0 + $0x2e0] sm:$0xf0] }
  0x2d   :  { %1923 = vmatpush.bf16.msrb.mxu3 %v3099_v14  ;;  %v2967_v14 = vld [vmem:[%s4363_s0 + $0x1cc] sm:$0xf]  ;;  %v2377_v18 = vor.u32 %v2971_v13, %v2376_v12  ;;  %v2464_v13 = vld [vmem:[%s4363_s0 + $0x280] sm:$0xf] }
  0x2e   :  { %1657 = vmatpush.bf16.msrb.mxu0 %v3074_v41  ;;  %v2381_v19 = vor.u32 %v2967_v14, %v2378_v15  ;;  %v2994_v14 = vld [vmem:[%s4363_s0 + $0x29c] sm:$0xf0]  ;;  %v2990_v15 = vld [vmem:[%s4363_s0 + $0x284] sm:$0xf] }
  0x2f   :  { %1746 = vmatpush.bf16.msrb.mxu1 %v3082_v43 }
  0x30   :  { %1835 = vmatpush.bf16.msrb.mxu2 %v3090_v40 }
  0x31   :  { %1311 = vmatmul.bf16.gmra.mxu0 %v2177_v60  ;;  %1924 = vmatpush.bf16.msrb.mxu3 %v3098_v42  ;;  %v2344_v60 = vld [vmem:[%s4363_s0 + $0x188] sm:$0xf] }
  0x32   :  { %1400 = vmatmul.bf16.gmra.mxu1 %v2181_v61  ;;  %v2963_v61 = vld [vmem:[%s4363_s0 + $0x1a4] sm:$0xf0]  ;;  %1658 = vmatpush.bf16.msrb.mxu0 %v3073_v5 }
  0x33   :  { %1489 = vmatmul.bf16.gmra.mxu2 %v2185_v62  ;;  %v2959_v62 = vld [vmem:[%s4363_s0 + $0x18c] sm:$0xf]  ;;  %v2345_v2 = vor.u32 %v2963_v61, %v2344_v60  ;;  %1747 = vmatpush.bf16.msrb.mxu1 %v3081_v7 }
  0x34   :  { %1578 = vmatmul.bf16.gmra.mxu3 %v2189_v63  ;;  %v2346_v63 = vld [vmem:[%s4363_s0 + $0x1a8] sm:$0xf0]  ;;  %1836 = vmatpush.bf16.msrb.mxu2 %v3089_v4 }
  0x35   :  { %v2349_v3 = vor.u32 %v2959_v62, %v2346_v63  ;;  %1925 = vmatpush.bf16.msrb.mxu3 %v3097_v6 }
  0x37   :  { %1748 = vmatpush.bf16.msrb.mxu1 %v3080_v47  ;;  %v2496_v47 = vld [vmem:[%s4363_s0 + $0x2c0] sm:$0xf] }
  0x41   :  { %1316 = vmatmul.bf16.gmra.mxu0 %v2209_v8  ;;  %v2368_v8 = vld [vmem:[%s4363_s0 + $0x1c0] sm:$0xf] }
  0x42   :  { %1405 = vmatmul.bf16.gmra.mxu1 %v2213_v9  ;;  %v2970_v9 = vld [vmem:[%s4363_s0 + $0x1dc] sm:$0xf0] }
  0x43   :  { %1494 = vmatmul.bf16.gmra.mxu2 %v2217_v10  ;;  %v2966_v10 = vld [vmem:[%s4363_s0 + $0x1c4] sm:$0xf]  ;;  %v2369_v16 = vor.u32 %v2970_v9, %v2368_v8 }
  0x44   :  { %1583 = vmatmul.bf16.gmra.mxu3 %v2221_v11  ;;  %v2370_v11 = vld [vmem:[%s4363_s0 + $0x1e0] sm:$0xf0] }
  0x45   :  { %v2373_v17 = vor.u32 %v2966_v10, %v2370_v11 }
  0x51   :  { %1321 = vmatmul.bf16.gmra.mxu0 %v2241_v24  ;;  %v2402_v24 = vld [vmem:[%s4363_s0 + $0x220] sm:$0xf0] }
  0x52   :  { %1410 = vmatmul.bf16.gmra.mxu1 %v2245_v25  ;;  %v2408_v25 = vld [vmem:[%s4363_s0 + $0x208] sm:$0xf]  ;;  %v2405_v30 = vor.u32 %v2974_v23, %v2402_v24  ;;  %v2465_v24 = vor.u32 %v2994_v14, %v2464_v13  ;;  %v2528_v13 = vld [vmem:[%s4363_s0 + $0x300] sm:$0xf] }
  0x53   :  { %1499 = vmatmul.bf16.gmra.mxu2 %v2249_v26  ;;  %v2979_v26 = vld [vmem:[%s4363_s0 + $0x224] sm:$0xf0]  ;;  %v3010_v14 = vld [vmem:[%s4363_s0 + $0x31c] sm:$0xf0] }
  0x54   :  { %1588 = vmatmul.bf16.gmra.mxu3 %v2253_v27  ;;  %v2975_v27 = vld [vmem:[%s4363_s0 + $0x20c] sm:$0xf]  ;;  %v2409_v33 = vor.u32 %v2979_v26, %v2408_v25 }
  0x55   :  { %v2413_v34 = vor.u32 %v2975_v27, %v2410_v28 }
  0x61   :  { %1326 = vmatmul.bf16.gmra.mxu0 %v2273_v36 }
  0x62   :  { %1415 = vmatmul.bf16.gmra.mxu1 %v2277_v37  ;;  %v3088_v37 = vld [vmem:[%s4361_s1 + $0x190] sm:$0xff] }
  0x63   :  { %1504 = vmatmul.bf16.gmra.mxu2 %v2281_v38  ;;  %v3072_v38 = vld [vmem:[%s4361_s1 + $0x110] sm:$0xff] }
  0x64   :  { %1593 = vmatmul.bf16.gmra.mxu3 %v2285_v39  ;;  %v3096_v39 = vld [vmem:[%s4361_s1 + $0x1d0] sm:$0xff]  ;;  %1837 = vmatpush.bf16.msrb.mxu2 %v3088_v37 }
  0x65   :  { %1659 = vmatpush.bf16.msrb.mxu0 %v3072_v38  ;;  %1926 = vmatpush.bf16.msrb.mxu3 %v3096_v39 }
  0x71   :  { %1331 = vmatmul.bf16.gmra.mxu0 %v2305_v52  ;;  %v2434_v52 = vld [vmem:[%s4363_s0 + $0x260] sm:$0xf0] }
  0x72   :  { %1420 = vmatmul.bf16.gmra.mxu1 %v2309_v53  ;;  %v2440_v53 = vld [vmem:[%s4363_s0 + $0x248] sm:$0xf]  ;;  %v2437_v60 = vor.u32 %v2982_v51, %v2434_v52 }
  0x73   :  { %1509 = vmatmul.bf16.gmra.mxu2 %v2313_v54  ;;  %v2987_v54 = vld [vmem:[%s4363_s0 + $0x264] sm:$0xf0] }
  0x74   :  { %1598 = vmatmul.bf16.gmra.mxu3 %v2317_v55  ;;  %v2983_v55 = vld [vmem:[%s4363_s0 + $0x24c] sm:$0xf]  ;;  %v2504_v51 = vld [vmem:[%s4363_s0 + $0x2c8] sm:$0xf] }
  0x75   :  { %v3003_v52 = vld [vmem:[%s4363_s0 + $0x2e4] sm:$0xf0] }
  0x81   :  { %1336 = vmatmul.bf16.gmra.mxu0 %v2337_v0  ;;  %v2441_v0 = vor.u32 %v2987_v54, %v2440_v53  ;;  %v2999_v53 = vld [vmem:[%s4363_s0 + $0x2cc] sm:$0xf] }
  0x82   :  { %1425 = vmatmul.bf16.gmra.mxu1 %v2341_v1  ;;  %v2445_v1 = vor.u32 %v2983_v55, %v2442_v56  ;;  %v2506_v54 = vld [vmem:[%s4363_s0 + $0x2e8] sm:$0xf0] }
  0x83   :  { %1514 = vmatmul.bf16.gmra.mxu2 %v2345_v2 }
  0x84   :  { %1603 = vmatmul.bf16.gmra.mxu3 %v2349_v3 }
  0x91   :  { %1341 = vmatmul.bf16.gmra.mxu0 %v2369_v16  ;;  %v2466_v16 = vld [vmem:[%s4363_s0 + $0x2a0] sm:$0xf0] }
  0x92   :  { %1430 = vmatmul.bf16.gmra.mxu1 %v2373_v17  ;;  %v2472_v17 = vld [vmem:[%s4363_s0 + $0x288] sm:$0xf]  ;;  %v2469_v25 = vor.u32 %v2990_v15, %v2466_v16  ;;  %v3006_v15 = vld [vmem:[%s4363_s0 + $0x304] sm:$0xf] }
  0x93   :  { %1519 = vmatmul.bf16.gmra.mxu2 %v2377_v18  ;;  %v2995_v18 = vld [vmem:[%s4363_s0 + $0x2a4] sm:$0xf0]  ;;  %v2530_v16 = vld [vmem:[%s4363_s0 + $0x320] sm:$0xf0] }
  0x94   :  { %1608 = vmatmul.bf16.gmra.mxu3 %v2381_v19  ;;  %v2991_v19 = vld [vmem:[%s4363_s0 + $0x28c] sm:$0xf] }
  0x9e   :  { %v1307_v31 = vpop.f32.mrf.mxu0 }
  0x9f   :  { %v1396_v32 = vpop.f32.mrf.mxu1  ;;  %v1308_v35 = vadd.f32 %v3570_v20, %v1307_v31 }
  0xa1   :  { %v1397_v36 = vadd.f32 %v1396_v32, %v1308_v35  ;;  %1346 = vmatmul.bf16.gmra.mxu0 %v2401_v29  ;;  %v2473_v29 = vor.u32 %v2995_v18, %v2472_v17  ;;  %v3071_v35 = vld [vmem:[%s4361_s1 + $0x108] sm:$0xff] }
  0xa2   :  { %1435 = vmatmul.bf16.gmra.mxu1 %v2405_v30  ;;  %v2477_v30 = vor.u32 %v2991_v19, %v2474_v21  ;;  %1660 = vmatpush.bf16.msrb.mxu0 %v3071_v35  ;;  %v2536_v17 = vld [vmem:[%s4363_s0 + $0x308] sm:$0xf]  ;;  %v3007_v19 = vld [vmem:[%s4363_s0 + $0x30c] sm:$0xf]  ;;  %v3086_v35 = vld [vmem:[%s4361_s1 + $0x180] sm:$0xff] }
  0xa3   :  { %1524 = vmatmul.bf16.gmra.mxu2 %v2409_v33  ;;  %v3011_v18 = vld [vmem:[%s4363_s0 + $0x324] sm:$0xf0]  ;;  %v2538_v21 = vld [vmem:[%s4363_s0 + $0x328] sm:$0xf0] }
  0xa4   :  { %1613 = vmatmul.bf16.gmra.mxu3 %v2413_v34  ;;  %v3087_v34 = vld [vmem:[%s4361_s1 + $0x188] sm:$0xff] }
  0xa5   :  { %1838 = vmatpush.bf16.msrb.mxu2 %v3087_v34 }
  0xa6   :  { %v1485_v40 = vpop.f32.mrf.mxu2  ;;  %v1309_v43 = vpop.f32.mrf.mxu0 }
  0xa7   :  { %v1574_v41 = vpop.f32.mrf.mxu3  ;;  %v1486_v42 = vadd.f32 %v1485_v40, %v1397_v36  ;;  %v1398_v44 = vpop.f32.mrf.mxu1  ;;  %v1310_v45 = vadd.f32 %v3570_v20, %v1309_v43  ;;  %v3095_v36 = vld [vmem:[%s4361_s1 + $0x1c8] sm:$0xff] }
  0xa8   :  { %1927 = vmatpush.bf16.msrb.mxu3 %v3095_v36  ;;  %v3070_v36 = vld [vmem:[%s4361_s1 + $0x100] sm:$0xff] }
  0xa9   :  { %v3607_v46 = vadd.f32 %v1574_v41, %v1486_v42  ;;  %v1399_v48 = vadd.f32 %v1398_v44, %v1310_v45  ;;  %v3079_v44 = vld [vmem:[%s4361_s1 + $0x148] sm:$0xff]  ;;  %1839 = vmatpush.bf16.msrb.mxu2 %v3086_v35  ;;  %1661 = vmatpush.bf16.msrb.mxu0 %v3070_v36 }
  0xaa   :  { %1749 = vmatpush.bf16.msrb.mxu1 %v3079_v44 }
  0xae   :  { %v1487_v57 = vpop.f32.mrf.mxu2  ;;  %v1312_v62 = vpop.f32.mrf.mxu0 }
  0xaf   :  { %v1576_v58 = vpop.f32.mrf.mxu3  ;;  %v1488_v61 = vadd.f32 %v1487_v57, %v1399_v48  ;;  %v1401_v63 = vpop.f32.mrf.mxu1  ;;  %v1313_v2 = vadd.f32 %v3570_v20, %v1312_v62  ;;  %v3002_v48 = vld [vmem:[%s4363_s0 + $0x2dc] sm:$0xf0]  ;;  %v2505_v62 = vor.u32 %v3003_v52, %v2504_v51  ;;  %v3014_v51 = vld [vmem:[%s4363_s0 + $0x344] sm:$0xf] }
  0xb0   :  { %v2497_v57 = vor.u32 %v3002_v48, %v2496_v47  ;;  %v3078_v47 = vld [vmem:[%s4361_s1 + $0x140] sm:$0xff] }
  0xb1   :  { %v3637_v3 = vadd.f32 %v1576_v58, %v1488_v61  ;;  %v1402_v4 = vadd.f32 %v1401_v63, %v1313_v2  ;;  %1351 = vmatmul.bf16.gmra.mxu0 %v2433_v59  ;;  %v2501_v58 = vor.u32 %v2998_v49, %v2498_v50  ;;  %v2509_v63 = vor.u32 %v2999_v53, %v2506_v54  ;;  %v2560_v49 = vld [vmem:[%s4363_s0 + $0x340] sm:$0xf]  ;;  %v2562_v52 = vld [vmem:[%s4363_s0 + $0x360] sm:$0xf0]  ;;  %v2568_v53 = vld [vmem:[%s4363_s0 + $0x348] sm:$0xf] }
  0xb2   :  { %1440 = vmatmul.bf16.gmra.mxu1 %v2437_v60  ;;  %v3018_v50 = vld [vmem:[%s4363_s0 + $0x35c] sm:$0xf0]  ;;  %v3019_v54 = vld [vmem:[%s4363_s0 + $0x364] sm:$0xf0] }
  0xb3   :  { %1529 = vmatmul.bf16.gmra.mxu2 %v2441_v0  ;;  %1750 = vmatpush.bf16.msrb.mxu1 %v3078_v47 }
  0xb4   :  { %1618 = vmatmul.bf16.gmra.mxu3 %v2445_v1 }
  0xb6   :  { %v1490_v5 = vpop.f32.mrf.mxu2  ;;  %v1314_v8 = vpop.f32.mrf.mxu0 }
  0xb7   :  { %v1579_v6 = vpop.f32.mrf.mxu3  ;;  %v1491_v7 = vadd.f32 %v1490_v5, %v1402_v4  ;;  %v1403_v9 = vpop.f32.mrf.mxu1  ;;  %v1315_v10 = vadd.f32 %v3570_v20, %v1314_v8 }
  0xb9   :  { %v3640_v11 = vadd.f32 %v1579_v6, %v1491_v7  ;;  %v1404_v12 = vadd.f32 %v1403_v9, %v1315_v10 }
  0xbe   :  { %v1492_v22 = vpop.f32.mrf.mxu2  ;;  %v1317_v27 = vpop.f32.mrf.mxu0 }
  0xbf   :  { %v1581_v23 = vpop.f32.mrf.mxu3  ;;  %v1493_v26 = vadd.f32 %v1492_v22, %v1404_v12  ;;  %v1406_v28 = vpop.f32.mrf.mxu1  ;;  %v1318_v31 = vadd.f32 %v3570_v20, %v1317_v27 }
  0xc1   :  { %v3667_v32 = vadd.f32 %v1581_v23, %v1493_v26  ;;  %v1407_v33 = vadd.f32 %v1406_v28, %v1318_v31  ;;  %1356 = vmatmul.bf16.gmra.mxu0 %v2465_v24  ;;  %v2529_v24 = vor.u32 %v3010_v14, %v2528_v13 }
  0xc2   :  { %1445 = vmatmul.bf16.gmra.mxu1 %v2469_v25  ;;  %v2533_v25 = vor.u32 %v3006_v15, %v2530_v16 }
  0xc3   :  { %1534 = vmatmul.bf16.gmra.mxu2 %v2473_v29  ;;  %v2537_v29 = vor.u32 %v3011_v18, %v2536_v17  ;;  %v2592_v17 = vld [vmem:[%s4363_s0 + $0x380] sm:$0xf] }
  0xc4   :  { %1623 = vmatmul.bf16.gmra.mxu3 %v2477_v30  ;;  %v2541_v30 = vor.u32 %v3007_v19, %v2538_v21  ;;  %v3026_v18 = vld [vmem:[%s4363_s0 + $0x39c] sm:$0xf0]  ;;  %v3022_v19 = vld [vmem:[%s4363_s0 + $0x384] sm:$0xf] }
  0xc5   :  { %v2594_v21 = vld [vmem:[%s4363_s0 + $0x3a0] sm:$0xf0] }
  0xc6   :  { %v1495_v37 = vpop.f32.mrf.mxu2  ;;  %v1319_v40 = vpop.f32.mrf.mxu0 }
  0xc7   :  { %v1584_v38 = vpop.f32.mrf.mxu3  ;;  %v1496_v39 = vadd.f32 %v1495_v37, %v1407_v33  ;;  %v1408_v41 = vpop.f32.mrf.mxu1  ;;  %v1320_v42 = vadd.f32 %v3570_v20, %v1319_v40  ;;  %v3094_v37 = vld [vmem:[%s4361_s1 + $0x1c0] sm:$0xff] }
  0xc8   :  { %1928 = vmatpush.bf16.msrb.mxu3 %v3094_v37 }
  0xc9   :  { %v3679_v43 = vadd.f32 %v1584_v38, %v1496_v39  ;;  %v1409_v45 = vadd.f32 %v1408_v41, %v1320_v42 }
  0xce   :  { %v1497_v55 = vpop.f32.mrf.mxu2  ;;  %v1322_v60 = vpop.f32.mrf.mxu0 }
  0xcf   :  { %v1586_v56 = vpop.f32.mrf.mxu3  ;;  %v1498_v59 = vadd.f32 %v1497_v55, %v1409_v45  ;;  %v1411_v61 = vpop.f32.mrf.mxu1  ;;  %v1323_v0 = vadd.f32 %v3570_v20, %v1322_v60  ;;  %v3015_v55 = vld [vmem:[%s4363_s0 + $0x34c] sm:$0xf]  ;;  %v2565_v60 = vor.u32 %v3014_v51, %v2562_v52  ;;  %v2624_v51 = vld [vmem:[%s4363_s0 + $0x3c0] sm:$0xf] }
  0xd0   :  { %v3034_v52 = vld [vmem:[%s4363_s0 + $0x3dc] sm:$0xf0] }
  0xd1   :  { %v3709_v1 = vadd.f32 %v1586_v56, %v1498_v59  ;;  %v1412_v2 = vadd.f32 %v1411_v61, %v1323_v0  ;;  %1361 = vmatmul.bf16.gmra.mxu0 %v2497_v57  ;;  %v2570_v56 = vld [vmem:[%s4363_s0 + $0x368] sm:$0xf0]  ;;  %v2561_v59 = vor.u32 %v3018_v50, %v2560_v49  ;;  %v2569_v0 = vor.u32 %v3019_v54, %v2568_v53  ;;  %v3030_v53 = vld [vmem:[%s4363_s0 + $0x3c4] sm:$0xf] }
  0xd2   :  { %1450 = vmatmul.bf16.gmra.mxu1 %v2501_v58  ;;  %v2626_v54 = vld [vmem:[%s4363_s0 + $0x3e0] sm:$0xf0] }
  0xd3   :  { %1539 = vmatmul.bf16.gmra.mxu2 %v2505_v62 }
  0xd4   :  { %1628 = vmatmul.bf16.gmra.mxu3 %v2509_v63 }
  0xd6   :  { %v1500_v4 = vpop.f32.mrf.mxu2  ;;  %v1324_v7 = vpop.f32.mrf.mxu0 }
  0xd7   :  { %v1589_v5 = vpop.f32.mrf.mxu3  ;;  %v1501_v6 = vadd.f32 %v1500_v4, %v1412_v2  ;;  %v1413_v8 = vpop.f32.mrf.mxu1  ;;  %v1325_v9 = vadd.f32 %v3570_v20, %v1324_v7  ;;  %v2573_v2 = vor.u32 %v3015_v55, %v2570_v56  ;;  %v2632_v55 = vld [vmem:[%s4363_s0 + $0x3c8] sm:$0xf] }
  0xd8   :  { %v3035_v56 = vld [vmem:[%s4363_s0 + $0x3e4] sm:$0xf0] }
  0xd9   :  { %v3712_v10 = vadd.f32 %v1589_v5, %v1501_v6  ;;  %v1414_v12 = vadd.f32 %v1413_v8, %v1325_v9 }
  0xde   :  { %v1502_v22 = vpop.f32.mrf.mxu2  ;;  %v1327_v27 = vpop.f32.mrf.mxu0 }
  0xdf   :  { %v1591_v23 = vpop.f32.mrf.mxu3  ;;  %v1503_v26 = vadd.f32 %v1502_v22, %v1414_v12  ;;  %v1416_v28 = vpop.f32.mrf.mxu1  ;;  %v1328_v31 = vadd.f32 %v3570_v20, %v1327_v27  ;;  %v2600_v22 = vld [vmem:[%s4363_s0 + $0x388] sm:$0xf] }
  0xe1   :  { %v3739_v33 = vadd.f32 %v1591_v23, %v1503_v26  ;;  %v1417_v34 = vadd.f32 %v1416_v28, %v1328_v31  ;;  %1366 = vmatmul.bf16.gmra.mxu0 %v2529_v24  ;;  %v3027_v23 = vld [vmem:[%s4363_s0 + $0x3a4] sm:$0xf0]  ;;  %v3023_v24 = vld [vmem:[%s4363_s0 + $0x38c] sm:$0xf]  ;;  %v2593_v28 = vor.u32 %v3026_v18, %v2592_v17 }
  0xe2   :  { %1455 = vmatmul.bf16.gmra.mxu1 %v2533_v25  ;;  %v2602_v25 = vld [vmem:[%s4363_s0 + $0x3a8] sm:$0xf0]  ;;  %v2601_v35 = vor.u32 %v3027_v23, %v2600_v22  ;;  %v2160_v22 = vld [vmem:[%s4363_s0 + $0x10] sm:$0xf] }
  0xe3   :  { %1544 = vmatmul.bf16.gmra.mxu2 %v2537_v29  ;;  %v2597_v29 = vor.u32 %v3022_v19, %v2594_v21  ;;  %v2605_v36 = vor.u32 %v3023_v24, %v2602_v25  ;;  %v2916_v23 = vld [vmem:[%s4363_s0 + $0x2c] sm:$0xf0]  ;;  %v2912_v24 = vld [vmem:[%s4363_s0 + $0x14] sm:$0xf] }
  0xe4   :  { %1633 = vmatmul.bf16.gmra.mxu3 %v2541_v30  ;;  %v2162_v25 = vld [vmem:[%s4363_s0 + $0x30] sm:$0xf0] }
  0xe6   :  { %v1505_v38 = vpop.f32.mrf.mxu2  ;;  %v1329_v41 = vpop.f32.mrf.mxu0 }
  0xe7   :  { %v1594_v39 = vpop.f32.mrf.mxu3  ;;  %v1506_v40 = vadd.f32 %v1505_v38, %v1417_v34  ;;  %v1418_v42 = vpop.f32.mrf.mxu1  ;;  %v1330_v44 = vadd.f32 %v3570_v20, %v1329_v41 }
  0xe9   :  { %v3751_v45 = vadd.f32 %v1594_v39, %v1506_v40  ;;  %v1419_v48 = vadd.f32 %v1418_v42, %v1330_v44 }
  0xee   :  { %v1507_v57 = vpop.f32.mrf.mxu2  ;;  %v1332_v62 = vpop.f32.mrf.mxu0 }
  0xef   :  { %v1596_v58 = vpop.f32.mrf.mxu3  ;;  %v1508_v61 = vadd.f32 %v1507_v57, %v1419_v48  ;;  %v1421_v63 = vpop.f32.mrf.mxu1  ;;  %v1333_v4 = vadd.f32 %v3570_v20, %v1332_v62  ;;  %v3031_v57 = vld [vmem:[%s4363_s0 + $0x3cc] sm:$0xf]  ;;  %v2629_v62 = vor.u32 %v3030_v53, %v2626_v54 }
  0xf1   :  { %v3781_v5 = vadd.f32 %v1596_v58, %v1508_v61  ;;  %v1422_v6 = vadd.f32 %v1421_v63, %v1333_v4  ;;  %1371 = vmatmul.bf16.gmra.mxu0 %v2561_v59  ;;  %v2634_v58 = vld [vmem:[%s4363_s0 + $0x3e8] sm:$0xf0]  ;;  %v2625_v61 = vor.u32 %v3034_v52, %v2624_v51  ;;  %v2633_v4 = vor.u32 %v3035_v56, %v2632_v55 }
  0xf2   :  { %1460 = vmatmul.bf16.gmra.mxu1 %v2565_v60 }
  0xf3   :  { %1549 = vmatmul.bf16.gmra.mxu2 %v2569_v0 }
  0xf4   :  { %1638 = vmatmul.bf16.gmra.mxu3 %v2573_v2 }
  0xf6   :  { %v1510_v7 = vpop.f32.mrf.mxu2  ;;  %v1334_v12 = vpop.f32.mrf.mxu0 }
  0xf7   :  { %v1599_v8 = vpop.f32.mrf.mxu3  ;;  %v1511_v9 = vadd.f32 %v1510_v7, %v1422_v6  ;;  %v1423_v13 = vpop.f32.mrf.mxu1  ;;  %v1335_v14 = vadd.f32 %v3570_v20, %v1334_v12  ;;  %v2637_v6 = vor.u32 %v3031_v57, %v2634_v58  ;;  %v2192_v57 = vld [vmem:[%s4363_s0 + $0x50] sm:$0xf] }
  0xf8   :  { %v2924_v58 = vld [vmem:[%s4363_s0 + $0x6c] sm:$0xf0] }
  0xf9   :  { %v3784_v15 = vadd.f32 %v1599_v8, %v1511_v9  ;;  %v1424_v16 = vadd.f32 %v1423_v13, %v1335_v14 }
  0xfe   :  { %v1512_v26 = vpop.f32.mrf.mxu2  ;;  %v1337_v31 = vpop.f32.mrf.mxu0 }
  0xff   :  { %v1601_v27 = vpop.f32.mrf.mxu3  ;;  %v1513_v30 = vadd.f32 %v1512_v26, %v1424_v16  ;;  %v1426_v34 = vpop.f32.mrf.mxu1  ;;  %v1338_v37 = vadd.f32 %v3570_v20, %v1337_v31  ;;  %v2168_v26 = vld [vmem:[%s4363_s0 + $0x18] sm:$0xf] }
 0x101   :  { %v3811_v38 = vadd.f32 %v1601_v27, %v1513_v30  ;;  %v1427_v39 = vadd.f32 %v1426_v34, %v1338_v37  ;;  %1376 = vmatmul.bf16.gmra.mxu0 %v2593_v28  ;;  %v2917_v27 = vld [vmem:[%s4363_s0 + $0x34] sm:$0xf0]  ;;  %v2913_v28 = vld [vmem:[%s4363_s0 + $0x1c] sm:$0xf]  ;;  %v2161_v34 = vor.u32 %v2916_v23, %v2160_v22 }
 0x102   :  { %1465 = vmatmul.bf16.gmra.mxu1 %v2597_v29  ;;  %v2170_v29 = vld [vmem:[%s4363_s0 + $0x38] sm:$0xf0] }
 0x103   :  { %1554 = vmatmul.bf16.gmra.mxu2 %v2601_v35  ;;  %v2165_v35 = vor.u32 %v2912_v24, %v2162_v25 }
 0x104   :  { %1643 = vmatmul.bf16.gmra.mxu3 %v2605_v36 }
 0x106   :  { %v1515_v40 = vpop.f32.mrf.mxu2  ;;  %v1339_v44 = vpop.f32.mrf.mxu0 }
 0x107   :  { %v1604_v41 = vpop.f32.mrf.mxu3  ;;  %v1516_v42 = vadd.f32 %v1515_v40, %v1427_v39  ;;  %v1428_v47 = vpop.f32.mrf.mxu1  ;;  %v1340_v48 = vadd.f32 %v3570_v20, %v1339_v44  ;;  %v2169_v40 = vor.u32 %v2917_v27, %v2168_v26 }
 0x109   :  { %v3814_v49 = vadd.f32 %v1604_v41, %v1516_v42  ;;  %v1429_v50 = vadd.f32 %v1428_v47, %v1340_v48  ;;  %v2173_v41 = vor.u32 %v2913_v28, %v2170_v29 }
 0x10e   :  { %v1517_v59 = vpop.f32.mrf.mxu2  ;;  %v1342_v0 = vpop.f32.mrf.mxu0 }
 0x10f   :  { %v1606_v60 = vpop.f32.mrf.mxu3  ;;  %v1518_v63 = vadd.f32 %v1517_v59, %v1429_v50  ;;  %v1431_v2 = vpop.f32.mrf.mxu1  ;;  %v1343_v7 = vadd.f32 %v3570_v20, %v1342_v0  ;;  %v2920_v59 = vld [vmem:[%s4363_s0 + $0x54] sm:$0xf]  ;;  %v2202_v0 = vld [vmem:[%s4363_s0 + $0x78] sm:$0xf0] }
 0x111   :  { %v3841_v8 = vadd.f32 %v1606_v60, %v1518_v63  ;;  %v1432_v9 = vadd.f32 %v1431_v2, %v1343_v7  ;;  %1381 = vmatmul.bf16.gmra.mxu0 %v2625_v61  ;;  %v2194_v60 = vld [vmem:[%s4363_s0 + $0x70] sm:$0xf0]  ;;  %v2200_v61 = vld [vmem:[%s4363_s0 + $0x58] sm:$0xf]  ;;  %v2921_v63 = vld [vmem:[%s4363_s0 + $0x5c] sm:$0xf] }
 0x112   :  { %1470 = vmatmul.bf16.gmra.mxu1 %v2629_v62  ;;  %v2925_v62 = vld [vmem:[%s4363_s0 + $0x74] sm:$0xf0]  ;;  %v2197_v7 = vor.u32 %v2920_v59, %v2194_v60 }
 0x113   :  { %1559 = vmatmul.bf16.gmra.mxu2 %v2633_v4 }
 0x114   :  { %1648 = vmatmul.bf16.gmra.mxu3 %v2637_v6  ;;  %v2193_v6 = vor.u32 %v2924_v58, %v2192_v57 }
 0x116   :  { %v1520_v12 = vpop.f32.mrf.mxu2  ;;  %v1344_v16 = vpop.f32.mrf.mxu0 }
 0x117   :  { %v1609_v13 = vpop.f32.mrf.mxu3  ;;  %v1521_v14 = vadd.f32 %v1520_v12, %v1432_v9  ;;  %v1433_v17 = vpop.f32.mrf.mxu1  ;;  %v1345_v18 = vadd.f32 %v3570_v20, %v1344_v16  ;;  %v2205_v16 = vor.u32 %v2921_v63, %v2202_v0 }
 0x119   :  { %v3844_v19 = vadd.f32 %v1609_v13, %v1521_v14  ;;  %v1434_v21 = vadd.f32 %v1433_v17, %v1345_v18  ;;  %v2201_v14 = vor.u32 %v2925_v62, %v2200_v61 }
 0x11e   :  { %v1522_v30 = vpop.f32.mrf.mxu2  ;;  %v1347_v37 = vpop.f32.mrf.mxu0 }
 0x11f   :  { %v1611_v31 = vpop.f32.mrf.mxu3  ;;  %v1523_v36 = vadd.f32 %v1522_v30, %v1434_v21  ;;  %v1436_v39 = vpop.f32.mrf.mxu1  ;;  %v1348_v42 = vadd.f32 %v3570_v20, %v1347_v37  ;;  %v2224_v30 = vld [vmem:[%s4363_s0 + $0x90] sm:$0xf]  ;;  %v2933_v37 = vld [vmem:[%s4363_s0 + $0xb4] sm:$0xf0] }
 0x121   :  { %v3871_v44 = vadd.f32 %v1611_v31, %v1523_v36  ;;  %v1437_v47 = vadd.f32 %v1436_v39, %v1348_v42  ;;  %1662 = vmatmul.bf16.vlgmr.msrb.gmra.mxu0 %v2161_v34  ;;  %v2932_v31 = vld [vmem:[%s4363_s0 + $0xac] sm:$0xf0]  ;;  %v2928_v34 = vld [vmem:[%s4363_s0 + $0x94] sm:$0xf]  ;;  %v2232_v36 = vld [vmem:[%s4363_s0 + $0x98] sm:$0xf] }
 0x122   :  { %1751 = vmatmul.bf16.vlgmr.msrb.gmra.mxu1 %v2165_v35  ;;  %v2226_v35 = vld [vmem:[%s4363_s0 + $0xb0] sm:$0xf0]  ;;  %v2929_v39 = vld [vmem:[%s4363_s0 + $0x9c] sm:$0xf] }
 0x123   :  { %1840 = vmatmul.bf16.vlgmr.msrb.gmra.mxu2 %v2169_v40  ;;  %v2234_v40 = vld [vmem:[%s4363_s0 + $0xb8] sm:$0xf0] }
 0x124   :  { %1929 = vmatmul.bf16.vlgmr.msrb.gmra.mxu3 %v2173_v41 }
 0x126   :  { %v1525_v48 = vpop.f32.mrf.mxu2  ;;  %v1349_v52 = vpop.f32.mrf.mxu0 }
 0x127   :  { %v1614_v50 = vpop.f32.mrf.mxu3  ;;  %v1526_v51 = vadd.f32 %v1525_v48, %v1437_v47  ;;  %v1438_v53 = vpop.f32.mrf.mxu1  ;;  %v1350_v54 = vadd.f32 %v3570_v20, %v1349_v52  ;;  %v2225_v47 = vor.u32 %v2932_v31, %v2224_v30  ;;  %v2229_v48 = vor.u32 %v2928_v34, %v2226_v35 }
 0x129   :  { %v3874_v55 = vadd.f32 %v1614_v50, %v1526_v51  ;;  %v1439_v56 = vadd.f32 %v1438_v53, %v1350_v54  ;;  %v2233_v53 = vor.u32 %v2933_v37, %v2232_v36  ;;  %v2237_v54 = vor.u32 %v2929_v39, %v2234_v40 }
 0x12e   :  { %v1527_v2 = vpop.f32.mrf.mxu2  ;;  %v1352_v12 = vpop.f32.mrf.mxu0 }
 0x12f   :  { %v1616_v4 = vpop.f32.mrf.mxu3  ;;  %v1528_v9 = vadd.f32 %v1527_v2, %v1439_v56  ;;  %v1441_v13 = vpop.f32.mrf.mxu1  ;;  %v1353_v17 = vadd.f32 %v3570_v20, %v1352_v12  ;;  %v2258_v12 = vld [vmem:[%s4363_s0 + $0xf0] sm:$0xf0] }
 0x131   :  { %v3901_v18 = vadd.f32 %v1616_v4, %v1528_v9  ;;  %v1442_v21 = vadd.f32 %v1441_v13, %v1353_v17  ;;  %1667 = vmatmul.bf16.gmra.mxu0 %v2193_v6  ;;  %v2256_v6 = vld [vmem:[%s4363_s0 + $0xd0] sm:$0xf]  ;;  %v2936_v9 = vld [vmem:[%s4363_s0 + $0xd4] sm:$0xf]  ;;  %v2264_v13 = vld [vmem:[%s4363_s0 + $0xd8] sm:$0xf] }
 0x132   :  { %1756 = vmatmul.bf16.gmra.mxu1 %v2197_v7  ;;  %v2940_v7 = vld [vmem:[%s4363_s0 + $0xec] sm:$0xf0]  ;;  %v2266_v17 = vld [vmem:[%s4363_s0 + $0xf8] sm:$0xf0] }
 0x133   :  { %1845 = vmatmul.bf16.gmra.mxu2 %v2201_v14  ;;  %v2941_v14 = vld [vmem:[%s4363_s0 + $0xf4] sm:$0xf0] }
 0x134   :  { %1934 = vmatmul.bf16.gmra.mxu3 %v2205_v16  ;;  %v2937_v16 = vld [vmem:[%s4363_s0 + $0xdc] sm:$0xf] }
 0x135   :  { %v2269_v30 = vor.u32 %v2937_v16, %v2266_v17 }
 0x136   :  { %v1530_v22 = vpop.f32.mrf.mxu2  ;;  %v1354_v25 = vpop.f32.mrf.mxu0 }
 0x137   :  { %v1619_v23 = vpop.f32.mrf.mxu3  ;;  %v1531_v24 = vadd.f32 %v1530_v22, %v1442_v21  ;;  %v1443_v26 = vpop.f32.mrf.mxu1  ;;  %v1355_v27 = vadd.f32 %v3570_v20, %v1354_v25 }
 0x139   :  { %v3904_v28 = vadd.f32 %v1619_v23, %v1531_v24  ;;  %v1444_v29 = vadd.f32 %v1443_v26, %v1355_v27  ;;  %v2257_v23 = vor.u32 %v2940_v7, %v2256_v6  ;;  %v2261_v24 = vor.u32 %v2936_v9, %v2258_v12 }
 0x13e   :  { %v1532_v41 = vpop.f32.mrf.mxu2  ;;  %v1357_v51 = vpop.f32.mrf.mxu0 }
 0x13f   :  { %v1621_v42 = vpop.f32.mrf.mxu3  ;;  %v1533_v50 = vadd.f32 %v1532_v41, %v1444_v29  ;;  %v1446_v52 = vpop.f32.mrf.mxu1  ;;  %v1358_v56 = vadd.f32 %v3570_v20, %v1357_v51  ;;  %v2265_v29 = vor.u32 %v2941_v14, %v2264_v13  ;;  %v2948_v51 = vld [vmem:[%s4363_s0 + $0x12c] sm:$0xf0] }
 0x141   :  { %v3931_v57 = vadd.f32 %v1621_v42, %v1533_v50  ;;  %v1447_v58 = vadd.f32 %v1446_v52, %v1358_v56  ;;  %1672 = vmatmul.bf16.gmra.mxu0 %v2225_v47  ;;  %v2288_v50 = vld [vmem:[%s4363_s0 + $0x110] sm:$0xf]  ;;  %v2944_v52 = vld [vmem:[%s4363_s0 + $0x114] sm:$0xf]  ;;  %v2949_v56 = vld [vmem:[%s4363_s0 + $0x134] sm:$0xf0] }
 0x142   :  { %1761 = vmatmul.bf16.gmra.mxu1 %v2229_v48 }
 0x143   :  { %1850 = vmatmul.bf16.gmra.mxu2 %v2233_v53  ;;  %v2290_v53 = vld [vmem:[%s4363_s0 + $0x130] sm:$0xf0] }
 0x144   :  { %1939 = vmatmul.bf16.gmra.mxu3 %v2237_v54  ;;  %v2296_v54 = vld [vmem:[%s4363_s0 + $0x118] sm:$0xf] }
 0x145   :  { %v2297_v7 = vor.u32 %v2949_v56, %v2296_v54 }
 0x146   :  { %v1535_v59 = vpop.f32.mrf.mxu2  ;;  %v1359_v62 = vpop.f32.mrf.mxu0 }
 0x147   :  { %v1624_v60 = vpop.f32.mrf.mxu3  ;;  %v1536_v61 = vadd.f32 %v1535_v59, %v1447_v58  ;;  %v1448_v63 = vpop.f32.mrf.mxu1  ;;  %v1360_v0 = vadd.f32 %v3570_v20, %v1359_v62  ;;  %v2945_v58 = vld [vmem:[%s4363_s0 + $0x11c] sm:$0xf]  ;;  %v2289_v62 = vor.u32 %v2948_v51, %v2288_v50 }
 0x148   :  { %v2298_v59 = vld [vmem:[%s4363_s0 + $0x138] sm:$0xf0] }
 0x149   :  { %v3934_v2 = vadd.f32 %v1624_v60, %v1536_v61  ;;  %v1449_v4 = vadd.f32 %v1448_v63, %v1360_v0  ;;  %v2293_v63 = vor.u32 %v2944_v52, %v2290_v53  ;;  %v2301_v9 = vor.u32 %v2945_v58, %v2298_v59 }
 0x14e   :  { %v1537_v21 = vpop.f32.mrf.mxu2  ;;  %v1362_v26 = vpop.f32.mrf.mxu0 }
 0x14f   :  { %v1626_v22 = vpop.f32.mrf.mxu3  ;;  %v1538_v25 = vadd.f32 %v1537_v21, %v1449_v4  ;;  %v1451_v27 = vpop.f32.mrf.mxu1  ;;  %v1363_v31 = vadd.f32 %v3570_v20, %v1362_v26 }
 0x151   :  { %v3961_v34 = vadd.f32 %v1626_v22, %v1538_v25  ;;  %v1452_v35 = vadd.f32 %v1451_v27, %v1363_v31  ;;  %1677 = vmatmul.bf16.gmra.mxu0 %v2257_v23  ;;  %v2320_v27 = vld [vmem:[%s4363_s0 + $0x150] sm:$0xf]  ;;  %v2322_v31 = vld [vmem:[%s4363_s0 + $0x170] sm:$0xf0] }
 0x152   :  { %1766 = vmatmul.bf16.gmra.mxu1 %v2261_v24 }
 0x153   :  { %1855 = vmatmul.bf16.gmra.mxu2 %v2265_v29  ;;  %v2956_v29 = vld [vmem:[%s4363_s0 + $0x16c] sm:$0xf0] }
 0x154   :  { %1944 = vmatmul.bf16.gmra.mxu3 %v2269_v30  ;;  %v2952_v30 = vld [vmem:[%s4363_s0 + $0x154] sm:$0xf] }
 0x156   :  { %v1540_v36 = vpop.f32.mrf.mxu2  ;;  %v1364_v40 = vpop.f32.mrf.mxu0 }
 0x157   :  { %v1629_v37 = vpop.f32.mrf.mxu3  ;;  %v1541_v39 = vadd.f32 %v1540_v36, %v1452_v35  ;;  %v1453_v41 = vpop.f32.mrf.mxu1  ;;  %v1365_v42 = vadd.f32 %v3570_v20, %v1364_v40  ;;  %v2328_v35 = vld [vmem:[%s4363_s0 + $0x158] sm:$0xf] }
 0x158   :  { %v2957_v36 = vld [vmem:[%s4363_s0 + $0x174] sm:$0xf0] }
 0x159   :  { %v3964_v47 = vadd.f32 %v1629_v37, %v1541_v39  ;;  %v1454_v48 = vadd.f32 %v1453_v41, %v1365_v42  ;;  %v2953_v37 = vld [vmem:[%s4363_s0 + $0x15c] sm:$0xf]  ;;  %v2321_v42 = vor.u32 %v2956_v29, %v2320_v27  ;;  %v2329_v53 = vor.u32 %v2957_v36, %v2328_v35 }
 0x15a   :  { %v2330_v39 = vld [vmem:[%s4363_s0 + $0x178] sm:$0xf0] }
 0x15b   :  { %v2333_v54 = vor.u32 %v2953_v37, %v2330_v39 }
 0x15e   :  { %v1542_v60 = vpop.f32.mrf.mxu2  ;;  %v1367_v4 = vpop.f32.mrf.mxu0 }
 0x15f   :  { %v1631_v61 = vpop.f32.mrf.mxu3  ;;  %v1543_v0 = vadd.f32 %v1542_v60, %v1454_v48  ;;  %v1456_v6 = vpop.f32.mrf.mxu1  ;;  %v1368_v12 = vadd.f32 %v3570_v20, %v1367_v4  ;;  %v2325_v48 = vor.u32 %v2952_v30, %v2322_v31 }
 0x161   :  { %v3991_v13 = vadd.f32 %v1631_v61, %v1543_v0  ;;  %v1457_v14 = vadd.f32 %v1456_v6, %v1368_v12  ;;  %1682 = vmatmul.bf16.gmra.mxu0 %v2289_v62  ;;  %v2964_v12 = vld [vmem:[%s4363_s0 + $0x1ac] sm:$0xf0] }
 0x162   :  { %1771 = vmatmul.bf16.gmra.mxu1 %v2293_v63 }
 0x163   :  { %1860 = vmatmul.bf16.gmra.mxu2 %v2297_v7 }
 0x164   :  { %1949 = vmatmul.bf16.gmra.mxu3 %v2301_v9  ;;  %v2352_v9 = vld [vmem:[%s4363_s0 + $0x190] sm:$0xf] }
 0x165   :  { %v2353_v27 = vor.u32 %v2964_v12, %v2352_v9 }
 0x166   :  { %v1545_v16 = vpop.f32.mrf.mxu2  ;;  %v1369_v22 = vpop.f32.mrf.mxu0 }
 0x167   :  { %v1634_v17 = vpop.f32.mrf.mxu3  ;;  %v1546_v21 = vadd.f32 %v1545_v16, %v1457_v14  ;;  %v1458_v23 = vpop.f32.mrf.mxu1  ;;  %v1370_v24 = vadd.f32 %v3570_v20, %v1369_v22  ;;  %v2960_v14 = vld [vmem:[%s4363_s0 + $0x194] sm:$0xf]  ;;  %v2961_v22 = vld [vmem:[%s4363_s0 + $0x19c] sm:$0xf] }
 0x168   :  { %v2354_v16 = vld [vmem:[%s4363_s0 + $0x1b0] sm:$0xf0] }
 0x169   :  { %v3994_v25 = vadd.f32 %v1634_v17, %v1546_v21  ;;  %v1459_v26 = vadd.f32 %v1458_v23, %v1370_v24  ;;  %v2360_v17 = vld [vmem:[%s4363_s0 + $0x198] sm:$0xf]  ;;  %v2362_v23 = vld [vmem:[%s4363_s0 + $0x1b8] sm:$0xf0]  ;;  %v2357_v29 = vor.u32 %v2960_v14, %v2354_v16 }
 0x16a   :  { %v2965_v21 = vld [vmem:[%s4363_s0 + $0x1b4] sm:$0xf0]  ;;  %v2365_v37 = vor.u32 %v2961_v22, %v2362_v23 }
 0x16b   :  { %v2361_v36 = vor.u32 %v2965_v21, %v2360_v17 }
 0x16e   :  { %v1547_v40 = vpop.f32.mrf.mxu2  ;;  %v1372_v51 = vpop.f32.mrf.mxu0 }
 0x16f   :  { %v1636_v41 = vpop.f32.mrf.mxu3  ;;  %v1548_v50 = vadd.f32 %v1547_v40, %v1459_v26  ;;  %v1461_v52 = vpop.f32.mrf.mxu1  ;;  %v1373_v56 = vadd.f32 %v3570_v20, %v1372_v51 }
 0x171   :  { %v4021_v58 = vadd.f32 %v1636_v41, %v1548_v50  ;;  %v1462_v59 = vadd.f32 %v1461_v52, %v1373_v56  ;;  %1687 = vmatmul.bf16.gmra.mxu0 %v2321_v42 }
 0x172   :  { %1776 = vmatmul.bf16.gmra.mxu1 %v2325_v48 }
 0x173   :  { %1865 = vmatmul.bf16.gmra.mxu2 %v2329_v53 }
 0x174   :  { %1954 = vmatmul.bf16.gmra.mxu3 %v2333_v54 }
 0x176   :  { %v1550_v60 = vpop.f32.mrf.mxu2  ;;  %v1374_v63 = vpop.f32.mrf.mxu0 }
 0x177   :  { %v1639_v61 = vpop.f32.mrf.mxu3  ;;  %v1551_v62 = vadd.f32 %v1550_v60, %v1462_v59  ;;  %v1463_v0 = vpop.f32.mrf.mxu1  ;;  %v1375_v4 = vadd.f32 %v3570_v20, %v1374_v63  ;;  %v2384_v59 = vld [vmem:[%s4363_s0 + $0x1d0] sm:$0xf]  ;;  %v2973_v63 = vld [vmem:[%s4363_s0 + $0x1f4] sm:$0xf0] }
 0x178   :  { %v2972_v60 = vld [vmem:[%s4363_s0 + $0x1ec] sm:$0xf0] }
 0x179   :  { %v4024_v6 = vadd.f32 %v1639_v61, %v1551_v62  ;;  %v1464_v7 = vadd.f32 %v1463_v0, %v1375_v4  ;;  %v2968_v61 = vld [vmem:[%s4363_s0 + $0x1d4] sm:$0xf]  ;;  %v2969_v0 = vld [vmem:[%s4363_s0 + $0x1dc] sm:$0xf]  ;;  %v2385_v12 = vor.u32 %v2972_v60, %v2384_v59 }
 0x17a   :  { %v2386_v62 = vld [vmem:[%s4363_s0 + $0x1f0] sm:$0xf0]  ;;  %v2394_v4 = vld [vmem:[%s4363_s0 + $0x1f8] sm:$0xf0] }
 0x17b   :  { %v2389_v14 = vor.u32 %v2968_v61, %v2386_v62  ;;  %v2397_v23 = vor.u32 %v2969_v0, %v2394_v4  ;;  %v2977_v59 = vld [vmem:[%s4363_s0 + $0x21c] sm:$0xf] }
 0x17c   :  { %v2426_v60 = vld [vmem:[%s4363_s0 + $0x238] sm:$0xf0] }
 0x17e   :  { %v1552_v24 = vpop.f32.mrf.mxu2  ;;  %v1377_v31 = vpop.f32.mrf.mxu0 }
 0x17f   :  { %v1641_v26 = vpop.f32.mrf.mxu3  ;;  %v1553_v30 = vadd.f32 %v1552_v24, %v1464_v7  ;;  %v1466_v35 = vpop.f32.mrf.mxu1  ;;  %v1378_v39 = vadd.f32 %v3570_v20, %v1377_v31  ;;  %v3198_v24 = vld [vmem:[%s4362_s2] ss:$0 sm:$0xff] }
 0x181   :  { %v4051_v40 = vadd.f32 %v1641_v26, %v1553_v30  ;;  %v1467_v41 = vadd.f32 %v1466_v35, %v1378_v39  ;;  %1692 = vmatmul.bf16.gmra.mxu0 %v2353_v27 }
 0x182   :  { %1781 = vmatmul.bf16.gmra.mxu1 %v2357_v29 }
 0x183   :  { %1870 = vmatmul.bf16.gmra.mxu2 %v2361_v36 }
 0x184   :  { %1959 = vmatmul.bf16.gmra.mxu3 %v2365_v37 }
 0x186   :  { %v1555_v42 = vpop.f32.mrf.mxu2  ;;  %v1379_v51 = vpop.f32.mrf.mxu0 }
 0x187   :  { %v1644_v48 = vpop.f32.mrf.mxu3  ;;  %v1556_v50 = vadd.f32 %v1555_v42, %v1467_v41  ;;  %v1468_v52 = vpop.f32.mrf.mxu1  ;;  %v1380_v53 = vadd.f32 %v3570_v20, %v1379_v51  ;;  %v2392_v20 = vld [vmem:[%s4363_s0 + $0x1d8] sm:$0xf]  ;;  %v2976_v51 = vld [vmem:[%s4363_s0 + $0x214] sm:$0xf] }
 0x188   :  { %v2393_v22 = vor.u32 %v2973_v63, %v2392_v20 }
 0x189   :  { %v4054_v54 = vadd.f32 %v1644_v48, %v1556_v50  ;;  %v1469_v56 = vadd.f32 %v1468_v52, %v1380_v53  ;;  %v2416_v48 = vld [vmem:[%s4363_s0 + $0x210] sm:$0xf]  ;;  %v2418_v52 = vld [vmem:[%s4363_s0 + $0x230] sm:$0xf0]  ;;  %v2424_v53 = vld [vmem:[%s4363_s0 + $0x218] sm:$0xf] }
 0x18a   :  { %v2980_v50 = vld [vmem:[%s4363_s0 + $0x22c] sm:$0xf0]  ;;  %v2421_v63 = vor.u32 %v2976_v51, %v2418_v52 }
 0x18b   :  { %v2417_v20 = vor.u32 %v2980_v50, %v2416_v48 }
 0x18e   :  { %v1557_v7 = vpop.f32.mrf.mxu2  ;;  %v1382_v17 = vpop.f32.mrf.mxu0 }
 0x18f   :  { %v1646_v9 = vpop.f32.mrf.mxu3  ;;  %v1558_v16 = vadd.f32 %v1557_v7, %v1469_v56  ;;  %v1471_v21 = vpop.f32.mrf.mxu1  ;;  %v1383_v26 = vadd.f32 %v3198_v24, %v1382_v17  ;;  %v2981_v56 = vld [vmem:[%s4363_s0 + $0x234] sm:$0xf0] }
 0x191   :  { %v4083_v27 = vadd.f32 %v1646_v9, %v1558_v16  ;;  %v1472_v29 = vadd.f32 %v1471_v21, %v1383_v26  ;;  %1697 = vmatmul.bf16.gmra.mxu0 %v2385_v12  ;;  %v2425_v9 = vor.u32 %v2981_v56, %v2424_v53  ;;  %v2429_v12 = vor.u32 %v2977_v59, %v2426_v60 }
 0x192   :  { %1786 = vmatmul.bf16.gmra.mxu1 %v2389_v14 }
 0x193   :  { %1875 = vmatmul.bf16.gmra.mxu2 %v2393_v22 }
 0x194   :  { %1964 = vmatmul.bf16.gmra.mxu3 %v2397_v23 }
 0x196   :  { %v1560_v30 = vpop.f32.mrf.mxu2  ;;  %v1384_v36 = vpop.f32.mrf.mxu0 }
 0x197   :  { %v1649_v31 = vpop.f32.mrf.mxu3  ;;  %v1561_v35 = vadd.f32 %v1560_v30, %v1472_v29  ;;  %v1473_v37 = vpop.f32.mrf.mxu1  ;;  %v1385_v39 = vadd.f32 %v3198_v24, %v1384_v36  ;;  %v2448_v30 = vld [vmem:[%s4363_s0 + $0x250] sm:$0xf]  ;;  %v2989_v36 = vld [vmem:[%s4363_s0 + $0x274] sm:$0xf0] }
 0x199   :  { %v4085_v41 = vadd.f32 %v1649_v31, %v1561_v35  ;;  %v1474_v42 = vadd.f32 %v1473_v37, %v1385_v39  ;;  %v2988_v31 = vld [vmem:[%s4363_s0 + $0x26c] sm:$0xf0]  ;;  %v2450_v35 = vld [vmem:[%s4363_s0 + $0x270] sm:$0xf0]  ;;  %v2985_v37 = vld [vmem:[%s4363_s0 + $0x25c] sm:$0xf] }
 0x19a   :  { %v2458_v39 = vld [vmem:[%s4363_s0 + $0x278] sm:$0xf0]  ;;  %v2449_v52 = vor.u32 %v2988_v31, %v2448_v30  ;;  %v2992_v30 = vld [vmem:[%s4363_s0 + $0x294] sm:$0xf] }
 0x19b   :  { %v2482_v31 = vld [vmem:[%s4363_s0 + $0x2b0] sm:$0xf0] }
 0x19e   :  { %v1562_v61 = vpop.f32.mrf.mxu2  ;;  %v1663_v4 = vpop.f32.mrf.mxu0 }
 0x19f   :  { %v1651_v62 = vpop.f32.mrf.mxu3  ;;  %v1563_v0 = vadd.f32 %v1562_v61, %v1474_v42  ;;  %v1752_v7 = vpop.f32.mrf.mxu1  ;;  %v1664_v16 = vadd.f32 %v1663_v4, %v3607_v46  ;;  %v2984_v46 = vld [vmem:[%s4363_s0 + $0x254] sm:$0xf] }
 0x1a0   :  { %v2453_v53 = vor.u32 %v2984_v46, %v2450_v35  ;;  %v2997_v46 = vld [vmem:[%s4363_s0 + $0x2b4] sm:$0xf0]  ;;  %v2993_v35 = vld [vmem:[%s4363_s0 + $0x29c] sm:$0xf] }
 0x1a1   :  { %v4111_v14 = vadd.f32 %v1651_v62, %v1563_v0  ;;  %1702 = vmatmul.bf16.gmra.mxu0 %v2417_v20  ;;  %v1753_v22 = vadd.f32 %v1752_v7, %v1664_v16  ;;  %v2461_v62 = vor.u32 %v2985_v37, %v2458_v39 }
 0x1a2   :  { %1791 = vmatmul.bf16.gmra.mxu1 %v2421_v63 }
 0x1a3   :  { %1880 = vmatmul.bf16.gmra.mxu2 %v2425_v9 }
 0x1a4   :  { %1969 = vmatmul.bf16.gmra.mxu3 %v2429_v12 }
 0x1a6   :  { %v1841_v17 = vpop.f32.mrf.mxu2  ;;  %v1665_v23 = vpop.f32.mrf.mxu0 }
 0x1a7   :  { %v1930_v21 = vpop.f32.mrf.mxu3  ;;  %v1754_v24 = vpop.f32.mrf.mxu1  ;;  %v1842_v26 = vadd.f32 %v1841_v17, %v1753_v22  ;;  %v1666_v29 = vadd.f32 %v1665_v23, %v3637_v3  ;;  %v2456_v3 = vld [vmem:[%s4363_s0 + $0x258] sm:$0xf] }
 0x1a8   :  { %v2457_v61 = vor.u32 %v2989_v36, %v2456_v3  ;;  %v2490_v3 = vld [vmem:[%s4363_s0 + $0x2b8] sm:$0xf0] }
 0x1a9   :  { %v1931_v42 = vadd.f32 %v1930_v21, %v1842_v26  ;;  %v1755_v48 = vadd.f32 %v1754_v24, %v1666_v29  ;;  %v2996_v29 = vld [vmem:[%s4363_s0 + $0x2ac] sm:$0xf0] }
 0x1ab   :  { %v2010_v20 = vmul.f32 0.1, %v1931_v42 }
 0x1ad   :  { %v2042_v7 = vmax.f32 %v1931_v42, %v2010_v20 }
 0x1ae   :  { %v1843_v50 = vpop.f32.mrf.mxu2  ;;  %v1668_v59 = vpop.f32.mrf.mxu0 }
 0x1af   :  { %v1932_v51 = vpop.f32.mrf.mxu3  ;;  %v1844_v56 = vadd.f32 %v1843_v50, %v1755_v48  ;;  %v1757_v60 = vpop.f32.mrf.mxu1  ;;  %v1669_v4 = vadd.f32 %v1668_v59, %v3640_v11  ;;  %v2480_v11 = vld [vmem:[%s4363_s0 + $0x290] sm:$0xf]  ;;  %v2485_v50 = vor.u32 %v2992_v30, %v2482_v31  ;;  %v2493_v59 = vor.u32 %v2993_v35, %v2490_v3  ;;  %v2522_v30 = vld [vmem:[%s4363_s0 + $0x2f8] sm:$0xf0] }
 0x1b0   :  { %v2481_v48 = vor.u32 %v2996_v29, %v2480_v11  ;;  %v3005_v11 = vld [vmem:[%s4363_s0 + $0x2f4] sm:$0xf0]  ;;  %v3001_v29 = vld [vmem:[%s4363_s0 + $0x2dc] sm:$0xf] }
 0x1b1   :  { %v1933_v63 = vadd.f32 %v1932_v51, %v1844_v56  ;;  %1707 = vmatmul.bf16.gmra.mxu0 %v2449_v52  ;;  %v1758_v21 = vadd.f32 %v1757_v60, %v1669_v4 }
 0x1b2   :  { %1796 = vmatmul.bf16.gmra.mxu1 %v2453_v53 }
 0x1b3   :  { %v2011_v0 = vmul.f32 0.1, %v1933_v63  ;;  %1885 = vmatmul.bf16.gmra.mxu2 %v2457_v61 }
 0x1b4   :  { %1974 = vmatmul.bf16.gmra.mxu3 %v2461_v62 }
 0x1b5   :  { %v2043_v9 = vmax.f32 %v1933_v63, %v2011_v0 }
 0x1b6   :  { %v1846_v12 = vpop.f32.mrf.mxu2  ;;  %v1670_v22 = vpop.f32.mrf.mxu0 }
 0x1b7   :  { %v1935_v16 = vpop.f32.mrf.mxu3  ;;  %v3105_v17 = vpack.c.bf16 %v2043_v9, %v2042_v7  ;;  %v1759_v23 = vpop.f32.mrf.mxu1  ;;  %v1847_v24 = vadd.f32 %v1846_v12, %v1758_v21  ;;  %v1671_v26 = vadd.f32 %v1670_v22, %v3667_v32  ;;  %v2488_v32 = vld [vmem:[%s4363_s0 + $0x298] sm:$0xf] }
 0x1b8   :  { %v2489_v56 = vor.u32 %v2997_v46, %v2488_v32 }
 0x1b9   :  { %3106 = vst [vmem:[%s4364_s3] sm:$0xff] %v3105_v17   ;;  %v1936_v36 = vadd.f32 %v1935_v16, %v1847_v24  ;;  %v1760_v37 = vadd.f32 %v1759_v23, %v1671_v26  ;;  %v3004_v23 = vld [vmem:[%s4363_s0 + $0x2ec] sm:$0xf0]  ;;  %v3000_v24 = vld [vmem:[%s4363_s0 + $0x2d4] sm:$0xf] }
 0x1ba   :  { %v2514_v26 = vld [vmem:[%s4363_s0 + $0x2f0] sm:$0xf0] }
 0x1bb   :  { %v2012_v60 = vmul.f32 0.1, %v1936_v36 }
 0x1bd   :  { %v2044_v63 = vmax.f32 %v1936_v36, %v2012_v60  ;;  %v2517_v36 = vor.u32 %v3000_v24, %v2514_v26 }
 0x1be   :  { %v1848_v39 = vpop.f32.mrf.mxu2  ;;  %v1673_v52 = vpop.f32.mrf.mxu0 }
 0x1bf   :  { %v1937_v42 = vpop.f32.mrf.mxu3  ;;  %v1849_v51 = vadd.f32 %v1848_v39, %v1760_v37  ;;  %v1762_v53 = vpop.f32.mrf.mxu1  ;;  %v1674_v20 = vadd.f32 %v1673_v52, %v3679_v43  ;;  %v2512_v43 = vld [vmem:[%s4363_s0 + $0x2d0] sm:$0xf] }
 0x1c0   :  { %v2513_v3 = vor.u32 %v3004_v23, %v2512_v43  ;;  %v2554_v43 = vld [vmem:[%s4363_s0 + $0x338] sm:$0xf0] }
 0x1c1   :  { %v1938_v61 = vadd.f32 %v1937_v42, %v1849_v51  ;;  %1712 = vmatmul.bf16.gmra.mxu0 %v2481_v48  ;;  %v1763_v12 = vadd.f32 %v1762_v53, %v1674_v20 }
 0x1c2   :  { %1801 = vmatmul.bf16.gmra.mxu1 %v2485_v50  ;;  %v2525_v50 = vor.u32 %v3001_v29, %v2522_v30 }
 0x1c3   :  { %v2013_v62 = vmul.f32 0.1, %v1938_v61  ;;  %1890 = vmatmul.bf16.gmra.mxu2 %v2489_v56 }
 0x1c4   :  { %1979 = vmatmul.bf16.gmra.mxu3 %v2493_v59 }
 0x1c5   :  { %v2045_v0 = vmax.f32 %v1938_v61, %v2013_v62 }
 0x1c6   :  { %v1851_v4 = vpop.f32.mrf.mxu2  ;;  %v1675_v16 = vpop.f32.mrf.mxu0 }
 0x1c7   :  { %v1940_v7 = vpop.f32.mrf.mxu3  ;;  %v3110_v9 = vpack.c.bf16 %v2045_v0, %v2044_v63  ;;  %v1764_v17 = vpop.f32.mrf.mxu1  ;;  %v1852_v21 = vadd.f32 %v1851_v4, %v1763_v12  ;;  %v1676_v22 = vadd.f32 %v1675_v16, %v3709_v1  ;;  %v2520_v1 = vld [vmem:[%s4363_s0 + $0x2d8] sm:$0xf]  ;;  %v3012_v12 = vld [vmem:[%s4363_s0 + $0x32c] sm:$0xf0]  ;;  %v3008_v16 = vld [vmem:[%s4363_s0 + $0x314] sm:$0xf] }
 0x1c8   :  { %v2521_v48 = vor.u32 %v3005_v11, %v2520_v1 }
 0x1c9   :  { %3182 = vst [vmem:[%s4364_s3 + $0x8] sm:$0xff] %v3110_v9   ;;  %v1941_v31 = vadd.f32 %v1940_v7, %v1852_v21  ;;  %v1765_v32 = vadd.f32 %v1764_v17, %v1676_v22  ;;  %v2546_v17 = vld [vmem:[%s4363_s0 + $0x330] sm:$0xf0]  ;;  %v3013_v21 = vld [vmem:[%s4363_s0 + $0x334] sm:$0xf0] }
 0x1ca   :  { %v3009_v22 = vld [vmem:[%s4363_s0 + $0x31c] sm:$0xf]  ;;  %v2549_v29 = vor.u32 %v3008_v16, %v2546_v17 }
 0x1cb   :  { %v2014_v51 = vmul.f32 0.1, %v1941_v31 }
 0x1cd   :  { %v2046_v59 = vmax.f32 %v1941_v31, %v2014_v51 }
 0x1ce   :  { %v1853_v46 = vpop.f32.mrf.mxu2  ;;  %v1678_v39 = vpop.f32.mrf.mxu0 }
 0x1cf   :  { %v1942_v35 = vpop.f32.mrf.mxu3  ;;  %v1854_v37 = vadd.f32 %v1853_v46, %v1765_v32  ;;  %v1767_v42 = vpop.f32.mrf.mxu1  ;;  %v1679_v56 = vadd.f32 %v1678_v39, %v3712_v10  ;;  %v2544_v10 = vld [vmem:[%s4363_s0 + $0x310] sm:$0xf] }
 0x1d0   :  { %v2545_v11 = vor.u32 %v3012_v12, %v2544_v10 }
 0x1d1   :  { %v1943_v52 = vadd.f32 %v1942_v35, %v1854_v37  ;;  %1717 = vmatmul.bf16.gmra.mxu0 %v2513_v3  ;;  %v1768_v63 = vadd.f32 %v1767_v42, %v1679_v56  ;;  %v2557_v35 = vor.u32 %v3009_v22, %v2554_v43 }
 0x1d2   :  { %1806 = vmatmul.bf16.gmra.mxu1 %v2517_v36 }
 0x1d3   :  { %v2015_v53 = vmul.f32 0.1, %v1943_v52  ;;  %1895 = vmatmul.bf16.gmra.mxu2 %v2521_v48 }
 0x1d4   :  { %1984 = vmatmul.bf16.gmra.mxu3 %v2525_v50 }
 0x1d5   :  { %v2047_v60 = vmax.f32 %v1943_v52, %v2015_v53 }
 0x1d6   :  { %v1856_v61 = vpop.f32.mrf.mxu2  ;;  %v1680_v0 = vpop.f32.mrf.mxu0 }
 0x1d7   :  { %v1945_v62 = vpop.f32.mrf.mxu3  ;;  %v3115_v20 = vpack.c.bf16 %v2047_v60, %v2046_v59  ;;  %v1769_v4 = vpop.f32.mrf.mxu1  ;;  %v1857_v7 = vadd.f32 %v1856_v61, %v1768_v63  ;;  %v1681_v9 = vadd.f32 %v1680_v0, %v3739_v33  ;;  %v2552_v33 = vld [vmem:[%s4363_s0 + $0x318] sm:$0xf]  ;;  %v2578_v63 = vld [vmem:[%s4363_s0 + $0x370] sm:$0xf0] }
 0x1d8   :  { %v2553_v46 = vor.u32 %v3013_v21, %v2552_v33  ;;  %v3021_v0 = vld [vmem:[%s4363_s0 + $0x374] sm:$0xf0] }
 0x1d9   :  { %3183 = vst [vmem:[%s4364_s3 + $0x10] sm:$0xff] %v3115_v20   ;;  %v1946_v23 = vadd.f32 %v1945_v62, %v1857_v7  ;;  %v1770_v24 = vadd.f32 %v1769_v4, %v1681_v9  ;;  %v3020_v62 = vld [vmem:[%s4363_s0 + $0x36c] sm:$0xf0]  ;;  %v3016_v20 = vld [vmem:[%s4363_s0 + $0x354] sm:$0xf] }
 0x1da   :  { %v3017_v4 = vld [vmem:[%s4363_s0 + $0x35c] sm:$0xf]  ;;  %v2581_v33 = vor.u32 %v3016_v20, %v2578_v63 }
 0x1db   :  { %v2016_v3 = vmul.f32 0.1, %v1946_v23  ;;  %v2586_v7 = vld [vmem:[%s4363_s0 + $0x378] sm:$0xf0] }
 0x1dd   :  { %v2048_v42 = vmax.f32 %v1946_v23, %v2016_v3 }
 0x1de   :  { %v1858_v26 = vpop.f32.mrf.mxu2  ;;  %v1683_v31 = vpop.f32.mrf.mxu0 }
 0x1df   :  { %v1947_v1 = vpop.f32.mrf.mxu3  ;;  %v1859_v30 = vadd.f32 %v1858_v26, %v1770_v24  ;;  %v1772_v32 = vpop.f32.mrf.mxu1  ;;  %v1684_v39 = vadd.f32 %v1683_v31, %v3751_v45  ;;  %v2576_v45 = vld [vmem:[%s4363_s0 + $0x350] sm:$0xf]  ;;  %v2589_v24 = vor.u32 %v3017_v4, %v2586_v7 }
 0x1e0   :  { %v2577_v17 = vor.u32 %v3020_v62, %v2576_v45 }
 0x1e1   :  { %v1948_v36 = vadd.f32 %v1947_v1, %v1859_v30  ;;  %1722 = vmatmul.bf16.gmra.mxu0 %v2545_v11  ;;  %v1773_v53 = vadd.f32 %v1772_v32, %v1684_v39 }
 0x1e2   :  { %1811 = vmatmul.bf16.gmra.mxu1 %v2549_v29 }
 0x1e3   :  { %v2017_v37 = vmul.f32 0.1, %v1948_v36  ;;  %1900 = vmatmul.bf16.gmra.mxu2 %v2553_v46 }
 0x1e4   :  { %1989 = vmatmul.bf16.gmra.mxu3 %v2557_v35 }
 0x1e5   :  { %v2049_v48 = vmax.f32 %v1948_v36, %v2017_v37 }
 0x1e6   :  { %v1861_v50 = vpop.f32.mrf.mxu2  ;;  %v1685_v56 = vpop.f32.mrf.mxu0 }
 0x1e7   :  { %v1950_v51 = vpop.f32.mrf.mxu3  ;;  %v3120_v52 = vpack.c.bf16 %v2049_v48, %v2048_v42  ;;  %v1774_v59 = vpop.f32.mrf.mxu1  ;;  %v1862_v60 = vadd.f32 %v1861_v50, %v1773_v53  ;;  %v1686_v61 = vadd.f32 %v1685_v56, %v3781_v5  ;;  %v2584_v5 = vld [vmem:[%s4363_s0 + $0x358] sm:$0xf]  ;;  %v3028_v48 = vld [vmem:[%s4363_s0 + $0x3ac] sm:$0xf0]  ;;  %v3024_v50 = vld [vmem:[%s4363_s0 + $0x394] sm:$0xf] }
 0x1e8   :  { %v2585_v23 = vor.u32 %v3021_v0, %v2584_v5  ;;  %v3025_v53 = vld [vmem:[%s4363_s0 + $0x39c] sm:$0xf] }
 0x1e9   :  { %3184 = vst [vmem:[%s4364_s3 + $0x18] sm:$0xff] %v3120_v52   ;;  %v1951_v9 = vadd.f32 %v1950_v51, %v1862_v60  ;;  %v1775_v10 = vadd.f32 %v1774_v59, %v1686_v61  ;;  %v2610_v51 = vld [vmem:[%s4363_s0 + $0x3b0] sm:$0xf0]  ;;  %v3029_v52 = vld [vmem:[%s4363_s0 + $0x3b4] sm:$0xf0] }
 0x1ea   :  { %v2618_v56 = vld [vmem:[%s4363_s0 + $0x3b8] sm:$0xf0]  ;;  %v2613_v20 = vor.u32 %v3024_v50, %v2610_v51 }
 0x1eb   :  { %v2018_v26 = vmul.f32 0.1, %v1951_v9  ;;  %v2621_v7 = vor.u32 %v3025_v53, %v2618_v56 }
 0x1ed   :  { %v2050_v30 = vmax.f32 %v1951_v9, %v2018_v26 }
 0x1ee   :  { %v1863_v12 = vpop.f32.mrf.mxu2  ;;  %v1688_v22 = vpop.f32.mrf.mxu0 }
 0x1ef   :  { %v1952_v16 = vpop.f32.mrf.mxu3  ;;  %v1864_v21 = vadd.f32 %v1863_v12, %v1775_v10  ;;  %v1777_v43 = vpop.f32.mrf.mxu1  ;;  %v1689_v29 = vadd.f32 %v1688_v22, %v3784_v15  ;;  %v2608_v15 = vld [vmem:[%s4363_s0 + $0x390] sm:$0xf] }
 0x1f0   :  { %v2609_v62 = vor.u32 %v3028_v48, %v2608_v15 }
 0x1f1   :  { %v1953_v1 = vadd.f32 %v1952_v16, %v1864_v21  ;;  %1727 = vmatmul.bf16.gmra.mxu0 %v2577_v17  ;;  %v1778_v3 = vadd.f32 %v1777_v43, %v1689_v29  ;;  %v3036_v29 = vld [vmem:[%s4363_s0 + $0x3ec] sm:$0xf0] }
 0x1f2   :  { %1816 = vmatmul.bf16.gmra.mxu1 %v2581_v33 }
 0x1f3   :  { %v2019_v11 = vmul.f32 0.1, %v1953_v1  ;;  %1905 = vmatmul.bf16.gmra.mxu2 %v2585_v23 }
 0x1f4   :  { %1994 = vmatmul.bf16.gmra.mxu3 %v2589_v24 }
 0x1f5   :  { %v2051_v31 = vmax.f32 %v1953_v1, %v2019_v11 }
 0x1f6   :  { %v1866_v32 = vpop.f32.mrf.mxu2  ;;  %v1690_v36 = vpop.f32.mrf.mxu0 }
 0x1f7   :  { %v1955_v46 = vpop.f32.mrf.mxu3  ;;  %v3125_v35 = vpack.c.bf16 %v2051_v31, %v2050_v30  ;;  %v1779_v37 = vpop.f32.mrf.mxu1  ;;  %v1867_v39 = vadd.f32 %v1866_v32, %v1778_v3  ;;  %v1691_v42 = vadd.f32 %v1690_v36, %v3811_v38  ;;  %v2616_v38 = vld [vmem:[%s4363_s0 + $0x398] sm:$0xf]  ;;  %v3032_v30 = vld [vmem:[%s4363_s0 + $0x3d4] sm:$0xf] }
 0x1f8   :  { %v2617_v4 = vor.u32 %v3029_v52, %v2616_v38  ;;  %v2642_v31 = vld [vmem:[%s4363_s0 + $0x3f0] sm:$0xf0]  ;;  %v3037_v32 = vld [vmem:[%s4363_s0 + $0x3f4] sm:$0xf0] }
 0x1f9   :  { %3185 = vst [vmem:[%s4364_s3 + $0x20] sm:$0xff] %v3125_v35   ;;  %v1956_v59 = vadd.f32 %v1955_v46, %v1867_v39  ;;  %v1780_v60 = vadd.f32 %v1779_v37, %v1691_v42  ;;  %v3033_v46 = vld [vmem:[%s4363_s0 + $0x3dc] sm:$0xf]  ;;  %v2645_v15 = vor.u32 %v3032_v30, %v2642_v31 }
 0x1fa   :  { %v2650_v35 = vld [vmem:[%s4363_s0 + $0x3f8] sm:$0xf0] }
 0x1fb   :  { %v2020_v9 = vmul.f32 0.1, %v1956_v59  ;;  %v2653_v52 = vor.u32 %v3033_v46, %v2650_v35 }
 0x1fd   :  { %v2052_v17 = vmax.f32 %v1956_v59, %v2020_v9 }
 0x1fe   :  { %v1868_v61 = vpop.f32.mrf.mxu2  ;;  %v1693_v5 = vpop.f32.mrf.mxu0 }
 0x1ff   :  { %v1957_v45 = vpop.f32.mrf.mxu3  ;;  %v1869_v63 = vadd.f32 %v1868_v61, %v1780_v60  ;;  %v1782_v0 = vpop.f32.mrf.mxu1  ;;  %v1694_v16 = vadd.f32 %v1693_v5, %v3814_v49  ;;  %v2640_v49 = vld [vmem:[%s4363_s0 + $0x3d0] sm:$0xf] }
 0x200   :  { %v2641_v42 = vor.u32 %v3036_v29, %v2640_v49 }
 0x201   :  { %v1958_v10 = vadd.f32 %v1957_v45, %v1869_v63  ;;  %1732 = vmatmul.bf16.gmra.mxu0 %v2609_v62  ;;  %v1783_v23 = vadd.f32 %v1782_v0, %v1694_v16 }
 0x202   :  { %1821 = vmatmul.bf16.gmra.mxu1 %v2613_v20 }
 0x203   :  { %v2021_v12 = vmul.f32 0.1, %v1958_v10  ;;  %1910 = vmatmul.bf16.gmra.mxu2 %v2617_v4 }
 0x204   :  { %1999 = vmatmul.bf16.gmra.mxu3 %v2621_v7 }
 0x205   :  { %v2053_v33 = vmax.f32 %v1958_v10, %v2021_v12 }
 0x206   :  { %v1871_v21 = vpop.f32.mrf.mxu2  ;;  %v1695_v24 = vpop.f32.mrf.mxu0 }
 0x207   :  { %v1960_v22 = vpop.f32.mrf.mxu3  ;;  %v3130_v43 = vpack.c.bf16 %v2053_v33, %v2052_v17  ;;  %v1784_v26 = vpop.f32.mrf.mxu1  ;;  %v1872_v1 = vadd.f32 %v1871_v21, %v1783_v23  ;;  %v1696_v11 = vadd.f32 %v1695_v24, %v3841_v8  ;;  %v2648_v8 = vld [vmem:[%s4363_s0 + $0x3d8] sm:$0xf] }
 0x208   :  { %v2649_v38 = vor.u32 %v3037_v32, %v2648_v8 }
 0x209   :  { %3186 = vst [vmem:[%s4364_s3 + $0x28] sm:$0xff] %v3130_v43   ;;  %v1961_v3 = vadd.f32 %v1960_v22, %v1872_v1  ;;  %v1785_v36 = vadd.f32 %v1784_v26, %v1696_v11 }
 0x20b   :  { %v2022_v53 = vmul.f32 0.1, %v1961_v3 }
 0x20d   :  { %v2054_v61 = vmax.f32 %v1961_v3, %v2022_v53 }
 0x20e   :  { %v1873_v37 = vpop.f32.mrf.mxu2  ;;  %v1698_v50 = vpop.f32.mrf.mxu0 }
 0x20f   :  { %v1962_v39 = vpop.f32.mrf.mxu3  ;;  %v1874_v48 = vadd.f32 %v1873_v37, %v1785_v36  ;;  %v1787_v51 = vpop.f32.mrf.mxu1  ;;  %v1699_v60 = vadd.f32 %v1698_v50, %v3844_v19 }
 0x211   :  { %v1963_v56 = vadd.f32 %v1962_v39, %v1874_v48  ;;  %1737 = vmatmul.bf16.gmra.mxu0 %v2641_v42  ;;  %v1788_v5 = vadd.f32 %v1787_v51, %v1699_v60 }
 0x212   :  { %1826 = vmatmul.bf16.gmra.mxu1 %v2645_v15 }
 0x213   :  { %v2023_v59 = vmul.f32 0.1, %v1963_v56  ;;  %1915 = vmatmul.bf16.gmra.mxu2 %v2649_v38 }
 0x214   :  { %2004 = vmatmul.bf16.gmra.mxu3 %v2653_v52 }
 0x215   :  { %v2055_v45 = vmax.f32 %v1963_v56, %v2023_v59 }
 0x216   :  { %v1876_v62 = vpop.f32.mrf.mxu2  ;;  %v1700_v0 = vpop.f32.mrf.mxu0 }
 0x217   :  { %v1965_v20 = vpop.f32.mrf.mxu3  ;;  %v3135_v63 = vpack.c.bf16 %v2055_v45, %v2054_v61  ;;  %v1789_v4 = vpop.f32.mrf.mxu1  ;;  %v1877_v7 = vadd.f32 %v1876_v62, %v1788_v5  ;;  %v1701_v9 = vadd.f32 %v1700_v0, %v3871_v44 }
 0x219   :  { %3187 = vst [vmem:[%s4364_s3 + $0x30] sm:$0xff] %v3135_v63   ;;  %v1966_v10 = vadd.f32 %v1965_v20, %v1877_v7  ;;  %v1790_v12 = vadd.f32 %v1789_v4, %v1701_v9 }
 0x21b   :  { %v2024_v22 = vmul.f32 0.1, %v1966_v10 }
 0x21d   :  { %v2056_v26 = vmax.f32 %v1966_v10, %v2024_v22 }
 0x21e   :  { %v1878_v19 = vpop.f32.mrf.mxu2  ;;  %v1703_v33 = vpop.f32.mrf.mxu0 }
 0x21f   :  { %v1967_v16 = vpop.f32.mrf.mxu3  ;;  %v1879_v17 = vadd.f32 %v1878_v19, %v1790_v12  ;;  %v1792_v21 = vpop.f32.mrf.mxu1  ;;  %v1704_v24 = vadd.f32 %v1703_v33, %v3874_v55 }
 0x221   :  { %v1968_v43 = vadd.f32 %v1967_v16, %v1879_v17  ;;  %v1793_v30 = vadd.f32 %v1792_v21, %v1704_v24 }
 0x223   :  { %v2025_v23 = vmul.f32 0.1, %v1968_v43 }
 0x225   :  { %v2057_v1 = vmax.f32 %v1968_v43, %v2025_v23 }
 0x226   :  { %v1881_v11 = vpop.f32.mrf.mxu2  ;;  %v1705_v31 = vpop.f32.mrf.mxu0 }
 0x227   :  { %v1970_v49 = vpop.f32.mrf.mxu3  ;;  %v3140_v29 = vpack.c.bf16 %v2057_v1, %v2056_v26  ;;  %v1794_v44 = vpop.f32.mrf.mxu1  ;;  %v1882_v8 = vadd.f32 %v1881_v11, %v1793_v30  ;;  %v1706_v32 = vadd.f32 %v1705_v31, %v3901_v18 }
 0x229   :  { %3188 = vst [vmem:[%s4364_s3 + $0x38] sm:$0xff] %v3140_v29   ;;  %v1971_v46 = vadd.f32 %v1970_v49, %v1882_v8  ;;  %v1795_v35 = vadd.f32 %v1794_v44, %v1706_v32 }
 0x22b   :  { %v2026_v42 = vmul.f32 0.1, %v1971_v46 }
 0x22d   :  { %v2058_v51 = vmax.f32 %v1971_v46, %v2026_v42 }
 0x22e   :  { %v1883_v3 = vpop.f32.mrf.mxu2  ;;  %v1708_v37 = vpop.f32.mrf.mxu0 }
 0x22f   :  { %v1972_v36 = vpop.f32.mrf.mxu3  ;;  %v1884_v55 = vadd.f32 %v1883_v3, %v1795_v35  ;;  %v1797_v39 = vpop.f32.mrf.mxu1  ;;  %v1709_v50 = vadd.f32 %v1708_v37, %v3904_v28 }
 0x231   :  { %v1973_v15 = vadd.f32 %v1972_v36, %v1884_v55  ;;  %v1798_v59 = vadd.f32 %v1797_v39, %v1709_v50 }
 0x233   :  { %v2027_v48 = vmul.f32 0.1, %v1973_v15 }
 0x235   :  { %v2059_v38 = vmax.f32 %v1973_v15, %v2027_v48 }
 0x236   :  { %v1886_v52 = vpop.f32.mrf.mxu2  ;;  %v1710_v60 = vpop.f32.mrf.mxu0 }
 0x237   :  { %v1975_v53 = vpop.f32.mrf.mxu3  ;;  %v3145_v56 = vpack.c.bf16 %v2059_v38, %v2058_v51  ;;  %v1799_v18 = vpop.f32.mrf.mxu1  ;;  %v1887_v61 = vadd.f32 %v1886_v52, %v1798_v59  ;;  %v1711_v45 = vadd.f32 %v1710_v60, %v3931_v57 }
 0x239   :  { %3189 = vst [vmem:[%s4364_s3 + $0x40] sm:$0xff] %v3145_v56   ;;  %v1976_v62 = vadd.f32 %v1975_v53, %v1887_v61  ;;  %v1800_v20 = vadd.f32 %v1799_v18, %v1711_v45 }
 0x23b   :  { %v2028_v7 = vmul.f32 0.1, %v1976_v62 }
 0x23d   :  { %v2060_v19 = vmax.f32 %v1976_v62, %v2028_v7 }
 0x23e   :  { %v1888_v63 = vpop.f32.mrf.mxu2  ;;  %v1713_v0 = vpop.f32.mrf.mxu0 }
 0x23f   :  { %v1977_v5 = vpop.f32.mrf.mxu3  ;;  %v1889_v28 = vadd.f32 %v1888_v63, %v1800_v20  ;;  %v1802_v4 = vpop.f32.mrf.mxu1  ;;  %v1714_v12 = vadd.f32 %v1713_v0, %v3934_v2 }
 0x241   :  { %v1978_v9 = vadd.f32 %v1977_v5, %v1889_v28  ;;  %v1803_v22 = vadd.f32 %v1802_v4, %v1714_v12 }
 0x243   :  { %v2029_v10 = vmul.f32 0.1, %v1978_v9 }
 0x245   :  { %v2061_v16 = vmax.f32 %v1978_v9, %v2029_v10 }
 0x246   :  { %v1891_v17 = vpop.f32.mrf.mxu2  ;;  %v1715_v43 = vpop.f32.mrf.mxu0 }
 0x247   :  { %v1980_v33 = vpop.f32.mrf.mxu3  ;;  %v3150_v21 = vpack.c.bf16 %v2061_v16, %v2060_v19  ;;  %v1804_v57 = vpop.f32.mrf.mxu1  ;;  %v1892_v23 = vadd.f32 %v1891_v17, %v1803_v22  ;;  %v1716_v24 = vadd.f32 %v1715_v43, %v3961_v34 }
 0x249   :  { %3190 = vst [vmem:[%s4364_s3 + $0x48] sm:$0xff] %v3150_v21   ;;  %v1981_v26 = vadd.f32 %v1980_v33, %v1892_v23  ;;  %v1805_v1 = vadd.f32 %v1804_v57, %v1716_v24 }
 0x24b   :  { %v2030_v31 = vmul.f32 0.1, %v1981_v26 }
 0x24d   :  { %v2062_v46 = vmax.f32 %v1981_v26, %v2030_v31 }
 0x24e   :  { %v1893_v11 = vpop.f32.mrf.mxu2  ;;  %v1718_v29 = vpop.f32.mrf.mxu0 }
 0x24f   :  { %v1982_v49 = vpop.f32.mrf.mxu3  ;;  %v1894_v2 = vadd.f32 %v1893_v11, %v1805_v1  ;;  %v1807_v30 = vpop.f32.mrf.mxu1  ;;  %v1719_v32 = vadd.f32 %v1718_v29, %v3964_v47 }
 0x251   :  { %v1983_v44 = vadd.f32 %v1982_v49, %v1894_v2  ;;  %v1808_v37 = vadd.f32 %v1807_v30, %v1719_v32 }
 0x253   :  { %v2031_v8 = vmul.f32 0.1, %v1983_v44 }
 0x255   :  { %v2063_v35 = vmax.f32 %v1983_v44, %v2031_v8 }
 0x256   :  { %v1896_v3 = vpop.f32.mrf.mxu2  ;;  %v1720_v39 = vpop.f32.mrf.mxu0 }
 0x257   :  { %v1985_v36 = vpop.f32.mrf.mxu3  ;;  %v3155_v55 = vpack.c.bf16 %v2063_v35, %v2062_v46  ;;  %v1809_v34 = vpop.f32.mrf.mxu1  ;;  %v1897_v42 = vadd.f32 %v1896_v3, %v1808_v37  ;;  %v1721_v15 = vadd.f32 %v1720_v39, %v3991_v13 }
 0x259   :  { %3191 = vst [vmem:[%s4364_s3 + $0x50] sm:$0xff] %v3155_v55   ;;  %v1986_v48 = vadd.f32 %v1985_v36, %v1897_v42  ;;  %v1810_v50 = vadd.f32 %v1809_v34, %v1721_v15 }
 0x25b   :  { %v2032_v56 = vmul.f32 0.1, %v1986_v48 }
 0x25d   :  { %v2064_v61 = vmax.f32 %v1986_v48, %v2032_v56 }
 0x25e   :  { %v1898_v51 = vpop.f32.mrf.mxu2  ;;  %v1723_v52 = vpop.f32.mrf.mxu0 }
 0x25f   :  { %v1987_v38 = vpop.f32.mrf.mxu3  ;;  %v1899_v47 = vadd.f32 %v1898_v51, %v1810_v50  ;;  %v1812_v53 = vpop.f32.mrf.mxu1  ;;  %v1724_v18 = vadd.f32 %v1723_v52, %v3994_v25 }
 0x261   :  { %v1988_v59 = vadd.f32 %v1987_v38, %v1899_v47  ;;  %v1813_v5 = vadd.f32 %v1812_v53, %v1724_v18 }
 0x263   :  { %v2033_v60 = vmul.f32 0.1, %v1988_v59 }
 0x265   :  { %v2065_v45 = vmax.f32 %v1988_v59, %v2033_v60 }
 0x266   :  { %v1901_v62 = vpop.f32.mrf.mxu2  ;;  %v1725_v28 = vpop.f32.mrf.mxu0 }
 0x267   :  { %v1990_v20 = vpop.f32.mrf.mxu3  ;;  %v3160_v63 = vpack.c.bf16 %v2065_v45, %v2064_v61  ;;  %v1814_v13 = vpop.f32.mrf.mxu1  ;;  %v1902_v0 = vadd.f32 %v1901_v62, %v1813_v5  ;;  %v1726_v4 = vadd.f32 %v1725_v28, %v4021_v58 }
 0x269   :  { %3192 = vst [vmem:[%s4364_s3 + $0x58] sm:$0xff] %v3160_v63   ;;  %v1991_v7 = vadd.f32 %v1990_v20, %v1902_v0  ;;  %v1815_v9 = vadd.f32 %v1814_v13, %v1726_v4 }
 0x26b   :  { %v2034_v17 = vmul.f32 0.1, %v1991_v7 }
 0x26d   :  { %v2066_v43 = vmax.f32 %v1991_v7, %v2034_v17 }
 0x26e   :  { %v1903_v10 = vpop.f32.mrf.mxu2  ;;  %v1728_v19 = vpop.f32.mrf.mxu0 }
 0x26f   :  { %v1992_v12 = vpop.f32.mrf.mxu3  ;;  %v1904_v25 = vadd.f32 %v1903_v10, %v1815_v9  ;;  %v1817_v16 = vpop.f32.mrf.mxu1  ;;  %v1729_v22 = vadd.f32 %v1728_v19, %v4024_v6 }
 0x271   :  { %v1993_v33 = vadd.f32 %v1992_v12, %v1904_v25  ;;  %v1818_v1 = vadd.f32 %v1817_v16, %v1729_v22 }
 0x273   :  { %v2035_v21 = vmul.f32 0.1, %v1993_v33 }
 0x275   :  { %v2067_v57 = vmax.f32 %v1993_v33, %v2035_v21 }
 0x276   :  { %v1906_v23 = vpop.f32.mrf.mxu2  ;;  %v1730_v11 = vpop.f32.mrf.mxu0 }
 0x277   :  { %v1995_v24 = vpop.f32.mrf.mxu3  ;;  %v3165_v26 = vpack.c.bf16 %v2067_v57, %v2066_v43  ;;  %v1819_v58 = vpop.f32.mrf.mxu1  ;;  %v1907_v49 = vadd.f32 %v1906_v23, %v1818_v1  ;;  %v1731_v2 = vadd.f32 %v1730_v11, %v4051_v40 }
 0x279   :  { %3193 = vst [vmem:[%s4364_s3 + $0x60] sm:$0xff] %v3165_v26   ;;  %v1996_v29 = vadd.f32 %v1995_v24, %v1907_v49  ;;  %v1820_v30 = vadd.f32 %v1819_v58, %v1731_v2 }
 0x27b   :  { %v2036_v46 = vmul.f32 0.1, %v1996_v29 }
 0x27d   :  { %v2068_v55 = vmax.f32 %v1996_v29, %v2036_v46 }
 0x27e   :  { %v1908_v31 = vpop.f32.mrf.mxu2  ;;  %v1733_v8 = vpop.f32.mrf.mxu0 }
 0x27f   :  { %v1997_v44 = vpop.f32.mrf.mxu3  ;;  %v1909_v6 = vadd.f32 %v1908_v31, %v1820_v30  ;;  %v1822_v32 = vpop.f32.mrf.mxu1  ;;  %v1734_v36 = vadd.f32 %v1733_v8, %v4054_v54 }
 0x281   :  { %v1998_v35 = vadd.f32 %v1997_v44, %v1909_v6  ;;  %v1823_v15 = vadd.f32 %v1822_v32, %v1734_v36 }
 0x283   :  { %v2037_v3 = vmul.f32 0.1, %v1998_v35 }
 0x285   :  { %v2069_v37 = vmax.f32 %v1998_v35, %v2037_v3 }
 0x286   :  { %v1911_v39 = vpop.f32.mrf.mxu2  ;;  %v1735_v48 = vpop.f32.mrf.mxu0 }
 0x287   :  { %v2000_v34 = vpop.f32.mrf.mxu3  ;;  %v3170_v42 = vpack.c.bf16 %v2069_v37, %v2068_v55  ;;  %v1824_v40 = vpop.f32.mrf.mxu1  ;;  %v1912_v50 = vadd.f32 %v1911_v39, %v1823_v15  ;;  %v1736_v51 = vadd.f32 %v1735_v48, %v4083_v27 }
 0x289   :  { %3194 = vst [vmem:[%s4364_s3 + $0x68] sm:$0xff] %v3170_v42   ;;  %v2001_v38 = vadd.f32 %v2000_v34, %v1912_v50  ;;  %v1825_v47 = vadd.f32 %v1824_v40, %v1736_v51 }
 0x28b   :  { %v2038_v59 = vmul.f32 0.1, %v2001_v38 }
 0x28d   :  { %v2070_v62 = vmax.f32 %v2001_v38, %v2038_v59 }
 0x28e   :  { %v1913_v52 = vpop.f32.mrf.mxu2  ;;  %v1738_v56 = vpop.f32.mrf.mxu0 }
 0x28f   :  { %v2002_v53 = vpop.f32.mrf.mxu3  ;;  %v1914_v54 = vadd.f32 %v1913_v52, %v1825_v47  ;;  %v1827_v18 = vpop.f32.mrf.mxu1  ;;  %v1739_v45 = vadd.f32 %v1738_v56, %v4085_v41 }
 0x291   :  { %v2003_v60 = vadd.f32 %v2002_v53, %v1914_v54  ;;  %v1828_v13 = vadd.f32 %v1827_v18, %v1739_v45 }
 0x293   :  { %v2039_v61 = vmul.f32 0.1, %v2003_v60 }
 0x295   :  { %v2071_v20 = vmax.f32 %v2003_v60, %v2039_v61 }
 0x296   :  { %v1916_v63 = vpop.f32.mrf.mxu2  ;;  %v1740_v0 = vpop.f32.mrf.mxu0 }
 0x297   :  { %v2005_v5 = vpop.f32.mrf.mxu3  ;;  %v3175_v28 = vpack.c.bf16 %v2071_v20, %v2070_v62  ;;  %v1917_v27 = vadd.f32 %v1916_v63, %v1828_v13  ;;  %v1741_v4 = vadd.f32 %v1740_v0, %v4111_v14  ;;  %v1829_v7 = vpop.f32.mrf.mxu1 }
 0x299   :  { %3195 = vst [vmem:[%s4364_s3 + $0x70] sm:$0xff] %v3175_v28   ;;  %v2006_v9 = vadd.f32 %v2005_v5, %v1917_v27  ;;  %v1830_v10 = vadd.f32 %v1829_v7, %v1741_v4 }
 0x29b   :  { %v2040_v19 = vmul.f32 0.1, %v2006_v9 }
 0x29d   :  { %v2072_v33 = vmax.f32 %v2006_v9, %v2040_v19 }
 0x29e   :  { %v1918_v12 = vpop.f32.mrf.mxu2 }
 0x29f   :  { %v1919_v25 = vadd.f32 %v1918_v12, %v1830_v10  ;;  %v2007_v41 = vpop.f32.mrf.mxu3 }
 0x2a1   :  { %v2008_v16 = vadd.f32 %v2007_v41, %v1919_v25 }
 0x2a3   :  { %v2041_v17 = vmul.f32 0.1, %v2008_v16 }
 0x2a5   :  { %v2073_v21 = vmax.f32 %v2008_v16, %v2041_v17 }
 0x2a7   :  { %v3180_v22 = vpack.c.bf16 %v2073_v21, %v2072_v33 }
 0x2a9   :  { %3196 = vst [vmem:[%s4364_s3 + $0x78] sm:$0xff] %v3180_v22  }

// kernel: _mrd_forward.11
= control target key start
LH: loop header
LB: loop body
LE: loop exit
PB: predicated region body
PF: predicated region fallthrough
CT: control target
= control target key end

     0   :  { %s2948_s1 = inlined_call_operand.vmem [shape: bf16[640,128], index: 1, kind: input, shape index: {}]   ;;  %s2949_s2 = inlined_call_operand.vmem [shape: f32[1,128], index: 2, kind: input, shape index: {}]   ;;  %s2950_s0 = inlined_call_operand.vmem [shape: bf16[256,640], index: 0, kind: input, shape index: {}]   ;;  %s2951_s3 = inlined_call_operand.vmem [shape: bf16[256,128], index: 3, kind: output, shape index: {}]  }
   0x1   :  { %v1994_v0 = vld [vmem:[%s2948_s1 + $0x38] sm:$0xff]  ;;  %v1993_v1 = vld [vmem:[%s2948_s1 + $0x30] sm:$0xff]  ;;  %v1992_v2 = vld [vmem:[%s2948_s1 + $0x28] sm:$0xff] }
   0x2   :  { %2122 = vmatpush.bf16.msra.mxu1 %v1994_v0  ;;  %2123 = vmatpush.bf16.msra.mxu2 %v1994_v0  ;;  %v1991_v3 = vld [vmem:[%s2948_s1 + $0x20] sm:$0xff]  ;;  %v1990_v4 = vld [vmem:[%s2948_s1 + $0x18] sm:$0xff]  ;;  %v1989_v5 = vld [vmem:[%s2948_s1 + $0x10] sm:$0xff] }
   0x3   :  { %2124 = vmatpush.bf16.msra.mxu3 %v1994_v0  ;;  %850 = vmatpush.bf16.msra.mxu0 %v1994_v0  ;;  %v1988_v6 = vld [vmem:[%s2948_s1 + $0x8] sm:$0xff]  ;;  %v1987_v7 = vld [vmem:[%s2948_s1] sm:$0xff]  ;;  %v1929_v9 = vld [vmem:[%s2950_s0 + $0xb0] sm:$0xf0] }
   0x4   :  { %v1509_v8 = vld [vmem:[%s2950_s0 + $0xa0] sm:$0xf]  ;;  %v1949_v11 = vld [vmem:[%s2950_s0 + $0x150] sm:$0xf0]  ;;  %v2010_v16 = vld [vmem:[%s2948_s1 + $0xb8] sm:$0xff] }
   0x5   :  { %v1589_v10 = vld [vmem:[%s2950_s0 + $0x140] sm:$0xf]  ;;  %v1969_v13 = vld [vmem:[%s2950_s0 + $0x1f0] sm:$0xf0]  ;;  %v2018_v17 = vld [vmem:[%s2948_s1 + $0xf8] sm:$0xff]  ;;  %v1510_v18 = vor.u32 %v1929_v9, %v1509_v8 }
   0x6   :  { %2125 = vmatpush.bf16.msra.mxu1 %v1993_v1  ;;  %2126 = vmatpush.bf16.msra.mxu2 %v1993_v1  ;;  %v1669_v12 = vld [vmem:[%s2950_s0 + $0x1e0] sm:$0xf]  ;;  %v1909_v15 = vld [vmem:[%s2950_s0 + $0x10] sm:$0xf0]  ;;  %v1590_v19 = vor.u32 %v1949_v11, %v1589_v10  ;;  %v2002_v22 = vld [vmem:[%s2948_s1 + $0x78] sm:$0xff] }
   0x7   :  { %2127 = vmatpush.bf16.msra.mxu3 %v1993_v1  ;;  %851 = vmatpush.bf16.msra.mxu0 %v1993_v1  ;;  %v1429_v14 = vld [vmem:[%s2950_s0] sm:$0xf]  ;;  %v1670_v20 = vor.u32 %v1969_v13, %v1669_v12  ;;  %v2026_v23 = vld [vmem:[%s2948_s1 + $0x138] sm:$0xff]  ;;  %v2009_v24 = vld [vmem:[%s2948_s1 + $0xb0] sm:$0xff] }
   0x8   :  { %v1430_v21 = vor.u32 %v1909_v15, %v1429_v14  ;;  %v2017_v25 = vld [vmem:[%s2948_s1 + $0xf0] sm:$0xff]  ;;  %v2008_v28 = vld [vmem:[%s2948_s1 + $0xa8] sm:$0xff]  ;;  %v2007_v33 = vld [vmem:[%s2948_s1 + $0xa0] sm:$0xff] }
   0x9   :  { %v2001_v26 = vld [vmem:[%s2948_s1 + $0x70] sm:$0xff]  ;;  %v2016_v29 = vld [vmem:[%s2948_s1 + $0xe8] sm:$0xff]  ;;  %v2015_v34 = vld [vmem:[%s2948_s1 + $0xe0] sm:$0xff] }
   0xa   :  { %2128 = vmatpush.bf16.msra.mxu1 %v1992_v2  ;;  %2129 = vmatpush.bf16.msra.mxu2 %v1992_v2  ;;  %v2025_v27 = vld [vmem:[%s2948_s1 + $0x130] sm:$0xff]  ;;  %v2000_v30 = vld [vmem:[%s2948_s1 + $0x68] sm:$0xff]  ;;  %v1934_v35 = vld [vmem:[%s2950_s0 + $0xd8] sm:$0xf0] }
   0xb   :  { %2130 = vmatpush.bf16.msra.mxu3 %v1992_v2  ;;  %852 = vmatpush.bf16.msra.mxu0 %v1992_v2  ;;  %v2024_v31 = vld [vmem:[%s2948_s1 + $0x128] sm:$0xff]  ;;  %v1954_v37 = vld [vmem:[%s2950_s0 + $0x178] sm:$0xf0]  ;;  %v1999_v42 = vld [vmem:[%s2948_s1 + $0x60] sm:$0xff] }
   0xc   :  { %v1529_v32 = vld [vmem:[%s2950_s0 + $0xc8] sm:$0xf]  ;;  %v1974_v39 = vld [vmem:[%s2950_s0 + $0x218] sm:$0xf0]  ;;  %v2023_v43 = vld [vmem:[%s2948_s1 + $0x120] sm:$0xff] }
   0xd   :  { %v1609_v36 = vld [vmem:[%s2950_s0 + $0x168] sm:$0xf]  ;;  %v1914_v41 = vld [vmem:[%s2950_s0 + $0x38] sm:$0xf0]  ;;  %v1530_v46 = vor.u32 %v1934_v35, %v1529_v32  ;;  %v2005_v52 = vld [vmem:[%s2948_s1 + $0x90] sm:$0xff] }
   0xe   :  { %2131 = vmatpush.bf16.msra.mxu1 %v1991_v3  ;;  %2132 = vmatpush.bf16.msra.mxu2 %v1991_v3  ;;  %v1689_v38 = vld [vmem:[%s2950_s0 + $0x208] sm:$0xf]  ;;  %v2006_v44 = vld [vmem:[%s2948_s1 + $0x98] sm:$0xff]  ;;  %v1610_v47 = vor.u32 %v1954_v37, %v1609_v36  ;;  %v2013_v53 = vld [vmem:[%s2948_s1 + $0xd0] sm:$0xff] }
   0xf   :  { %2133 = vmatpush.bf16.msra.mxu3 %v1991_v3  ;;  %853 = vmatpush.bf16.msra.mxu0 %v1991_v3  ;;  %v1449_v40 = vld [vmem:[%s2950_s0 + $0x28] sm:$0xf]  ;;  %v2014_v45 = vld [vmem:[%s2948_s1 + $0xd8] sm:$0xff]  ;;  %v1690_v48 = vor.u32 %v1974_v39, %v1689_v38  ;;  %v1997_v54 = vld [vmem:[%s2948_s1 + $0x50] sm:$0xff] }
  0x10   :  { %v1450_v49 = vor.u32 %v1914_v41, %v1449_v40  ;;  %v1998_v50 = vld [vmem:[%s2948_s1 + $0x58] sm:$0xff]  ;;  %v2021_v55 = vld [vmem:[%s2948_s1 + $0x110] sm:$0xff]  ;;  %v2004_v56 = vld [vmem:[%s2948_s1 + $0x88] sm:$0xff] }
  0x11   :  { %v2022_v51 = vld [vmem:[%s2948_s1 + $0x118] sm:$0xff]  ;;  %v2012_v57 = vld [vmem:[%s2948_s1 + $0xc8] sm:$0xff]  ;;  %v1549_v60 = vld [vmem:[%s2950_s0 + $0xf0] sm:$0xf] }
  0x12   :  { %2134 = vmatpush.bf16.msra.mxu1 %v1990_v4  ;;  %2135 = vmatpush.bf16.msra.mxu2 %v1990_v4  ;;  %v1996_v58 = vld [vmem:[%s2948_s1 + $0x48] sm:$0xff]  ;;  %v2003_v61 = vld [vmem:[%s2948_s1 + $0x80] sm:$0xff]  ;;  %v1629_v0 = vld [vmem:[%s2950_s0 + $0x190] sm:$0xf] }
  0x13   :  { %2136 = vmatpush.bf16.msra.mxu3 %v1990_v4  ;;  %854 = vmatpush.bf16.msra.mxu0 %v1990_v4  ;;  %v2020_v59 = vld [vmem:[%s2948_s1 + $0x108] sm:$0xff]  ;;  %v2011_v62 = vld [vmem:[%s2948_s1 + $0xc0] sm:$0xff]  ;;  %v1709_v2 = vld [vmem:[%s2950_s0 + $0x230] sm:$0xf] }
  0x14   :  { %v1939_v63 = vld [vmem:[%s2950_s0 + $0x100] sm:$0xf0]  ;;  %v1469_v4 = vld [vmem:[%s2950_s0 + $0x50] sm:$0xf]  ;;  %v1569_v12 = vld [vmem:[%s2950_s0 + $0x118] sm:$0xf] }
  0x15   :  { %v1959_v1 = vld [vmem:[%s2950_s0 + $0x1a0] sm:$0xf0]  ;;  %v1550_v8 = vor.u32 %v1939_v63, %v1549_v60  ;;  %v1944_v13 = vld [vmem:[%s2950_s0 + $0x128] sm:$0xf0]  ;;  %v1649_v14 = vld [vmem:[%s2950_s0 + $0x1b8] sm:$0xf] }
  0x16   :  { %2137 = vmatpush.bf16.msra.mxu1 %v1989_v5  ;;  %2138 = vmatpush.bf16.msra.mxu2 %v1989_v5  ;;  %v1979_v3 = vld [vmem:[%s2950_s0 + $0x240] sm:$0xf0]  ;;  %v1630_v9 = vor.u32 %v1959_v1, %v1629_v0  ;;  %v1964_v15 = vld [vmem:[%s2950_s0 + $0x1c8] sm:$0xf0]  ;;  %v1451_v37 = vld [vmem:[%s2950_s0 + $0x3c] sm:$0xf0] }
  0x17   :  { %2139 = vmatpush.bf16.msra.mxu3 %v1989_v5  ;;  %855 = vmatpush.bf16.msra.mxu0 %v1989_v5  ;;  %v1919_v5 = vld [vmem:[%s2950_s0 + $0x60] sm:$0xf0]  ;;  %v1710_v10 = vor.u32 %v1979_v3, %v1709_v2  ;;  %v1912_v36 = vld [vmem:[%s2950_s0 + $0x2c] sm:$0xf]  ;;  %v1457_v38 = vld [vmem:[%s2950_s0 + $0x30] sm:$0xf] }
  0x18   :  { %v1470_v11 = vor.u32 %v1919_v5, %v1469_v4  ;;  %v1915_v39 = vld [vmem:[%s2950_s0 + $0x40] sm:$0xf0]  ;;  %v1913_v40 = vld [vmem:[%s2950_s0 + $0x34] sm:$0xf]  ;;  %v1459_v41 = vld [vmem:[%s2950_s0 + $0x44] sm:$0xf0] }
  0x19   :  { %v1922_v60 = vld [vmem:[%s2950_s0 + $0x7c] sm:$0xf]  ;;  %v1925_v63 = vld [vmem:[%s2950_s0 + $0x90] sm:$0xf0]  ;;  %v1923_v0 = vld [vmem:[%s2950_s0 + $0x84] sm:$0xf] }
  0x1a   :  { %2140 = vmatpush.bf16.msra.mxu1 %v1988_v6  ;;  %2141 = vmatpush.bf16.msra.mxu2 %v1988_v6  ;;  %v1499_v1 = vld [vmem:[%s2950_s0 + $0x94] sm:$0xf0]  ;;  %v1505_v2 = vld [vmem:[%s2950_s0 + $0x88] sm:$0xf]  ;;  %v1926_v3 = vld [vmem:[%s2950_s0 + $0x98] sm:$0xf0] }
  0x1b   :  { %2142 = vmatpush.bf16.msra.mxu3 %v1988_v6  ;;  %856 = vmatpush.bf16.msra.mxu0 %v1988_v6  ;;  %v1995_v6 = vld [vmem:[%s2948_s1 + $0x40] sm:$0xff] }
  0x1e   :  { %2143 = vmatpush.bf16.msra.mxu1 %v1987_v7  ;;  %2144 = vmatpush.bf16.msra.mxu2 %v1987_v7 }
  0x1f   :  { %2145 = vmatpush.bf16.msra.mxu3 %v1987_v7  ;;  %857 = vmatpush.bf16.msra.mxu0 %v1987_v7  ;;  %v2019_v7 = vld [vmem:[%s2948_s1 + $0x100] sm:$0xff] }
  0x21   :  { %878 = vmatmul.bf16.vlgmr.msra.gmra.mxu1 %v1510_v18  ;;  %898 = vmatmul.bf16.vlgmr.msra.gmra.mxu2 %v1590_v19  ;;  %v1489_v18 = vld [vmem:[%s2950_s0 + $0x78] sm:$0xf]  ;;  %v1924_v19 = vld [vmem:[%s2950_s0 + $0x88] sm:$0xf0] }
  0x22   :  { %1028 = vmatpush.bf16.msrb.mxu2 %v2010_v16  ;;  %918 = vmatmul.bf16.vlgmr.msra.gmra.mxu3 %v1670_v20  ;;  %v1729_v16 = vld [vmem:[%s2950_s0 + $0x258] sm:$0xf]  ;;  %v1570_v20 = vor.u32 %v1944_v13, %v1569_v12  ;;  %v1930_v12 = vld [vmem:[%s2950_s0 + $0xb8] sm:$0xf0]  ;;  %v1928_v13 = vld [vmem:[%s2950_s0 + $0xac] sm:$0xf] }
  0x23   :  { %1117 = vmatpush.bf16.msrb.mxu3 %v2018_v17  ;;  %858 = vmatmul.bf16.vlgmr.msra.gmra.mxu0 %v1430_v21  ;;  %v1984_v17 = vld [vmem:[%s2950_s0 + $0x268] sm:$0xf0]  ;;  %v1650_v21 = vor.u32 %v1964_v15, %v1649_v14  ;;  %v1519_v14 = vld [vmem:[%s2950_s0 + $0xbc] sm:$0xf0]  ;;  %v1525_v15 = vld [vmem:[%s2950_s0 + $0xb0] sm:$0xf] }
  0x24   :  { %939 = vmatpush.bf16.msrb.mxu1 %v2002_v22  ;;  %1206 = vmatpush.bf16.msrb.mxu0 %v2026_v23  ;;  %v1730_v22 = vor.u32 %v1984_v17, %v1729_v16  ;;  %v1490_v23 = vor.u32 %v1924_v19, %v1489_v18  ;;  %v1931_v16 = vld [vmem:[%s2950_s0 + $0xc0] sm:$0xf0] }
  0x26   :  { %1029 = vmatpush.bf16.msrb.mxu2 %v2009_v24  ;;  %v1907_v24 = vld [vmem:[%s2950_s0 + $0x4] sm:$0xf] }
  0x27   :  { %1118 = vmatpush.bf16.msrb.mxu3 %v2017_v25  ;;  %v1431_v25 = vld [vmem:[%s2950_s0 + $0x14] sm:$0xf0] }
  0x28   :  { %940 = vmatpush.bf16.msrb.mxu1 %v2001_v26  ;;  %1207 = vmatpush.bf16.msrb.mxu0 %v2025_v27  ;;  %v1437_v26 = vld [vmem:[%s2950_s0 + $0x8] sm:$0xf]  ;;  %v1910_v27 = vld [vmem:[%s2950_s0 + $0x18] sm:$0xf0]  ;;  %v1434_v32 = vor.u32 %v1907_v24, %v1431_v25 }
  0x2a   :  { %1030 = vmatpush.bf16.msrb.mxu2 %v2008_v28  ;;  %v1908_v28 = vld [vmem:[%s2950_s0 + $0xc] sm:$0xf] }
  0x2b   :  { %1119 = vmatpush.bf16.msrb.mxu3 %v2016_v29  ;;  %v1439_v29 = vld [vmem:[%s2950_s0 + $0x1c] sm:$0xf0] }
  0x2c   :  { %941 = vmatpush.bf16.msrb.mxu1 %v2000_v30  ;;  %1208 = vmatpush.bf16.msrb.mxu0 %v2024_v31  ;;  %v1445_v30 = vld [vmem:[%s2950_s0 + $0x10] sm:$0xf]  ;;  %v1911_v31 = vld [vmem:[%s2950_s0 + $0x20] sm:$0xf0] }
  0x2d   :  { %v1446_v35 = vor.u32 %v1911_v31, %v1445_v30  ;;  %v1932_v31 = vld [vmem:[%s2950_s0 + $0xcc] sm:$0xf] }
  0x2e   :  { %1031 = vmatpush.bf16.msrb.mxu2 %v2007_v33  ;;  %v1438_v33 = vor.u32 %v1910_v27, %v1437_v26 }
  0x2f   :  { %1120 = vmatpush.bf16.msrb.mxu3 %v2015_v34  ;;  %v1442_v34 = vor.u32 %v1908_v28, %v1439_v29 }
  0x30   :  { %942 = vmatpush.bf16.msrb.mxu1 %v1999_v42  ;;  %1209 = vmatpush.bf16.msrb.mxu0 %v2023_v43  ;;  %v1465_v42 = vld [vmem:[%s2950_s0 + $0x38] sm:$0xf]  ;;  %v1916_v43 = vld [vmem:[%s2950_s0 + $0x48] sm:$0xf0] }
  0x31   :  { %883 = vmatmul.bf16.gmra.mxu1 %v1530_v46  ;;  %903 = vmatmul.bf16.gmra.mxu2 %v1610_v47  ;;  %v1462_v46 = vor.u32 %v1913_v40, %v1459_v41  ;;  %v1466_v47 = vor.u32 %v1916_v43, %v1465_v42 }
  0x32   :  { %1032 = vmatpush.bf16.msrb.mxu2 %v2006_v44  ;;  %923 = vmatmul.bf16.gmra.mxu3 %v1690_v48  ;;  %v1454_v44 = vor.u32 %v1912_v36, %v1451_v37  ;;  %v1917_v48 = vld [vmem:[%s2950_s0 + $0x54] sm:$0xf]  ;;  %v1539_v36 = vld [vmem:[%s2950_s0 + $0xe4] sm:$0xf0]  ;;  %v1545_v37 = vld [vmem:[%s2950_s0 + $0xd8] sm:$0xf] }
  0x33   :  { %1121 = vmatpush.bf16.msrb.mxu3 %v2014_v45  ;;  %863 = vmatmul.bf16.gmra.mxu0 %v1450_v49  ;;  %v1458_v45 = vor.u32 %v1915_v39, %v1457_v38  ;;  %v1471_v49 = vld [vmem:[%s2950_s0 + $0x64] sm:$0xf0]  ;;  %v1936_v38 = vld [vmem:[%s2950_s0 + $0xe8] sm:$0xf0] }
  0x34   :  { %943 = vmatpush.bf16.msrb.mxu1 %v1998_v50  ;;  %1210 = vmatpush.bf16.msrb.mxu0 %v2022_v51  ;;  %v1477_v50 = vld [vmem:[%s2950_s0 + $0x58] sm:$0xf]  ;;  %v1920_v51 = vld [vmem:[%s2950_s0 + $0x68] sm:$0xf0] }
  0x36   :  { %1033 = vmatpush.bf16.msrb.mxu2 %v2005_v52  ;;  %v1918_v52 = vld [vmem:[%s2950_s0 + $0x5c] sm:$0xf] }
  0x37   :  { %1122 = vmatpush.bf16.msrb.mxu3 %v2013_v53  ;;  %v1479_v53 = vld [vmem:[%s2950_s0 + $0x6c] sm:$0xf0] }
  0x38   :  { %944 = vmatpush.bf16.msrb.mxu1 %v1997_v54  ;;  %1211 = vmatpush.bf16.msrb.mxu0 %v2021_v55  ;;  %v1485_v54 = vld [vmem:[%s2950_s0 + $0x60] sm:$0xf]  ;;  %v1921_v55 = vld [vmem:[%s2950_s0 + $0x70] sm:$0xf0] }
  0x3a   :  { %1034 = vmatpush.bf16.msrb.mxu2 %v2004_v56  ;;  %v1474_v56 = vor.u32 %v1917_v48, %v1471_v49 }
  0x3b   :  { %1123 = vmatpush.bf16.msrb.mxu3 %v2012_v57  ;;  %v1478_v57 = vor.u32 %v1920_v51, %v1477_v50 }
  0x3c   :  { %945 = vmatpush.bf16.msrb.mxu1 %v1996_v58  ;;  %1212 = vmatpush.bf16.msrb.mxu0 %v2020_v59  ;;  %v1482_v58 = vor.u32 %v1918_v52, %v1479_v53  ;;  %v1486_v59 = vor.u32 %v1921_v55, %v1485_v54 }
  0x3e   :  { %1035 = vmatpush.bf16.msrb.mxu2 %v2003_v61  ;;  %v1491_v61 = vld [vmem:[%s2950_s0 + $0x8c] sm:$0xf0] }
  0x3f   :  { %1124 = vmatpush.bf16.msrb.mxu3 %v2011_v62  ;;  %v1497_v62 = vld [vmem:[%s2950_s0 + $0x80] sm:$0xf]  ;;  %v1494_v4 = vor.u32 %v1922_v60, %v1491_v61  ;;  %v1940_v60 = vld [vmem:[%s2950_s0 + $0x108] sm:$0xf0]  ;;  %v1938_v61 = vld [vmem:[%s2950_s0 + $0xfc] sm:$0xf] }
  0x40   :  { %946 = vmatpush.bf16.msrb.mxu1 %v1995_v6  ;;  %1213 = vmatpush.bf16.msrb.mxu0 %v2019_v7  ;;  %v1498_v5 = vor.u32 %v1925_v63, %v1497_v62  ;;  %v1502_v6 = vor.u32 %v1923_v0, %v1499_v1  ;;  %v1506_v7 = vor.u32 %v1926_v3, %v1505_v2  ;;  %v1559_v62 = vld [vmem:[%s2950_s0 + $0x10c] sm:$0xf0]  ;;  %v1565_v63 = vld [vmem:[%s2950_s0 + $0x100] sm:$0xf]  ;;  %v1941_v0 = vld [vmem:[%s2950_s0 + $0x110] sm:$0xf0] }
  0x41   :  { %888 = vmatmul.bf16.gmra.mxu1 %v1550_v8  ;;  %908 = vmatmul.bf16.gmra.mxu2 %v1630_v9  ;;  %v2482_v8 = vld [vmem:[%s2949_s2] ss:$0 sm:$0xff]  ;;  %v1927_v9 = vld [vmem:[%s2950_s0 + $0xa4] sm:$0xf] }
  0x42   :  { %928 = vmatmul.bf16.gmra.mxu3 %v1710_v10  ;;  %v1511_v10 = vld [vmem:[%s2950_s0 + $0xb4] sm:$0xf0] }
  0x43   :  { %868 = vmatmul.bf16.gmra.mxu0 %v1470_v11  ;;  %v1517_v11 = vld [vmem:[%s2950_s0 + $0xa8] sm:$0xf]  ;;  %v1514_v17 = vor.u32 %v1927_v9, %v1511_v10  ;;  %v1562_v9 = vor.u32 %v1938_v61, %v1559_v62  ;;  %v1566_v10 = vor.u32 %v1941_v0, %v1565_v63  ;;  %v1591_v61 = vld [vmem:[%s2950_s0 + $0x154] sm:$0xf0]  ;;  %v1950_v63 = vld [vmem:[%s2950_s0 + $0x158] sm:$0xf0] }
  0x44   :  { %v1518_v18 = vor.u32 %v1930_v12, %v1517_v11  ;;  %v1597_v62 = vld [vmem:[%s2950_s0 + $0x148] sm:$0xf]  ;;  %v1948_v0 = vld [vmem:[%s2950_s0 + $0x14c] sm:$0xf] }
  0x51   :  { %893 = vmatmul.bf16.gmra.mxu1 %v1570_v20  ;;  %913 = vmatmul.bf16.gmra.mxu2 %v1650_v21  ;;  %v1522_v20 = vor.u32 %v1928_v13, %v1519_v14  ;;  %v1526_v21 = vor.u32 %v1931_v16, %v1525_v15 }
  0x52   :  { %933 = vmatmul.bf16.gmra.mxu3 %v1730_v22 }
  0x53   :  { %873 = vmatmul.bf16.gmra.mxu0 %v1490_v23 }
  0x61   :  { %947 = vmatmul.bf16.vlgmr.msrb.gmra.mxu1 %v1434_v32  ;;  %1036 = vmatmul.bf16.vlgmr.msrb.gmra.mxu2 %v1438_v33  ;;  %v1531_v32 = vld [vmem:[%s2950_s0 + $0xdc] sm:$0xf0]  ;;  %v1537_v33 = vld [vmem:[%s2950_s0 + $0xd0] sm:$0xf] }
  0x62   :  { %1125 = vmatmul.bf16.vlgmr.msrb.gmra.mxu3 %v1442_v34  ;;  %v1935_v34 = vld [vmem:[%s2950_s0 + $0xe0] sm:$0xf0]  ;;  %v1534_v42 = vor.u32 %v1932_v31, %v1531_v32  ;;  %v1579_v31 = vld [vmem:[%s2950_s0 + $0x134] sm:$0xf0]  ;;  %v1585_v32 = vld [vmem:[%s2950_s0 + $0x128] sm:$0xf] }
  0x63   :  { %1214 = vmatmul.bf16.vlgmr.msrb.gmra.mxu0 %v1446_v35  ;;  %v1933_v35 = vld [vmem:[%s2950_s0 + $0xd4] sm:$0xf]  ;;  %v1538_v43 = vor.u32 %v1935_v34, %v1537_v33  ;;  %v1946_v33 = vld [vmem:[%s2950_s0 + $0x138] sm:$0xf0] }
  0x71   :  { %952 = vmatmul.bf16.gmra.mxu1 %v1454_v44  ;;  %1041 = vmatmul.bf16.gmra.mxu2 %v1458_v45 }
  0x72   :  { %1130 = vmatmul.bf16.gmra.mxu3 %v1462_v46  ;;  %v1542_v46 = vor.u32 %v1933_v35, %v1539_v36 }
  0x73   :  { %1219 = vmatmul.bf16.gmra.mxu0 %v1466_v47  ;;  %v1546_v47 = vor.u32 %v1936_v38, %v1545_v37 }
  0x81   :  { %957 = vmatmul.bf16.gmra.mxu1 %v1474_v56  ;;  %1046 = vmatmul.bf16.gmra.mxu2 %v1478_v57  ;;  %v1937_v57 = vld [vmem:[%s2950_s0 + $0xf4] sm:$0xf] }
  0x82   :  { %1135 = vmatmul.bf16.gmra.mxu3 %v1482_v58  ;;  %v1551_v58 = vld [vmem:[%s2950_s0 + $0x104] sm:$0xf0] }
  0x83   :  { %1224 = vmatmul.bf16.gmra.mxu0 %v1486_v59  ;;  %v1557_v59 = vld [vmem:[%s2950_s0 + $0xf8] sm:$0xf] }
  0x91   :  { %962 = vmatmul.bf16.gmra.mxu1 %v1494_v4  ;;  %1051 = vmatmul.bf16.gmra.mxu2 %v1498_v5  ;;  %v1554_v4 = vor.u32 %v1937_v57, %v1551_v58  ;;  %v1558_v5 = vor.u32 %v1940_v60, %v1557_v59  ;;  %v1947_v60 = vld [vmem:[%s2950_s0 + $0x144] sm:$0xf] }
  0x92   :  { %1140 = vmatmul.bf16.gmra.mxu3 %v1502_v6 }
  0x93   :  { %1229 = vmatmul.bf16.gmra.mxu0 %v1506_v7 }
  0x9e   :  { %v879_v19 = vpop.f32.mrf.mxu1 }
  0x9f   :  { %v2509_v22 = vadd.f32 %v2482_v8, %v879_v19 }
  0xa0   :  { %v2511_v23 = vpop.f32.mrf.mxu0 }
  0xa1   :  { %967 = vmatmul.bf16.gmra.mxu1 %v1514_v17  ;;  %1056 = vmatmul.bf16.gmra.mxu2 %v1518_v18 }
  0xa2   :  { %1145 = vmatmul.bf16.gmra.mxu3 %v1522_v20  ;;  %v1942_v20 = vld [vmem:[%s2950_s0 + $0x11c] sm:$0xf] }
  0xa3   :  { %1234 = vmatmul.bf16.gmra.mxu0 %v1526_v21  ;;  %v1571_v21 = vld [vmem:[%s2950_s0 + $0x12c] sm:$0xf0] }
  0xa4   :  { %v899_v24 = vpop.f32.mrf.mxu2  ;;  %v1574_v37 = vor.u32 %v1942_v20, %v1571_v21 }
  0xa5   :  { %v2514_v25 = vadd.f32 %v2482_v8, %v899_v24  ;;  %v919_v26 = vpop.f32.mrf.mxu3  ;;  %v1577_v24 = vld [vmem:[%s2950_s0 + $0x120] sm:$0xf] }
  0xa6   :  { %v2517_v27 = vadd.f32 %v2482_v8, %v919_v26  ;;  %v881_v28 = vpop.f32.mrf.mxu1  ;;  %v1945_v26 = vld [vmem:[%s2950_s0 + $0x130] sm:$0xf0] }
  0xa7   :  { %v2520_v29 = vadd.f32 %v2482_v8, %v881_v28  ;;  %v1943_v28 = vld [vmem:[%s2950_s0 + $0x124] sm:$0xf]  ;;  %v1578_v38 = vor.u32 %v1945_v26, %v1577_v24  ;;  %v860_v26 = vadd.f32 %v2482_v8, %v2511_v23  ;;  %v1611_v23 = vld [vmem:[%s2950_s0 + $0x17c] sm:$0xf0] }
  0xa8   :  { %v2522_v30 = vpop.f32.mrf.mxu0 }
  0xac   :  { %v901_v39 = vpop.f32.mrf.mxu2 }
  0xad   :  { %v2549_v40 = vadd.f32 %v2482_v8, %v901_v39  ;;  %v921_v41 = vpop.f32.mrf.mxu3 }
  0xae   :  { %v2552_v44 = vadd.f32 %v2482_v8, %v921_v41  ;;  %v884_v45 = vpop.f32.mrf.mxu1 }
  0xaf   :  { %v2555_v48 = vadd.f32 %v2482_v8, %v884_v45 }
  0xb0   :  { %v2557_v49 = vpop.f32.mrf.mxu0 }
  0xb1   :  { %972 = vmatmul.bf16.gmra.mxu1 %v1534_v42  ;;  %1061 = vmatmul.bf16.gmra.mxu2 %v1538_v43  ;;  %v1582_v42 = vor.u32 %v1943_v28, %v1579_v31  ;;  %v1586_v43 = vor.u32 %v1946_v33, %v1585_v32 }
  0xb2   :  { %1150 = vmatmul.bf16.gmra.mxu3 %v1542_v46 }
  0xb3   :  { %1239 = vmatmul.bf16.gmra.mxu0 %v1546_v47 }
  0xb4   :  { %v904_v50 = vpop.f32.mrf.mxu2 }
  0xb5   :  { %v2560_v51 = vadd.f32 %v2482_v8, %v904_v50  ;;  %v924_v52 = vpop.f32.mrf.mxu3 }
  0xb6   :  { %v2563_v53 = vadd.f32 %v2482_v8, %v924_v52  ;;  %v886_v54 = vpop.f32.mrf.mxu1 }
  0xb7   :  { %v2566_v55 = vadd.f32 %v2482_v8, %v886_v54 }
  0xb8   :  { %v2568_v56 = vpop.f32.mrf.mxu0 }
  0xbc   :  { %v906_v1 = vpop.f32.mrf.mxu2 }
  0xbd   :  { %v2595_v2 = vadd.f32 %v2482_v8, %v906_v1  ;;  %v926_v3 = vpop.f32.mrf.mxu3  ;;  %v1599_v1 = vld [vmem:[%s2950_s0 + $0x15c] sm:$0xf0] }
  0xbe   :  { %v2598_v6 = vadd.f32 %v2482_v8, %v926_v3  ;;  %v889_v7 = vpop.f32.mrf.mxu1  ;;  %v1605_v3 = vld [vmem:[%s2950_s0 + $0x150] sm:$0xf]  ;;  %v1602_v20 = vor.u32 %v1948_v0, %v1599_v1 }
  0xbf   :  { %v2601_v11 = vadd.f32 %v2482_v8, %v889_v7 }
  0xc0   :  { %v2603_v12 = vpop.f32.mrf.mxu0 }
  0xc1   :  { %977 = vmatmul.bf16.gmra.mxu1 %v1554_v4  ;;  %1066 = vmatmul.bf16.gmra.mxu2 %v1558_v5  ;;  %v1951_v4 = vld [vmem:[%s2950_s0 + $0x160] sm:$0xf0] }
  0xc2   :  { %1155 = vmatmul.bf16.gmra.mxu3 %v1562_v9  ;;  %v1606_v21 = vor.u32 %v1951_v4, %v1605_v3 }
  0xc3   :  { %1244 = vmatmul.bf16.gmra.mxu0 %v1566_v10  ;;  %v1594_v10 = vor.u32 %v1947_v60, %v1591_v61  ;;  %v1956_v60 = vld [vmem:[%s2950_s0 + $0x188] sm:$0xf0] }
  0xc4   :  { %v909_v13 = vpop.f32.mrf.mxu2 }
  0xc5   :  { %v2606_v14 = vadd.f32 %v2482_v8, %v909_v13  ;;  %v929_v15 = vpop.f32.mrf.mxu3  ;;  %v1598_v13 = vor.u32 %v1950_v63, %v1597_v62 }
  0xc6   :  { %v2609_v16 = vadd.f32 %v2482_v8, %v929_v15  ;;  %v891_v17 = vpop.f32.mrf.mxu1 }
  0xc7   :  { %v2612_v18 = vadd.f32 %v2482_v8, %v891_v17 }
  0xc8   :  { %v2614_v19 = vpop.f32.mrf.mxu0 }
  0xcc   :  { %v911_v34 = vpop.f32.mrf.mxu2 }
  0xcd   :  { %v2641_v35 = vadd.f32 %v2482_v8, %v911_v34  ;;  %v931_v36 = vpop.f32.mrf.mxu3 }
  0xce   :  { %v2644_v39 = vadd.f32 %v2482_v8, %v931_v36  ;;  %v894_v41 = vpop.f32.mrf.mxu1 }
  0xcf   :  { %v2647_v45 = vadd.f32 %v2482_v8, %v894_v41  ;;  %v1952_v41 = vld [vmem:[%s2950_s0 + $0x16c] sm:$0xf] }
  0xd0   :  { %v2649_v46 = vpop.f32.mrf.mxu0  ;;  %v1614_v1 = vor.u32 %v1952_v41, %v1611_v23  ;;  %v867_v23 = vadd.f32 %v2482_v8, %v2568_v56  ;;  %v1960_v56 = vld [vmem:[%s2950_s0 + $0x1a8] sm:$0xf0] }
  0xd1   :  { %982 = vmatmul.bf16.gmra.mxu1 %v1574_v37  ;;  %1071 = vmatmul.bf16.gmra.mxu2 %v1578_v38  ;;  %v862_v37 = vadd.f32 %v2482_v8, %v2522_v30  ;;  %v1953_v30 = vld [vmem:[%s2950_s0 + $0x174] sm:$0xf] }
  0xd2   :  { %1160 = vmatmul.bf16.gmra.mxu3 %v1582_v42  ;;  %v1617_v42 = vld [vmem:[%s2950_s0 + $0x170] sm:$0xf] }
  0xd3   :  { %1249 = vmatmul.bf16.gmra.mxu0 %v1586_v43  ;;  %v1955_v43 = vld [vmem:[%s2950_s0 + $0x180] sm:$0xf0] }
  0xd4   :  { %v914_v47 = vpop.f32.mrf.mxu2  ;;  %v1618_v3 = vor.u32 %v1955_v43, %v1617_v42  ;;  %v1631_v42 = vld [vmem:[%s2950_s0 + $0x1a4] sm:$0xf0]  ;;  %v1637_v43 = vld [vmem:[%s2950_s0 + $0x198] sm:$0xf] }
  0xd5   :  { %v2652_v50 = vadd.f32 %v2482_v8, %v914_v47  ;;  %v934_v52 = vpop.f32.mrf.mxu3 }
  0xd6   :  { %v2655_v54 = vadd.f32 %v2482_v8, %v934_v52  ;;  %v896_v57 = vpop.f32.mrf.mxu1  ;;  %v1619_v52 = vld [vmem:[%s2950_s0 + $0x184] sm:$0xf0] }
  0xd7   :  { %v2658_v58 = vadd.f32 %v2482_v8, %v896_v57  ;;  %v1625_v57 = vld [vmem:[%s2950_s0 + $0x178] sm:$0xf] }
  0xd8   :  { %v2660_v59 = vpop.f32.mrf.mxu0 }
  0xdc   :  { %v916_v5 = vpop.f32.mrf.mxu2 }
  0xdd   :  { %v2687_v7 = vadd.f32 %v2482_v8, %v916_v5  ;;  %v936_v9 = vpop.f32.mrf.mxu3  ;;  %v1622_v5 = vor.u32 %v1953_v30, %v1619_v52  ;;  %v1958_v30 = vld [vmem:[%s2950_s0 + $0x19c] sm:$0xf]  ;;  %v1639_v52 = vld [vmem:[%s2950_s0 + $0x1ac] sm:$0xf0] }
  0xde   :  { %v2690_v15 = vadd.f32 %v2482_v8, %v936_v9  ;;  %v948_v17 = vpop.f32.mrf.mxu1  ;;  %v1626_v9 = vor.u32 %v1956_v60, %v1625_v57  ;;  %v1645_v57 = vld [vmem:[%s2950_s0 + $0x1a0] sm:$0xf]  ;;  %v1961_v60 = vld [vmem:[%s2950_s0 + $0x1b0] sm:$0xf0] }
  0xdf   :  { %v949_v28 = vadd.f32 %v948_v17, %v860_v26  ;;  %v865_v17 = vadd.f32 %v2482_v8, %v2557_v49 }
  0xe0   :  { %v1215_v24 = vpop.f32.mrf.mxu0 }
  0xe1   :  { %987 = vmatmul.bf16.gmra.mxu1 %v1594_v10  ;;  %1076 = vmatmul.bf16.gmra.mxu2 %v1598_v13 }
  0xe2   :  { %1165 = vmatmul.bf16.gmra.mxu3 %v1602_v20 }
  0xe3   :  { %1254 = vmatmul.bf16.gmra.mxu0 %v1606_v21 }
  0xe4   :  { %v1037_v31 = vpop.f32.mrf.mxu2 }
  0xe5   :  { %v1038_v32 = vadd.f32 %v1037_v31, %v949_v28  ;;  %v1126_v33 = vpop.f32.mrf.mxu3 }
  0xe6   :  { %v950_v34 = vpop.f32.mrf.mxu1 }
  0xe7   :  { %v1127_v38 = vadd.f32 %v1126_v33, %v1038_v32  ;;  %v951_v47 = vadd.f32 %v950_v34, %v862_v37 }
  0xe8   :  { %v1217_v36 = vpop.f32.mrf.mxu0 }
  0xe9   :  { %v1216_v62 = vadd.f32 %v1215_v24, %v1127_v38 }
  0xeb   :  { %v1295_v20 = vmul.f32 0.1, %v1216_v62 }
  0xec   :  { %v1039_v61 = vpop.f32.mrf.mxu2 }
  0xed   :  { %v1040_v63 = vadd.f32 %v1039_v61, %v951_v47  ;;  %v1128_v0 = vpop.f32.mrf.mxu3  ;;  %v1327_v31 = vmax.f32 %v1216_v62, %v1295_v20  ;;  %v870_v20 = vadd.f32 %v2482_v8, %v2603_v12 }
  0xee   :  { %v953_v4 = vpop.f32.mrf.mxu1 }
  0xef   :  { %v1129_v10 = vadd.f32 %v1128_v0, %v1040_v63  ;;  %v954_v24 = vadd.f32 %v953_v4, %v865_v17 }
  0xf0   :  { %v1220_v13 = vpop.f32.mrf.mxu0 }
  0xf1   :  { %v1218_v21 = vadd.f32 %v1217_v36, %v1129_v10  ;;  %992 = vmatmul.bf16.gmra.mxu1 %v1614_v1  ;;  %1081 = vmatmul.bf16.gmra.mxu2 %v1618_v3  ;;  %v1957_v36 = vld [vmem:[%s2950_s0 + $0x194] sm:$0xf]  ;;  %v1638_v3 = vor.u32 %v1960_v56, %v1637_v43  ;;  %v1963_v43 = vld [vmem:[%s2950_s0 + $0x1c4] sm:$0xf] }
  0xf2   :  { %1170 = vmatmul.bf16.gmra.mxu3 %v1622_v5  ;;  %v1634_v1 = vor.u32 %v1957_v36, %v1631_v42  ;;  %v1642_v5 = vor.u32 %v1958_v30, %v1639_v52  ;;  %v1651_v36 = vld [vmem:[%s2950_s0 + $0x1cc] sm:$0xf0]  ;;  %v1657_v42 = vld [vmem:[%s2950_s0 + $0x1c0] sm:$0xf]  ;;  %v1659_v30 = vld [vmem:[%s2950_s0 + $0x1d4] sm:$0xf0] }
  0xf3   :  { %1259 = vmatmul.bf16.gmra.mxu0 %v1626_v9  ;;  %v1296_v26 = vmul.f32 0.1, %v1218_v21  ;;  %v1646_v9 = vor.u32 %v1961_v60, %v1645_v57  ;;  %v1966_v52 = vld [vmem:[%s2950_s0 + $0x1d8] sm:$0xf0] }
  0xf4   :  { %v1042_v28 = vpop.f32.mrf.mxu2 }
  0xf5   :  { %v1328_v32 = vmax.f32 %v1218_v21, %v1296_v26  ;;  %v1043_v33 = vadd.f32 %v1042_v28, %v954_v24  ;;  %v1131_v34 = vpop.f32.mrf.mxu3 }
  0xf6   :  { %v955_v37 = vpop.f32.mrf.mxu1 }
  0xf7   :  { %v2030_v38 = vpack.c.bf16 %v1328_v32, %v1327_v31  ;;  %v1132_v49 = vadd.f32 %v1131_v34, %v1043_v33  ;;  %v956_v47 = vadd.f32 %v955_v37, %v867_v23 }
  0xf8   :  { %v1222_v41 = vpop.f32.mrf.mxu0 }
  0xf9   :  { %2031 = vst [vmem:[%s2951_s3] sm:$0xff] %v2030_v38   ;;  %v1221_v62 = vadd.f32 %v1220_v13, %v1132_v49  ;;  %v872_v49 = vadd.f32 %v2482_v8, %v2614_v19  ;;  %v1965_v19 = vld [vmem:[%s2950_s0 + $0x1d0] sm:$0xf0] }
  0xfb   :  { %v1297_v21 = vmul.f32 0.1, %v1221_v62 }
  0xfc   :  { %v1044_v61 = vpop.f32.mrf.mxu2 }
  0xfd   :  { %v1045_v63 = vadd.f32 %v1044_v61, %v956_v47  ;;  %v1133_v0 = vpop.f32.mrf.mxu3  ;;  %v1329_v31 = vmax.f32 %v1221_v62, %v1297_v21  ;;  %v1665_v47 = vld [vmem:[%s2950_s0 + $0x1c8] sm:$0xf] }
  0xfe   :  { %v958_v4 = vpop.f32.mrf.mxu1 }
  0xff   :  { %v1134_v10 = vadd.f32 %v1133_v0, %v1045_v63  ;;  %v959_v13 = vadd.f32 %v958_v4, %v870_v20  ;;  %v1658_v0 = vor.u32 %v1965_v19, %v1657_v42  ;;  %v1666_v4 = vor.u32 %v1966_v52, %v1665_v47  ;;  %v1685_v42 = vld [vmem:[%s2950_s0 + $0x1f0] sm:$0xf]  ;;  %v1971_v19 = vld [vmem:[%s2950_s0 + $0x200] sm:$0xf0] }
 0x100   :  { %v1225_v17 = vpop.f32.mrf.mxu0 }
 0x101   :  { %v1223_v26 = vadd.f32 %v1222_v41, %v1134_v10  ;;  %997 = vmatmul.bf16.gmra.mxu1 %v1634_v1  ;;  %1086 = vmatmul.bf16.gmra.mxu2 %v1638_v3  ;;  %v1962_v41 = vld [vmem:[%s2950_s0 + $0x1bc] sm:$0xf]  ;;  %v1662_v3 = vor.u32 %v1963_v43, %v1659_v30  ;;  %v875_v10 = vadd.f32 %v2482_v8, %v2649_v46 }
 0x102   :  { %1175 = vmatmul.bf16.gmra.mxu3 %v1642_v5  ;;  %v1654_v63 = vor.u32 %v1962_v41, %v1651_v36  ;;  %v1679_v36 = vld [vmem:[%s2950_s0 + $0x1fc] sm:$0xf0] }
 0x103   :  { %1264 = vmatmul.bf16.gmra.mxu0 %v1646_v9  ;;  %v1298_v24 = vmul.f32 0.1, %v1223_v26 }
 0x104   :  { %v1047_v28 = vpop.f32.mrf.mxu2 }
 0x105   :  { %v1330_v32 = vmax.f32 %v1223_v26, %v1298_v24  ;;  %v1048_v33 = vadd.f32 %v1047_v28, %v959_v13  ;;  %v1136_v34 = vpop.f32.mrf.mxu3 }
 0x106   :  { %v960_v37 = vpop.f32.mrf.mxu1 }
 0x107   :  { %v2035_v38 = vpack.c.bf16 %v1330_v32, %v1329_v31  ;;  %v1137_v12 = vadd.f32 %v1136_v34, %v1048_v33  ;;  %v961_v56 = vadd.f32 %v960_v37, %v872_v49  ;;  %v1671_v49 = vld [vmem:[%s2950_s0 + $0x1f4] sm:$0xf0] }
 0x108   :  { %v1227_v23 = vpop.f32.mrf.mxu0 }
 0x109   :  { %2107 = vst [vmem:[%s2951_s3 + $0x8] sm:$0xff] %v2035_v38   ;;  %v1226_v60 = vadd.f32 %v1225_v17, %v1137_v12  ;;  %v877_v38 = vadd.f32 %v2482_v8, %v2660_v59  ;;  %v1677_v12 = vld [vmem:[%s2950_s0 + $0x1e8] sm:$0xf]  ;;  %v1970_v8 = vld [vmem:[%s2950_s0 + $0x1f8] sm:$0xf0] }
 0x10a   :  { %v1968_v59 = vld [vmem:[%s2950_s0 + $0x1ec] sm:$0xf] }
 0x10b   :  { %v1299_v20 = vmul.f32 0.1, %v1226_v60 }
 0x10c   :  { %v1049_v57 = vpop.f32.mrf.mxu2 }
 0x10d   :  { %v1050_v61 = vadd.f32 %v1049_v57, %v961_v56  ;;  %v1138_v62 = vpop.f32.mrf.mxu3  ;;  %v1331_v13 = vmax.f32 %v1226_v60, %v1299_v20  ;;  %v1678_v57 = vor.u32 %v1970_v8, %v1677_v12 }
 0x10e   :  { %v963_v1 = vpop.f32.mrf.mxu1 }
 0x10f   :  { %v1139_v5 = vadd.f32 %v1138_v62, %v1050_v61  ;;  %v964_v17 = vadd.f32 %v963_v1, %v875_v10  ;;  %v1682_v61 = vor.u32 %v1968_v59, %v1679_v36  ;;  %v1686_v62 = vor.u32 %v1971_v19, %v1685_v42 }
 0x110   :  { %v1230_v9 = vpop.f32.mrf.mxu0 }
 0x111   :  { %v1228_v21 = vadd.f32 %v1227_v23, %v1139_v5  ;;  %1002 = vmatmul.bf16.gmra.mxu1 %v1654_v63  ;;  %1091 = vmatmul.bf16.gmra.mxu2 %v1658_v0  ;;  %v1967_v23 = vld [vmem:[%s2950_s0 + $0x1e4] sm:$0xf] }
 0x112   :  { %1180 = vmatmul.bf16.gmra.mxu3 %v1662_v3  ;;  %v1674_v52 = vor.u32 %v1967_v23, %v1671_v49  ;;  %v1976_v23 = vld [vmem:[%s2950_s0 + $0x228] sm:$0xf0] }
 0x113   :  { %1269 = vmatmul.bf16.gmra.mxu0 %v1666_v4  ;;  %v1300_v26 = vmul.f32 0.1, %v1228_v21 }
 0x114   :  { %v1052_v24 = vpop.f32.mrf.mxu2 }
 0x115   :  { %v1332_v28 = vmax.f32 %v1228_v21, %v1300_v26  ;;  %v1053_v31 = vadd.f32 %v1052_v24, %v964_v17  ;;  %v1141_v32 = vpop.f32.mrf.mxu3 }
 0x116   :  { %v965_v33 = vpop.f32.mrf.mxu1 }
 0x117   :  { %v2040_v34 = vpack.c.bf16 %v1332_v28, %v1331_v13  ;;  %v1142_v46 = vadd.f32 %v1141_v32, %v1053_v31  ;;  %v966_v41 = vadd.f32 %v965_v33, %v877_v38  ;;  %v1972_v31 = vld [vmem:[%s2950_s0 + $0x20c] sm:$0xf]  ;;  %v1697_v32 = vld [vmem:[%s2950_s0 + $0x210] sm:$0xf]  ;;  %v1975_v33 = vld [vmem:[%s2950_s0 + $0x220] sm:$0xf0] }
 0x118   :  { %v1232_v37 = vpop.f32.mrf.mxu0  ;;  %v1699_v38 = vld [vmem:[%s2950_s0 + $0x224] sm:$0xf0]  ;;  %v1698_v36 = vor.u32 %v1975_v33, %v1697_v32 }
 0x119   :  { %2108 = vst [vmem:[%s2951_s3 + $0x10] sm:$0xff] %v2040_v34   ;;  %v1231_v56 = vadd.f32 %v1230_v9, %v1142_v46  ;;  %v1973_v34 = vld [vmem:[%s2950_s0 + $0x214] sm:$0xf]  ;;  %v1705_v46 = vld [vmem:[%s2950_s0 + $0x218] sm:$0xf] }
 0x11a   :  { %v1706_v19 = vor.u32 %v1976_v23, %v1705_v46 }
 0x11b   :  { %v1301_v1 = vmul.f32 0.1, %v1231_v56 }
 0x11c   :  { %v1054_v43 = vpop.f32.mrf.mxu2 }
 0x11d   :  { %v1055_v30 = vadd.f32 %v1054_v43, %v966_v41  ;;  %v1143_v47 = vpop.f32.mrf.mxu3  ;;  %v1333_v9 = vmax.f32 %v1231_v56, %v1301_v1 }
 0x11e   :  { %v968_v60 = vpop.f32.mrf.mxu1 }
 0x11f   :  { %v1144_v63 = vadd.f32 %v1143_v47, %v1055_v30  ;;  %v969_v5 = vadd.f32 %v968_v60, %v2509_v22  ;;  %v1691_v22 = vld [vmem:[%s2950_s0 + $0x21c] sm:$0xf0] }
 0x120   :  { %v1235_v0 = vpop.f32.mrf.mxu0  ;;  %v1694_v41 = vor.u32 %v1972_v31, %v1691_v22 }
 0x121   :  { %v1233_v3 = vadd.f32 %v1232_v37, %v1144_v63  ;;  %1007 = vmatmul.bf16.gmra.mxu1 %v1674_v52  ;;  %1096 = vmatmul.bf16.gmra.mxu2 %v1678_v57 }
 0x122   :  { %1185 = vmatmul.bf16.gmra.mxu3 %v1682_v61 }
 0x123   :  { %1274 = vmatmul.bf16.gmra.mxu0 %v1686_v62  ;;  %v1302_v4 = vmul.f32 0.1, %v1233_v3 }
 0x124   :  { %v1057_v10 = vpop.f32.mrf.mxu2 }
 0x125   :  { %v1334_v20 = vmax.f32 %v1233_v3, %v1302_v4  ;;  %v1058_v21 = vadd.f32 %v1057_v10, %v969_v5  ;;  %v1146_v26 = vpop.f32.mrf.mxu3  ;;  %v1977_v10 = vld [vmem:[%s2950_s0 + $0x234] sm:$0xf] }
 0x126   :  { %v970_v17 = vpop.f32.mrf.mxu1 }
 0x127   :  { %v2045_v24 = vpack.c.bf16 %v1334_v20, %v1333_v9  ;;  %v1147_v28 = vadd.f32 %v1146_v26, %v1058_v21  ;;  %v971_v37 = vadd.f32 %v970_v17, %v2520_v29  ;;  %v1702_v29 = vor.u32 %v1973_v34, %v1699_v38  ;;  %v1717_v9 = vld [vmem:[%s2950_s0 + $0x238] sm:$0xf]  ;;  %v1980_v20 = vld [vmem:[%s2950_s0 + $0x248] sm:$0xf0]  ;;  %v1978_v21 = vld [vmem:[%s2950_s0 + $0x23c] sm:$0xf] }
 0x128   :  { %v1237_v13 = vpop.f32.mrf.mxu0  ;;  %v1719_v17 = vld [vmem:[%s2950_s0 + $0x24c] sm:$0xf0]  ;;  %v1718_v34 = vor.u32 %v1980_v20, %v1717_v9 }
 0x129   :  { %2109 = vst [vmem:[%s2951_s3 + $0x18] sm:$0xff] %v2045_v24   ;;  %v1236_v12 = vadd.f32 %v1235_v0, %v1147_v28  ;;  %v1725_v24 = vld [vmem:[%s2950_s0 + $0x240] sm:$0xf] }
 0x12b   :  { %v1303_v30 = vmul.f32 0.1, %v1236_v12 }
 0x12c   :  { %v1059_v49 = vpop.f32.mrf.mxu2 }
 0x12d   :  { %v1060_v8 = vadd.f32 %v1059_v49, %v971_v37  ;;  %v1148_v59 = vpop.f32.mrf.mxu3  ;;  %v1335_v61 = vmax.f32 %v1236_v12, %v1303_v30 }
 0x12e   :  { %v973_v42 = vpop.f32.mrf.mxu1 }
 0x12f   :  { %v1149_v43 = vadd.f32 %v1148_v59, %v1060_v8  ;;  %v974_v57 = vadd.f32 %v973_v42, %v2555_v48  ;;  %v1711_v48 = vld [vmem:[%s2950_s0 + $0x244] sm:$0xf0] }
 0x130   :  { %v1240_v56 = vpop.f32.mrf.mxu0  ;;  %v1714_v33 = vor.u32 %v1977_v10, %v1711_v48 }
 0x131   :  { %v1238_v47 = vadd.f32 %v1237_v13, %v1149_v43  ;;  %1012 = vmatmul.bf16.gmra.mxu1 %v1694_v41  ;;  %1101 = vmatmul.bf16.gmra.mxu2 %v1698_v36  ;;  %v1981_v13 = vld [vmem:[%s2950_s0 + $0x250] sm:$0xf0] }
 0x132   :  { %1190 = vmatmul.bf16.gmra.mxu3 %v1702_v29  ;;  %v1726_v38 = vor.u32 %v1981_v13, %v1725_v24 }
 0x133   :  { %1279 = vmatmul.bf16.gmra.mxu0 %v1706_v19  ;;  %v1304_v52 = vmul.f32 0.1, %v1238_v47 }
 0x134   :  { %v1062_v60 = vpop.f32.mrf.mxu2 }
 0x135   :  { %v1336_v62 = vmax.f32 %v1238_v47, %v1304_v52  ;;  %v1063_v63 = vadd.f32 %v1062_v60, %v974_v57  ;;  %v1151_v0 = vpop.f32.mrf.mxu3  ;;  %v1982_v52 = vld [vmem:[%s2950_s0 + $0x25c] sm:$0xf]  ;;  %v1737_v57 = vld [vmem:[%s2950_s0 + $0x260] sm:$0xf]  ;;  %v1985_v60 = vld [vmem:[%s2950_s0 + $0x270] sm:$0xf0] }
 0x136   :  { %v975_v1 = vpop.f32.mrf.mxu1  ;;  %v1738_v9 = vor.u32 %v1985_v60, %v1737_v57 }
 0x137   :  { %v2050_v3 = vpack.c.bf16 %v1336_v62, %v1335_v61  ;;  %v1152_v5 = vadd.f32 %v1151_v0, %v1063_v63  ;;  %v976_v26 = vadd.f32 %v975_v1, %v2566_v55  ;;  %v1722_v55 = vor.u32 %v1978_v21, %v1719_v17  ;;  %v1983_v61 = vld [vmem:[%s2950_s0 + $0x264] sm:$0xf]  ;;  %v1739_v63 = vld [vmem:[%s2950_s0 + $0x274] sm:$0xf0]  ;;  %v1745_v0 = vld [vmem:[%s2950_s0 + $0x268] sm:$0xf] }
 0x138   :  { %v1242_v4 = vpop.f32.mrf.mxu0  ;;  %v1986_v1 = vld [vmem:[%s2950_s0 + $0x278] sm:$0xf0] }
 0x139   :  { %2110 = vst [vmem:[%s2951_s3 + $0x20] sm:$0xff] %v2050_v3   ;;  %v1241_v31 = vadd.f32 %v1240_v56, %v1152_v5  ;;  %v1746_v21 = vor.u32 %v1986_v1, %v1745_v0 }
 0x13b   :  { %v1305_v49 = vmul.f32 0.1, %v1241_v31 }
 0x13c   :  { %v1064_v28 = vpop.f32.mrf.mxu2 }
 0x13d   :  { %v1065_v22 = vadd.f32 %v1064_v28, %v976_v26  ;;  %v1153_v32 = vpop.f32.mrf.mxu3  ;;  %v1337_v36 = vmax.f32 %v1241_v31, %v1305_v49 }
 0x13e   :  { %v978_v37 = vpop.f32.mrf.mxu1 }
 0x13f   :  { %v1154_v46 = vadd.f32 %v1153_v32, %v1065_v22  ;;  %v979_v59 = vadd.f32 %v978_v37, %v2601_v11  ;;  %v1731_v11 = vld [vmem:[%s2950_s0 + $0x26c] sm:$0xf0] }
 0x140   :  { %v1245_v23 = vpop.f32.mrf.mxu0  ;;  %v1734_v48 = vor.u32 %v1982_v52, %v1731_v11 }
 0x141   :  { %v1243_v12 = vadd.f32 %v1242_v4, %v1154_v46  ;;  %1017 = vmatmul.bf16.gmra.mxu1 %v1714_v33  ;;  %1106 = vmatmul.bf16.gmra.mxu2 %v1718_v34 }
 0x142   :  { %1195 = vmatmul.bf16.gmra.mxu3 %v1722_v55 }
 0x143   :  { %1284 = vmatmul.bf16.gmra.mxu0 %v1726_v38  ;;  %v1306_v8 = vmul.f32 0.1, %v1243_v12 }
 0x144   :  { %v1067_v41 = vpop.f32.mrf.mxu2 }
 0x145   :  { %v1338_v42 = vmax.f32 %v1243_v12, %v1306_v8  ;;  %v1068_v29 = vadd.f32 %v1067_v41, %v979_v59  ;;  %v1156_v19 = vpop.f32.mrf.mxu3 }
 0x146   :  { %v980_v43 = vpop.f32.mrf.mxu1 }
 0x147   :  { %v2055_v56 = vpack.c.bf16 %v1338_v42, %v1337_v36  ;;  %v1157_v47 = vadd.f32 %v1156_v19, %v1068_v29  ;;  %v981_v62 = vadd.f32 %v980_v43, %v2612_v18  ;;  %v1742_v18 = vor.u32 %v1983_v61, %v1739_v63 }
 0x148   :  { %v1247_v30 = vpop.f32.mrf.mxu0 }
 0x149   :  { %2111 = vst [vmem:[%s2951_s3 + $0x28] sm:$0xff] %v2055_v56   ;;  %v1246_v4 = vadd.f32 %v1245_v23, %v1157_v47 }
 0x14b   :  { %v1307_v24 = vmul.f32 0.1, %v1246_v4 }
 0x14c   :  { %v1069_v3 = vpop.f32.mrf.mxu2 }
 0x14d   :  { %v1070_v5 = vadd.f32 %v1069_v3, %v981_v62  ;;  %v1158_v10 = vpop.f32.mrf.mxu3  ;;  %v1339_v32 = vmax.f32 %v1246_v4, %v1307_v24 }
 0x14e   :  { %v983_v20 = vpop.f32.mrf.mxu1 }
 0x14f   :  { %v1159_v26 = vadd.f32 %v1158_v10, %v1070_v5  ;;  %v984_v31 = vadd.f32 %v983_v20, %v2647_v45 }
 0x150   :  { %v1250_v17 = vpop.f32.mrf.mxu0 }
 0x151   :  { %v1248_v13 = vadd.f32 %v1247_v30, %v1159_v26  ;;  %1022 = vmatmul.bf16.gmra.mxu1 %v1734_v48  ;;  %1111 = vmatmul.bf16.gmra.mxu2 %v1738_v9 }
 0x152   :  { %1200 = vmatmul.bf16.gmra.mxu3 %v1742_v18 }
 0x153   :  { %1289 = vmatmul.bf16.gmra.mxu0 %v1746_v21  ;;  %v1308_v28 = vmul.f32 0.1, %v1248_v13 }
 0x154   :  { %v1072_v22 = vpop.f32.mrf.mxu2 }
 0x155   :  { %v1340_v33 = vmax.f32 %v1248_v13, %v1308_v28  ;;  %v1073_v34 = vadd.f32 %v1072_v22, %v984_v31  ;;  %v1161_v37 = vpop.f32.mrf.mxu3 }
 0x156   :  { %v985_v55 = vpop.f32.mrf.mxu1 }
 0x157   :  { %v2060_v38 = vpack.c.bf16 %v1340_v33, %v1339_v32  ;;  %v1162_v23 = vadd.f32 %v1161_v37, %v1073_v34  ;;  %v986_v49 = vadd.f32 %v985_v55, %v2658_v58 }
 0x158   :  { %v1252_v46 = vpop.f32.mrf.mxu0 }
 0x159   :  { %2112 = vst [vmem:[%s2951_s3 + $0x30] sm:$0xff] %v2060_v38   ;;  %v1251_v8 = vadd.f32 %v1250_v17, %v1162_v23 }
 0x15b   :  { %v1309_v29 = vmul.f32 0.1, %v1251_v8 }
 0x15c   :  { %v1074_v12 = vpop.f32.mrf.mxu2 }
 0x15d   :  { %v1075_v59 = vadd.f32 %v1074_v12, %v986_v49  ;;  %v1163_v41 = vpop.f32.mrf.mxu3  ;;  %v1341_v47 = vmax.f32 %v1251_v8, %v1309_v29 }
 0x15e   :  { %v988_v45 = vpop.f32.mrf.mxu1 }
 0x15f   :  { %v1164_v36 = vadd.f32 %v1163_v41, %v1075_v59  ;;  %v989_v56 = vadd.f32 %v988_v45, %v2514_v25 }
 0x160   :  { %v1255_v42 = vpop.f32.mrf.mxu0 }
 0x161   :  { %v1253_v19 = vadd.f32 %v1252_v46, %v1164_v36 }
 0x163   :  { %v1310_v43 = vmul.f32 0.1, %v1253_v19 }
 0x164   :  { %v1077_v30 = vpop.f32.mrf.mxu2 }
 0x165   :  { %v1342_v52 = vmax.f32 %v1253_v19, %v1310_v43  ;;  %v1078_v11 = vadd.f32 %v1077_v30, %v989_v56  ;;  %v1166_v57 = vpop.f32.mrf.mxu3 }
 0x166   :  { %v990_v60 = vpop.f32.mrf.mxu1 }
 0x167   :  { %v2065_v61 = vpack.c.bf16 %v1342_v52, %v1341_v47  ;;  %v1167_v62 = vadd.f32 %v1166_v57, %v1078_v11  ;;  %v991_v63 = vadd.f32 %v990_v60, %v2549_v40 }
 0x168   :  { %v1257_v58 = vpop.f32.mrf.mxu0 }
 0x169   :  { %2113 = vst [vmem:[%s2951_s3 + $0x38] sm:$0xff] %v2065_v61   ;;  %v1256_v1 = vadd.f32 %v1255_v42, %v1167_v62 }
 0x16b   :  { %v1311_v48 = vmul.f32 0.1, %v1256_v1 }
 0x16c   :  { %v1079_v0 = vpop.f32.mrf.mxu2 }
 0x16d   :  { %v1080_v3 = vadd.f32 %v1079_v0, %v991_v63  ;;  %v1168_v4 = vpop.f32.mrf.mxu3  ;;  %v1343_v26 = vmax.f32 %v1256_v1, %v1311_v48 }
 0x16e   :  { %v993_v25 = vpop.f32.mrf.mxu1 }
 0x16f   :  { %v1169_v5 = vadd.f32 %v1168_v4, %v1080_v3  ;;  %v994_v18 = vadd.f32 %v993_v25, %v2560_v51 }
 0x170   :  { %v1260_v10 = vpop.f32.mrf.mxu0 }
 0x171   :  { %v1258_v9 = vadd.f32 %v1257_v58, %v1169_v5 }
 0x173   :  { %v1312_v20 = vmul.f32 0.1, %v1258_v9 }
 0x174   :  { %v1082_v21 = vpop.f32.mrf.mxu2 }
 0x175   :  { %v1344_v17 = vmax.f32 %v1258_v9, %v1312_v20  ;;  %v1083_v24 = vadd.f32 %v1082_v21, %v994_v18  ;;  %v1171_v13 = vpop.f32.mrf.mxu3 }
 0x176   :  { %v995_v28 = vpop.f32.mrf.mxu1 }
 0x177   :  { %v2070_v31 = vpack.c.bf16 %v1344_v17, %v1343_v26  ;;  %v1172_v22 = vadd.f32 %v1171_v13, %v1083_v24  ;;  %v996_v32 = vadd.f32 %v995_v28, %v2595_v2 }
 0x178   :  { %v1262_v40 = vpop.f32.mrf.mxu0 }
 0x179   :  { %2114 = vst [vmem:[%s2951_s3 + $0x40] sm:$0xff] %v2070_v31   ;;  %v1261_v34 = vadd.f32 %v1260_v10, %v1172_v22 }
 0x17b   :  { %v1313_v23 = vmul.f32 0.1, %v1261_v34 }
 0x17c   :  { %v1084_v33 = vpop.f32.mrf.mxu2 }
 0x17d   :  { %v1085_v37 = vadd.f32 %v1084_v33, %v996_v32  ;;  %v1173_v55 = vpop.f32.mrf.mxu3  ;;  %v1345_v41 = vmax.f32 %v1261_v34, %v1313_v23 }
 0x17e   :  { %v998_v51 = vpop.f32.mrf.mxu1 }
 0x17f   :  { %v1174_v38 = vadd.f32 %v1173_v55, %v1085_v37  ;;  %v999_v8 = vadd.f32 %v998_v51, %v2606_v14 }
 0x180   :  { %v1265_v46 = vpop.f32.mrf.mxu0 }
 0x181   :  { %v1263_v49 = vadd.f32 %v1262_v40, %v1174_v38 }
 0x183   :  { %v1314_v12 = vmul.f32 0.1, %v1263_v49 }
 0x184   :  { %v1087_v59 = vpop.f32.mrf.mxu2 }
 0x185   :  { %v1346_v45 = vmax.f32 %v1263_v49, %v1314_v12  ;;  %v1088_v36 = vadd.f32 %v1087_v59, %v999_v8  ;;  %v1176_v42 = vpop.f32.mrf.mxu3 }
 0x186   :  { %v1000_v29 = vpop.f32.mrf.mxu1 }
 0x187   :  { %v2075_v19 = vpack.c.bf16 %v1346_v45, %v1345_v41  ;;  %v1177_v43 = vadd.f32 %v1176_v42, %v1088_v36  ;;  %v1001_v56 = vadd.f32 %v1000_v29, %v2641_v35 }
 0x188   :  { %v1267_v2 = vpop.f32.mrf.mxu0 }
 0x189   :  { %2115 = vst [vmem:[%s2951_s3 + $0x48] sm:$0xff] %v2075_v19   ;;  %v1266_v47 = vadd.f32 %v1265_v46, %v1177_v43 }
 0x18b   :  { %v1315_v61 = vmul.f32 0.1, %v1266_v47 }
 0x18c   :  { %v1089_v30 = vpop.f32.mrf.mxu2 }
 0x18d   :  { %v1090_v52 = vadd.f32 %v1089_v30, %v1001_v56  ;;  %v1178_v11 = vpop.f32.mrf.mxu3  ;;  %v1347_v1 = vmax.f32 %v1266_v47, %v1315_v61 }
 0x18e   :  { %v1003_v14 = vpop.f32.mrf.mxu1 }
 0x18f   :  { %v1179_v57 = vadd.f32 %v1178_v11, %v1090_v52  ;;  %v1004_v63 = vadd.f32 %v1003_v14, %v2652_v50 }
 0x190   :  { %v1270_v60 = vpop.f32.mrf.mxu0 }
 0x191   :  { %v1268_v58 = vadd.f32 %v1267_v2, %v1179_v57 }
 0x193   :  { %v1316_v62 = vmul.f32 0.1, %v1268_v58 }
 0x194   :  { %v1092_v0 = vpop.f32.mrf.mxu2 }
 0x195   :  { %v1348_v3 = vmax.f32 %v1268_v58, %v1316_v62  ;;  %v1093_v4 = vadd.f32 %v1092_v0, %v1004_v63  ;;  %v1181_v25 = vpop.f32.mrf.mxu3 }
 0x196   :  { %v1005_v5 = vpop.f32.mrf.mxu1 }
 0x197   :  { %v2080_v10 = vpack.c.bf16 %v1348_v3, %v1347_v1  ;;  %v1182_v48 = vadd.f32 %v1181_v25, %v1093_v4  ;;  %v1006_v9 = vadd.f32 %v1005_v5, %v2687_v7 }
 0x198   :  { %v1272_v35 = vpop.f32.mrf.mxu0 }
 0x199   :  { %2116 = vst [vmem:[%s2951_s3 + $0x50] sm:$0xff] %v2080_v10   ;;  %v1271_v18 = vadd.f32 %v1270_v60, %v1182_v48 }
 0x19b   :  { %v1317_v13 = vmul.f32 0.1, %v1271_v18 }
 0x19c   :  { %v1094_v20 = vpop.f32.mrf.mxu2 }
 0x19d   :  { %v1095_v21 = vadd.f32 %v1094_v20, %v1006_v9  ;;  %v1183_v26 = vpop.f32.mrf.mxu3  ;;  %v1349_v32 = vmax.f32 %v1271_v18, %v1317_v13 }
 0x19e   :  { %v1008_v50 = vpop.f32.mrf.mxu1 }
 0x19f   :  { %v1184_v17 = vadd.f32 %v1183_v26, %v1095_v21  ;;  %v1009_v40 = vadd.f32 %v1008_v50, %v2517_v27 }
 0x1a0   :  { %v1275_v24 = vpop.f32.mrf.mxu0 }
 0x1a1   :  { %v1273_v28 = vadd.f32 %v1272_v35, %v1184_v17 }
 0x1a3   :  { %v1318_v31 = vmul.f32 0.1, %v1273_v28 }
 0x1a4   :  { %v1097_v22 = vpop.f32.mrf.mxu2 }
 0x1a5   :  { %v1350_v33 = vmax.f32 %v1273_v28, %v1318_v31  ;;  %v1098_v34 = vadd.f32 %v1097_v22, %v1009_v40  ;;  %v1186_v37 = vpop.f32.mrf.mxu3 }
 0x1a6   :  { %v1010_v55 = vpop.f32.mrf.mxu1 }
 0x1a7   :  { %v2085_v51 = vpack.c.bf16 %v1350_v33, %v1349_v32  ;;  %v1187_v38 = vadd.f32 %v1186_v37, %v1098_v34  ;;  %v1011_v46 = vadd.f32 %v1010_v55, %v2552_v44 }
 0x1a8   :  { %v1277_v7 = vpop.f32.mrf.mxu0 }
 0x1a9   :  { %2117 = vst [vmem:[%s2951_s3 + $0x58] sm:$0xff] %v2085_v51   ;;  %v1276_v49 = vadd.f32 %v1275_v24, %v1187_v38 }
 0x1ab   :  { %v1319_v45 = vmul.f32 0.1, %v1276_v49 }
 0x1ac   :  { %v1099_v23 = vpop.f32.mrf.mxu2 }
 0x1ad   :  { %v1100_v12 = vadd.f32 %v1099_v23, %v1011_v46  ;;  %v1188_v8 = vpop.f32.mrf.mxu3  ;;  %v1351_v2 = vmax.f32 %v1276_v49, %v1319_v45 }
 0x1ae   :  { %v1013_v27 = vpop.f32.mrf.mxu1 }
 0x1af   :  { %v1189_v59 = vadd.f32 %v1188_v8, %v1100_v12  ;;  %v1014_v29 = vadd.f32 %v1013_v27, %v2563_v53 }
 0x1b0   :  { %v1280_v41 = vpop.f32.mrf.mxu0 }
 0x1b1   :  { %v1278_v36 = vadd.f32 %v1277_v7, %v1189_v59 }
 0x1b3   :  { %v1320_v42 = vmul.f32 0.1, %v1278_v36 }
 0x1b4   :  { %v1102_v19 = vpop.f32.mrf.mxu2 }
 0x1b5   :  { %v1352_v43 = vmax.f32 %v1278_v36, %v1320_v42  ;;  %v1103_v56 = vadd.f32 %v1102_v19, %v1014_v29  ;;  %v1191_v30 = vpop.f32.mrf.mxu3 }
 0x1b6   :  { %v1015_v47 = vpop.f32.mrf.mxu1 }
 0x1b7   :  { %v2090_v52 = vpack.c.bf16 %v1352_v43, %v1351_v2  ;;  %v1192_v11 = vadd.f32 %v1191_v30, %v1103_v56  ;;  %v1016_v14 = vadd.f32 %v1015_v47, %v2598_v6 }
 0x1b8   :  { %v1282_v44 = vpop.f32.mrf.mxu0 }
 0x1b9   :  { %2118 = vst [vmem:[%s2951_s3 + $0x60] sm:$0xff] %v2090_v52   ;;  %v1281_v60 = vadd.f32 %v1280_v41, %v1192_v11 }
 0x1bb   :  { %v1321_v63 = vmul.f32 0.1, %v1281_v60 }
 0x1bc   :  { %v1104_v57 = vpop.f32.mrf.mxu2 }
 0x1bd   :  { %v1105_v61 = vadd.f32 %v1104_v57, %v1016_v14  ;;  %v1193_v58 = vpop.f32.mrf.mxu3  ;;  %v1353_v5 = vmax.f32 %v1281_v60, %v1321_v63 }
 0x1be   :  { %v1018_v53 = vpop.f32.mrf.mxu1 }
 0x1bf   :  { %v1194_v62 = vadd.f32 %v1193_v58, %v1105_v61  ;;  %v1019_v4 = vadd.f32 %v1018_v53, %v2609_v16 }
 0x1c0   :  { %v1285_v1 = vpop.f32.mrf.mxu0 }
 0x1c1   :  { %v1283_v0 = vadd.f32 %v1282_v44, %v1194_v62 }
 0x1c3   :  { %v1322_v3 = vmul.f32 0.1, %v1283_v0 }
 0x1c4   :  { %v1107_v25 = vpop.f32.mrf.mxu2 }
 0x1c5   :  { %v1354_v10 = vmax.f32 %v1283_v0, %v1322_v3  ;;  %v1108_v35 = vadd.f32 %v1107_v25, %v1019_v4  ;;  %v1196_v48 = vpop.f32.mrf.mxu3 }
 0x1c6   :  { %v1020_v9 = vpop.f32.mrf.mxu1 }
 0x1c7   :  { %v2095_v20 = vpack.c.bf16 %v1354_v10, %v1353_v5  ;;  %v1197_v6 = vadd.f32 %v1196_v48, %v1108_v35  ;;  %v1021_v18 = vadd.f32 %v1020_v9, %v2644_v39 }
 0x1c8   :  { %v1287_v21 = vpop.f32.mrf.mxu0 }
 0x1c9   :  { %2119 = vst [vmem:[%s2951_s3 + $0x68] sm:$0xff] %v2095_v20   ;;  %v1286_v50 = vadd.f32 %v1285_v1, %v1197_v6 }
 0x1cb   :  { %v1323_v28 = vmul.f32 0.1, %v1286_v50 }
 0x1cc   :  { %v1109_v26 = vpop.f32.mrf.mxu2 }
 0x1cd   :  { %v1110_v17 = vadd.f32 %v1109_v26, %v1021_v18  ;;  %v1198_v24 = vpop.f32.mrf.mxu3  ;;  %v1355_v33 = vmax.f32 %v1286_v50, %v1323_v28 }
 0x1ce   :  { %v1023_v16 = vpop.f32.mrf.mxu1 }
 0x1cf   :  { %v1199_v13 = vadd.f32 %v1198_v24, %v1110_v17  ;;  %v1024_v22 = vadd.f32 %v1023_v16, %v2655_v54 }
 0x1d0   :  { %v1290_v51 = vpop.f32.mrf.mxu0 }
 0x1d1   :  { %v1288_v31 = vadd.f32 %v1287_v21, %v1199_v13 }
 0x1d3   :  { %v1324_v40 = vmul.f32 0.1, %v1288_v31 }
 0x1d4   :  { %v1112_v32 = vpop.f32.mrf.mxu2 }
 0x1d5   :  { %v1356_v34 = vmax.f32 %v1288_v31, %v1324_v40  ;;  %v1113_v37 = vadd.f32 %v1112_v32, %v1024_v22  ;;  %v1201_v55 = vpop.f32.mrf.mxu3 }
 0x1d6   :  { %v1025_v39 = vpop.f32.mrf.mxu1 }
 0x1d7   :  { %v2100_v7 = vpack.c.bf16 %v1356_v34, %v1355_v33  ;;  %v1202_v38 = vadd.f32 %v1201_v55, %v1113_v37  ;;  %v1026_v46 = vadd.f32 %v1025_v39, %v2690_v15 }
 0x1d8   :  { %v1292_v27 = vpop.f32.mrf.mxu0 }
 0x1d9   :  { %2120 = vst [vmem:[%s2951_s3 + $0x70] sm:$0xff] %v2100_v7   ;;  %v1291_v49 = vadd.f32 %v1290_v51, %v1202_v38 }
 0x1db   :  { %v1325_v59 = vmul.f32 0.1, %v1291_v49 }
 0x1dc   :  { %v1114_v23 = vpop.f32.mrf.mxu2 }
 0x1dd   :  { %v1115_v12 = vadd.f32 %v1114_v23, %v1026_v46  ;;  %v1203_v8 = vpop.f32.mrf.mxu3  ;;  %v1357_v36 = vmax.f32 %v1291_v49, %v1325_v59 }
 0x1df   :  { %v1204_v54 = vadd.f32 %v1203_v8, %v1115_v12 }
 0x1e1   :  { %v1293_v41 = vadd.f32 %v1292_v27, %v1204_v54 }
 0x1e3   :  { %v1326_v45 = vmul.f32 0.1, %v1293_v41 }
 0x1e5   :  { %v1358_v42 = vmax.f32 %v1293_v41, %v1326_v45 }
 0x1e7   :  { %v2105_v29 = vpack.c.bf16 %v1358_v42, %v1357_v36 }
 0x1e9   :  { %2121 = vst [vmem:[%s2951_s3 + $0x78] sm:$0xff] %v2105_v29  }

// kernel: _mrd_forward.13
= control target key start
LH: loop header
LB: loop body
LE: loop exit
PB: predicated region body
PF: predicated region fallthrough
CT: control target
= control target key end

     0   :  { %vm1295_vm0 = vcmask 7168   ;;  %s2838_s1 = inlined_call_operand.vmem [shape: bf16[640,128], index: 1, kind: input, shape index: {}]   ;;  %s2839_s2 = inlined_call_operand.vmem [shape: f32[1,128], index: 2, kind: input, shape index: {}]   ;;  %s2840_s0 = inlined_call_operand.vmem [shape: bf16[256,640], index: 0, kind: input, shape index: {}]   ;;  %s2841_s3 = inlined_call_operand.vmem [shape: f32[256,1], index: 3, kind: output, shape index: {}]  }
   0x1   :  { %v1899_v0 = vld [vmem:[%s2838_s1 + $0x38] sm:$0xff]  ;;  %v1898_v1 = vld [vmem:[%s2838_s1 + $0x30] sm:$0xff]  ;;  %v1897_v2 = vld [vmem:[%s2838_s1 + $0x28] sm:$0xff] }
   0x2   :  { %1932 = vmatpush.bf16.msra.mxu1 %v1899_v0  ;;  %1933 = vmatpush.bf16.msra.mxu2 %v1899_v0  ;;  %v1896_v3 = vld [vmem:[%s2838_s1 + $0x20] sm:$0xff]  ;;  %v1895_v4 = vld [vmem:[%s2838_s1 + $0x18] sm:$0xff]  ;;  %v1894_v5 = vld [vmem:[%s2838_s1 + $0x10] sm:$0xff] }
   0x3   :  { %1934 = vmatpush.bf16.msra.mxu3 %v1899_v0  ;;  %850 = vmatpush.bf16.msra.mxu0 %v1899_v0  ;;  %v1893_v6 = vld [vmem:[%s2838_s1 + $0x8] sm:$0xff]  ;;  %v1892_v7 = vld [vmem:[%s2838_s1] sm:$0xff]  ;;  %v1834_v9 = vld [vmem:[%s2840_s0 + $0xb0] sm:$0xf0] }
   0x4   :  { %v1414_v8 = vld [vmem:[%s2840_s0 + $0xa0] sm:$0xf]  ;;  %v1854_v11 = vld [vmem:[%s2840_s0 + $0x150] sm:$0xf0]  ;;  %v1915_v16 = vld [vmem:[%s2838_s1 + $0xb8] sm:$0xff] }
   0x5   :  { %v1494_v10 = vld [vmem:[%s2840_s0 + $0x140] sm:$0xf]  ;;  %v1874_v13 = vld [vmem:[%s2840_s0 + $0x1f0] sm:$0xf0]  ;;  %v1923_v17 = vld [vmem:[%s2838_s1 + $0xf8] sm:$0xff]  ;;  %v1415_v18 = vor.u32 %v1834_v9, %v1414_v8 }
   0x6   :  { %1935 = vmatpush.bf16.msra.mxu1 %v1898_v1  ;;  %1936 = vmatpush.bf16.msra.mxu2 %v1898_v1  ;;  %v1574_v12 = vld [vmem:[%s2840_s0 + $0x1e0] sm:$0xf]  ;;  %v1814_v15 = vld [vmem:[%s2840_s0 + $0x10] sm:$0xf0]  ;;  %v1495_v19 = vor.u32 %v1854_v11, %v1494_v10  ;;  %v1907_v22 = vld [vmem:[%s2838_s1 + $0x78] sm:$0xff] }
   0x7   :  { %1937 = vmatpush.bf16.msra.mxu3 %v1898_v1  ;;  %851 = vmatpush.bf16.msra.mxu0 %v1898_v1  ;;  %v1334_v14 = vld [vmem:[%s2840_s0] sm:$0xf]  ;;  %v1575_v20 = vor.u32 %v1874_v13, %v1574_v12  ;;  %v1931_v23 = vld [vmem:[%s2838_s1 + $0x138] sm:$0xff]  ;;  %v1914_v24 = vld [vmem:[%s2838_s1 + $0xb0] sm:$0xff] }
   0x8   :  { %v1335_v21 = vor.u32 %v1814_v15, %v1334_v14  ;;  %v1922_v25 = vld [vmem:[%s2838_s1 + $0xf0] sm:$0xff]  ;;  %v1913_v28 = vld [vmem:[%s2838_s1 + $0xa8] sm:$0xff]  ;;  %v1912_v33 = vld [vmem:[%s2838_s1 + $0xa0] sm:$0xff] }
   0x9   :  { %v1906_v26 = vld [vmem:[%s2838_s1 + $0x70] sm:$0xff]  ;;  %v1921_v29 = vld [vmem:[%s2838_s1 + $0xe8] sm:$0xff]  ;;  %v1920_v34 = vld [vmem:[%s2838_s1 + $0xe0] sm:$0xff] }
   0xa   :  { %1938 = vmatpush.bf16.msra.mxu1 %v1897_v2  ;;  %1939 = vmatpush.bf16.msra.mxu2 %v1897_v2  ;;  %v1930_v27 = vld [vmem:[%s2838_s1 + $0x130] sm:$0xff]  ;;  %v1905_v30 = vld [vmem:[%s2838_s1 + $0x68] sm:$0xff]  ;;  %v1839_v35 = vld [vmem:[%s2840_s0 + $0xd8] sm:$0xf0] }
   0xb   :  { %1940 = vmatpush.bf16.msra.mxu3 %v1897_v2  ;;  %852 = vmatpush.bf16.msra.mxu0 %v1897_v2  ;;  %v1929_v31 = vld [vmem:[%s2838_s1 + $0x128] sm:$0xff]  ;;  %v1859_v37 = vld [vmem:[%s2840_s0 + $0x178] sm:$0xf0]  ;;  %v1904_v42 = vld [vmem:[%s2838_s1 + $0x60] sm:$0xff] }
   0xc   :  { %v1434_v32 = vld [vmem:[%s2840_s0 + $0xc8] sm:$0xf]  ;;  %v1879_v39 = vld [vmem:[%s2840_s0 + $0x218] sm:$0xf0]  ;;  %v1928_v43 = vld [vmem:[%s2838_s1 + $0x120] sm:$0xff] }
   0xd   :  { %v1514_v36 = vld [vmem:[%s2840_s0 + $0x168] sm:$0xf]  ;;  %v1819_v41 = vld [vmem:[%s2840_s0 + $0x38] sm:$0xf0]  ;;  %v1435_v46 = vor.u32 %v1839_v35, %v1434_v32  ;;  %v1910_v52 = vld [vmem:[%s2838_s1 + $0x90] sm:$0xff] }
   0xe   :  { %1941 = vmatpush.bf16.msra.mxu1 %v1896_v3  ;;  %1942 = vmatpush.bf16.msra.mxu2 %v1896_v3  ;;  %v1594_v38 = vld [vmem:[%s2840_s0 + $0x208] sm:$0xf]  ;;  %v1911_v44 = vld [vmem:[%s2838_s1 + $0x98] sm:$0xff]  ;;  %v1515_v47 = vor.u32 %v1859_v37, %v1514_v36  ;;  %v1918_v53 = vld [vmem:[%s2838_s1 + $0xd0] sm:$0xff] }
   0xf   :  { %1943 = vmatpush.bf16.msra.mxu3 %v1896_v3  ;;  %853 = vmatpush.bf16.msra.mxu0 %v1896_v3  ;;  %v1354_v40 = vld [vmem:[%s2840_s0 + $0x28] sm:$0xf]  ;;  %v1919_v45 = vld [vmem:[%s2838_s1 + $0xd8] sm:$0xff]  ;;  %v1595_v48 = vor.u32 %v1879_v39, %v1594_v38  ;;  %v1902_v54 = vld [vmem:[%s2838_s1 + $0x50] sm:$0xff] }
  0x10   :  { %v1355_v49 = vor.u32 %v1819_v41, %v1354_v40  ;;  %v1903_v50 = vld [vmem:[%s2838_s1 + $0x58] sm:$0xff]  ;;  %v1926_v55 = vld [vmem:[%s2838_s1 + $0x110] sm:$0xff]  ;;  %v1909_v56 = vld [vmem:[%s2838_s1 + $0x88] sm:$0xff] }
  0x11   :  { %v1927_v51 = vld [vmem:[%s2838_s1 + $0x118] sm:$0xff]  ;;  %v1917_v57 = vld [vmem:[%s2838_s1 + $0xc8] sm:$0xff]  ;;  %v1454_v60 = vld [vmem:[%s2840_s0 + $0xf0] sm:$0xf] }
  0x12   :  { %1944 = vmatpush.bf16.msra.mxu1 %v1895_v4  ;;  %1945 = vmatpush.bf16.msra.mxu2 %v1895_v4  ;;  %v1901_v58 = vld [vmem:[%s2838_s1 + $0x48] sm:$0xff]  ;;  %v1908_v61 = vld [vmem:[%s2838_s1 + $0x80] sm:$0xff]  ;;  %v1534_v0 = vld [vmem:[%s2840_s0 + $0x190] sm:$0xf] }
  0x13   :  { %1946 = vmatpush.bf16.msra.mxu3 %v1895_v4  ;;  %854 = vmatpush.bf16.msra.mxu0 %v1895_v4  ;;  %v1925_v59 = vld [vmem:[%s2838_s1 + $0x108] sm:$0xff]  ;;  %v1916_v62 = vld [vmem:[%s2838_s1 + $0xc0] sm:$0xff]  ;;  %v1614_v2 = vld [vmem:[%s2840_s0 + $0x230] sm:$0xf] }
  0x14   :  { %v1844_v63 = vld [vmem:[%s2840_s0 + $0x100] sm:$0xf0]  ;;  %v1374_v4 = vld [vmem:[%s2840_s0 + $0x50] sm:$0xf]  ;;  %v1474_v12 = vld [vmem:[%s2840_s0 + $0x118] sm:$0xf] }
  0x15   :  { %v1864_v1 = vld [vmem:[%s2840_s0 + $0x1a0] sm:$0xf0]  ;;  %v1455_v8 = vor.u32 %v1844_v63, %v1454_v60  ;;  %v1849_v13 = vld [vmem:[%s2840_s0 + $0x128] sm:$0xf0]  ;;  %v1554_v14 = vld [vmem:[%s2840_s0 + $0x1b8] sm:$0xf] }
  0x16   :  { %1947 = vmatpush.bf16.msra.mxu1 %v1894_v5  ;;  %1948 = vmatpush.bf16.msra.mxu2 %v1894_v5  ;;  %v1884_v3 = vld [vmem:[%s2840_s0 + $0x240] sm:$0xf0]  ;;  %v1535_v9 = vor.u32 %v1864_v1, %v1534_v0  ;;  %v1869_v15 = vld [vmem:[%s2840_s0 + $0x1c8] sm:$0xf0]  ;;  %v1356_v37 = vld [vmem:[%s2840_s0 + $0x3c] sm:$0xf0] }
  0x17   :  { %1949 = vmatpush.bf16.msra.mxu3 %v1894_v5  ;;  %855 = vmatpush.bf16.msra.mxu0 %v1894_v5  ;;  %v1824_v5 = vld [vmem:[%s2840_s0 + $0x60] sm:$0xf0]  ;;  %v1615_v10 = vor.u32 %v1884_v3, %v1614_v2  ;;  %v1817_v36 = vld [vmem:[%s2840_s0 + $0x2c] sm:$0xf]  ;;  %v1362_v38 = vld [vmem:[%s2840_s0 + $0x30] sm:$0xf] }
  0x18   :  { %v1375_v11 = vor.u32 %v1824_v5, %v1374_v4  ;;  %v1820_v39 = vld [vmem:[%s2840_s0 + $0x40] sm:$0xf0]  ;;  %v1818_v40 = vld [vmem:[%s2840_s0 + $0x34] sm:$0xf]  ;;  %v1364_v41 = vld [vmem:[%s2840_s0 + $0x44] sm:$0xf0] }
  0x19   :  { %v1827_v60 = vld [vmem:[%s2840_s0 + $0x7c] sm:$0xf]  ;;  %v1830_v63 = vld [vmem:[%s2840_s0 + $0x90] sm:$0xf0]  ;;  %v1828_v0 = vld [vmem:[%s2840_s0 + $0x84] sm:$0xf] }
  0x1a   :  { %1950 = vmatpush.bf16.msra.mxu1 %v1893_v6  ;;  %1951 = vmatpush.bf16.msra.mxu2 %v1893_v6  ;;  %v1404_v1 = vld [vmem:[%s2840_s0 + $0x94] sm:$0xf0]  ;;  %v1410_v2 = vld [vmem:[%s2840_s0 + $0x88] sm:$0xf]  ;;  %v1831_v3 = vld [vmem:[%s2840_s0 + $0x98] sm:$0xf0] }
  0x1b   :  { %1952 = vmatpush.bf16.msra.mxu3 %v1893_v6  ;;  %856 = vmatpush.bf16.msra.mxu0 %v1893_v6  ;;  %v1900_v6 = vld [vmem:[%s2838_s1 + $0x40] sm:$0xff] }
  0x1e   :  { %1953 = vmatpush.bf16.msra.mxu1 %v1892_v7  ;;  %1954 = vmatpush.bf16.msra.mxu2 %v1892_v7 }
  0x1f   :  { %1955 = vmatpush.bf16.msra.mxu3 %v1892_v7  ;;  %857 = vmatpush.bf16.msra.mxu0 %v1892_v7  ;;  %v1924_v7 = vld [vmem:[%s2838_s1 + $0x100] sm:$0xff] }
  0x21   :  { %878 = vmatmul.bf16.vlgmr.msra.gmra.mxu1 %v1415_v18  ;;  %898 = vmatmul.bf16.vlgmr.msra.gmra.mxu2 %v1495_v19  ;;  %v1394_v18 = vld [vmem:[%s2840_s0 + $0x78] sm:$0xf]  ;;  %v1829_v19 = vld [vmem:[%s2840_s0 + $0x88] sm:$0xf0] }
  0x22   :  { %1028 = vmatpush.bf16.msrb.mxu2 %v1915_v16  ;;  %918 = vmatmul.bf16.vlgmr.msra.gmra.mxu3 %v1575_v20  ;;  %v1634_v16 = vld [vmem:[%s2840_s0 + $0x258] sm:$0xf]  ;;  %v1475_v20 = vor.u32 %v1849_v13, %v1474_v12  ;;  %v1835_v12 = vld [vmem:[%s2840_s0 + $0xb8] sm:$0xf0]  ;;  %v1833_v13 = vld [vmem:[%s2840_s0 + $0xac] sm:$0xf] }
  0x23   :  { %1117 = vmatpush.bf16.msrb.mxu3 %v1923_v17  ;;  %858 = vmatmul.bf16.vlgmr.msra.gmra.mxu0 %v1335_v21  ;;  %v1889_v17 = vld [vmem:[%s2840_s0 + $0x268] sm:$0xf0]  ;;  %v1555_v21 = vor.u32 %v1869_v15, %v1554_v14  ;;  %v1424_v14 = vld [vmem:[%s2840_s0 + $0xbc] sm:$0xf0]  ;;  %v1430_v15 = vld [vmem:[%s2840_s0 + $0xb0] sm:$0xf] }
  0x24   :  { %939 = vmatpush.bf16.msrb.mxu1 %v1907_v22  ;;  %1206 = vmatpush.bf16.msrb.mxu0 %v1931_v23  ;;  %v1635_v22 = vor.u32 %v1889_v17, %v1634_v16  ;;  %v1395_v23 = vor.u32 %v1829_v19, %v1394_v18  ;;  %v1836_v16 = vld [vmem:[%s2840_s0 + $0xc0] sm:$0xf0] }
  0x26   :  { %1029 = vmatpush.bf16.msrb.mxu2 %v1914_v24  ;;  %v1812_v24 = vld [vmem:[%s2840_s0 + $0x4] sm:$0xf] }
  0x27   :  { %1118 = vmatpush.bf16.msrb.mxu3 %v1922_v25  ;;  %v1336_v25 = vld [vmem:[%s2840_s0 + $0x14] sm:$0xf0] }
  0x28   :  { %940 = vmatpush.bf16.msrb.mxu1 %v1906_v26  ;;  %1207 = vmatpush.bf16.msrb.mxu0 %v1930_v27  ;;  %v1342_v26 = vld [vmem:[%s2840_s0 + $0x8] sm:$0xf]  ;;  %v1815_v27 = vld [vmem:[%s2840_s0 + $0x18] sm:$0xf0]  ;;  %v1339_v32 = vor.u32 %v1812_v24, %v1336_v25 }
  0x2a   :  { %1030 = vmatpush.bf16.msrb.mxu2 %v1913_v28  ;;  %v1813_v28 = vld [vmem:[%s2840_s0 + $0xc] sm:$0xf] }
  0x2b   :  { %1119 = vmatpush.bf16.msrb.mxu3 %v1921_v29  ;;  %v1344_v29 = vld [vmem:[%s2840_s0 + $0x1c] sm:$0xf0] }
  0x2c   :  { %941 = vmatpush.bf16.msrb.mxu1 %v1905_v30  ;;  %1208 = vmatpush.bf16.msrb.mxu0 %v1929_v31  ;;  %v1350_v30 = vld [vmem:[%s2840_s0 + $0x10] sm:$0xf]  ;;  %v1816_v31 = vld [vmem:[%s2840_s0 + $0x20] sm:$0xf0] }
  0x2d   :  { %v1351_v35 = vor.u32 %v1816_v31, %v1350_v30  ;;  %v1837_v31 = vld [vmem:[%s2840_s0 + $0xcc] sm:$0xf] }
  0x2e   :  { %1031 = vmatpush.bf16.msrb.mxu2 %v1912_v33  ;;  %v1343_v33 = vor.u32 %v1815_v27, %v1342_v26 }
  0x2f   :  { %1120 = vmatpush.bf16.msrb.mxu3 %v1920_v34  ;;  %v1347_v34 = vor.u32 %v1813_v28, %v1344_v29 }
  0x30   :  { %942 = vmatpush.bf16.msrb.mxu1 %v1904_v42  ;;  %1209 = vmatpush.bf16.msrb.mxu0 %v1928_v43  ;;  %v1370_v42 = vld [vmem:[%s2840_s0 + $0x38] sm:$0xf]  ;;  %v1821_v43 = vld [vmem:[%s2840_s0 + $0x48] sm:$0xf0] }
  0x31   :  { %883 = vmatmul.bf16.gmra.mxu1 %v1435_v46  ;;  %903 = vmatmul.bf16.gmra.mxu2 %v1515_v47  ;;  %v1367_v46 = vor.u32 %v1818_v40, %v1364_v41  ;;  %v1371_v47 = vor.u32 %v1821_v43, %v1370_v42 }
  0x32   :  { %1032 = vmatpush.bf16.msrb.mxu2 %v1911_v44  ;;  %923 = vmatmul.bf16.gmra.mxu3 %v1595_v48  ;;  %v1359_v44 = vor.u32 %v1817_v36, %v1356_v37  ;;  %v1822_v48 = vld [vmem:[%s2840_s0 + $0x54] sm:$0xf]  ;;  %v1444_v36 = vld [vmem:[%s2840_s0 + $0xe4] sm:$0xf0]  ;;  %v1450_v37 = vld [vmem:[%s2840_s0 + $0xd8] sm:$0xf] }
  0x33   :  { %1121 = vmatpush.bf16.msrb.mxu3 %v1919_v45  ;;  %863 = vmatmul.bf16.gmra.mxu0 %v1355_v49  ;;  %v1363_v45 = vor.u32 %v1820_v39, %v1362_v38  ;;  %v1376_v49 = vld [vmem:[%s2840_s0 + $0x64] sm:$0xf0]  ;;  %v1841_v38 = vld [vmem:[%s2840_s0 + $0xe8] sm:$0xf0] }
  0x34   :  { %943 = vmatpush.bf16.msrb.mxu1 %v1903_v50  ;;  %1210 = vmatpush.bf16.msrb.mxu0 %v1927_v51  ;;  %v1382_v50 = vld [vmem:[%s2840_s0 + $0x58] sm:$0xf]  ;;  %v1825_v51 = vld [vmem:[%s2840_s0 + $0x68] sm:$0xf0] }
  0x36   :  { %1033 = vmatpush.bf16.msrb.mxu2 %v1910_v52  ;;  %v1823_v52 = vld [vmem:[%s2840_s0 + $0x5c] sm:$0xf] }
  0x37   :  { %1122 = vmatpush.bf16.msrb.mxu3 %v1918_v53  ;;  %v1384_v53 = vld [vmem:[%s2840_s0 + $0x6c] sm:$0xf0] }
  0x38   :  { %944 = vmatpush.bf16.msrb.mxu1 %v1902_v54  ;;  %1211 = vmatpush.bf16.msrb.mxu0 %v1926_v55  ;;  %v1390_v54 = vld [vmem:[%s2840_s0 + $0x60] sm:$0xf]  ;;  %v1826_v55 = vld [vmem:[%s2840_s0 + $0x70] sm:$0xf0] }
  0x3a   :  { %1034 = vmatpush.bf16.msrb.mxu2 %v1909_v56  ;;  %v1379_v56 = vor.u32 %v1822_v48, %v1376_v49 }
  0x3b   :  { %1123 = vmatpush.bf16.msrb.mxu3 %v1917_v57  ;;  %v1383_v57 = vor.u32 %v1825_v51, %v1382_v50 }
  0x3c   :  { %945 = vmatpush.bf16.msrb.mxu1 %v1901_v58  ;;  %1212 = vmatpush.bf16.msrb.mxu0 %v1925_v59  ;;  %v1387_v58 = vor.u32 %v1823_v52, %v1384_v53  ;;  %v1391_v59 = vor.u32 %v1826_v55, %v1390_v54 }
  0x3e   :  { %1035 = vmatpush.bf16.msrb.mxu2 %v1908_v61  ;;  %v1396_v61 = vld [vmem:[%s2840_s0 + $0x8c] sm:$0xf0] }
  0x3f   :  { %1124 = vmatpush.bf16.msrb.mxu3 %v1916_v62  ;;  %v1402_v62 = vld [vmem:[%s2840_s0 + $0x80] sm:$0xf]  ;;  %v1399_v4 = vor.u32 %v1827_v60, %v1396_v61  ;;  %v1845_v60 = vld [vmem:[%s2840_s0 + $0x108] sm:$0xf0]  ;;  %v1843_v61 = vld [vmem:[%s2840_s0 + $0xfc] sm:$0xf] }
  0x40   :  { %946 = vmatpush.bf16.msrb.mxu1 %v1900_v6  ;;  %1213 = vmatpush.bf16.msrb.mxu0 %v1924_v7  ;;  %v1403_v5 = vor.u32 %v1830_v63, %v1402_v62  ;;  %v1407_v6 = vor.u32 %v1828_v0, %v1404_v1  ;;  %v1411_v7 = vor.u32 %v1831_v3, %v1410_v2  ;;  %v1464_v62 = vld [vmem:[%s2840_s0 + $0x10c] sm:$0xf0]  ;;  %v1470_v63 = vld [vmem:[%s2840_s0 + $0x100] sm:$0xf]  ;;  %v1846_v0 = vld [vmem:[%s2840_s0 + $0x110] sm:$0xf0] }
  0x41   :  { %888 = vmatmul.bf16.gmra.mxu1 %v1455_v8  ;;  %908 = vmatmul.bf16.gmra.mxu2 %v1535_v9  ;;  %v2292_v8 = vld [vmem:[%s2839_s2] ss:$0 sm:$0xff]  ;;  %v1832_v9 = vld [vmem:[%s2840_s0 + $0xa4] sm:$0xf] }
  0x42   :  { %928 = vmatmul.bf16.gmra.mxu3 %v1615_v10  ;;  %v1416_v10 = vld [vmem:[%s2840_s0 + $0xb4] sm:$0xf0] }
  0x43   :  { %868 = vmatmul.bf16.gmra.mxu0 %v1375_v11  ;;  %v1422_v11 = vld [vmem:[%s2840_s0 + $0xa8] sm:$0xf]  ;;  %v1419_v17 = vor.u32 %v1832_v9, %v1416_v10  ;;  %v1467_v9 = vor.u32 %v1843_v61, %v1464_v62  ;;  %v1471_v10 = vor.u32 %v1846_v0, %v1470_v63  ;;  %v1496_v61 = vld [vmem:[%s2840_s0 + $0x154] sm:$0xf0]  ;;  %v1855_v63 = vld [vmem:[%s2840_s0 + $0x158] sm:$0xf0] }
  0x44   :  { %v1423_v18 = vor.u32 %v1835_v12, %v1422_v11  ;;  %v1502_v62 = vld [vmem:[%s2840_s0 + $0x148] sm:$0xf]  ;;  %v1853_v0 = vld [vmem:[%s2840_s0 + $0x14c] sm:$0xf] }
  0x51   :  { %893 = vmatmul.bf16.gmra.mxu1 %v1475_v20  ;;  %913 = vmatmul.bf16.gmra.mxu2 %v1555_v21  ;;  %v1427_v20 = vor.u32 %v1833_v13, %v1424_v14  ;;  %v1431_v21 = vor.u32 %v1836_v16, %v1430_v15 }
  0x52   :  { %933 = vmatmul.bf16.gmra.mxu3 %v1635_v22 }
  0x53   :  { %873 = vmatmul.bf16.gmra.mxu0 %v1395_v23 }
  0x61   :  { %947 = vmatmul.bf16.vlgmr.msrb.gmra.mxu1 %v1339_v32  ;;  %1036 = vmatmul.bf16.vlgmr.msrb.gmra.mxu2 %v1343_v33  ;;  %v1436_v32 = vld [vmem:[%s2840_s0 + $0xdc] sm:$0xf0]  ;;  %v1442_v33 = vld [vmem:[%s2840_s0 + $0xd0] sm:$0xf] }
  0x62   :  { %1125 = vmatmul.bf16.vlgmr.msrb.gmra.mxu3 %v1347_v34  ;;  %v1840_v34 = vld [vmem:[%s2840_s0 + $0xe0] sm:$0xf0]  ;;  %v1439_v42 = vor.u32 %v1837_v31, %v1436_v32  ;;  %v1484_v31 = vld [vmem:[%s2840_s0 + $0x134] sm:$0xf0]  ;;  %v1490_v32 = vld [vmem:[%s2840_s0 + $0x128] sm:$0xf] }
  0x63   :  { %1214 = vmatmul.bf16.vlgmr.msrb.gmra.mxu0 %v1351_v35  ;;  %v1838_v35 = vld [vmem:[%s2840_s0 + $0xd4] sm:$0xf]  ;;  %v1443_v43 = vor.u32 %v1840_v34, %v1442_v33  ;;  %v1851_v33 = vld [vmem:[%s2840_s0 + $0x138] sm:$0xf0] }
  0x71   :  { %952 = vmatmul.bf16.gmra.mxu1 %v1359_v44  ;;  %1041 = vmatmul.bf16.gmra.mxu2 %v1363_v45 }
  0x72   :  { %1130 = vmatmul.bf16.gmra.mxu3 %v1367_v46  ;;  %v1447_v46 = vor.u32 %v1838_v35, %v1444_v36 }
  0x73   :  { %1219 = vmatmul.bf16.gmra.mxu0 %v1371_v47  ;;  %v1451_v47 = vor.u32 %v1841_v38, %v1450_v37 }
  0x81   :  { %957 = vmatmul.bf16.gmra.mxu1 %v1379_v56  ;;  %1046 = vmatmul.bf16.gmra.mxu2 %v1383_v57  ;;  %v1842_v57 = vld [vmem:[%s2840_s0 + $0xf4] sm:$0xf] }
  0x82   :  { %1135 = vmatmul.bf16.gmra.mxu3 %v1387_v58  ;;  %v1456_v58 = vld [vmem:[%s2840_s0 + $0x104] sm:$0xf0] }
  0x83   :  { %1224 = vmatmul.bf16.gmra.mxu0 %v1391_v59  ;;  %v1462_v59 = vld [vmem:[%s2840_s0 + $0xf8] sm:$0xf] }
  0x91   :  { %962 = vmatmul.bf16.gmra.mxu1 %v1399_v4  ;;  %1051 = vmatmul.bf16.gmra.mxu2 %v1403_v5  ;;  %v1459_v4 = vor.u32 %v1842_v57, %v1456_v58  ;;  %v1463_v5 = vor.u32 %v1845_v60, %v1462_v59  ;;  %v1852_v60 = vld [vmem:[%s2840_s0 + $0x144] sm:$0xf] }
  0x92   :  { %1140 = vmatmul.bf16.gmra.mxu3 %v1407_v6 }
  0x93   :  { %1229 = vmatmul.bf16.gmra.mxu0 %v1411_v7 }
  0x9e   :  { %v879_v19 = vpop.f32.mrf.mxu1 }
  0x9f   :  { %v2319_v22 = vadd.f32 %v2292_v8, %v879_v19 }
  0xa0   :  { %v2321_v23 = vpop.f32.mrf.mxu0 }
  0xa1   :  { %967 = vmatmul.bf16.gmra.mxu1 %v1419_v17  ;;  %1056 = vmatmul.bf16.gmra.mxu2 %v1423_v18 }
  0xa2   :  { %1145 = vmatmul.bf16.gmra.mxu3 %v1427_v20  ;;  %v1847_v20 = vld [vmem:[%s2840_s0 + $0x11c] sm:$0xf] }
  0xa3   :  { %1234 = vmatmul.bf16.gmra.mxu0 %v1431_v21  ;;  %v1476_v21 = vld [vmem:[%s2840_s0 + $0x12c] sm:$0xf0] }
  0xa4   :  { %v899_v24 = vpop.f32.mrf.mxu2  ;;  %v1479_v37 = vor.u32 %v1847_v20, %v1476_v21 }
  0xa5   :  { %v2324_v25 = vadd.f32 %v2292_v8, %v899_v24  ;;  %v919_v26 = vpop.f32.mrf.mxu3  ;;  %v1482_v24 = vld [vmem:[%s2840_s0 + $0x120] sm:$0xf] }
  0xa6   :  { %v2327_v27 = vadd.f32 %v2292_v8, %v919_v26  ;;  %v881_v28 = vpop.f32.mrf.mxu1  ;;  %v1850_v26 = vld [vmem:[%s2840_s0 + $0x130] sm:$0xf0] }
  0xa7   :  { %v2330_v29 = vadd.f32 %v2292_v8, %v881_v28  ;;  %v1848_v28 = vld [vmem:[%s2840_s0 + $0x124] sm:$0xf]  ;;  %v1483_v38 = vor.u32 %v1850_v26, %v1482_v24  ;;  %v860_v26 = vadd.f32 %v2292_v8, %v2321_v23  ;;  %v1857_v23 = vld [vmem:[%s2840_s0 + $0x16c] sm:$0xf] }
  0xa8   :  { %v2332_v30 = vpop.f32.mrf.mxu0 }
  0xac   :  { %v901_v39 = vpop.f32.mrf.mxu2 }
  0xad   :  { %v2359_v40 = vadd.f32 %v2292_v8, %v901_v39  ;;  %v921_v41 = vpop.f32.mrf.mxu3 }
  0xae   :  { %v2362_v44 = vadd.f32 %v2292_v8, %v921_v41  ;;  %v884_v45 = vpop.f32.mrf.mxu1 }
  0xaf   :  { %v2365_v48 = vadd.f32 %v2292_v8, %v884_v45 }
  0xb0   :  { %v2367_v49 = vpop.f32.mrf.mxu0 }
  0xb1   :  { %972 = vmatmul.bf16.gmra.mxu1 %v1439_v42  ;;  %1061 = vmatmul.bf16.gmra.mxu2 %v1443_v43  ;;  %v1487_v42 = vor.u32 %v1848_v28, %v1484_v31  ;;  %v1491_v43 = vor.u32 %v1851_v33, %v1490_v32 }
  0xb2   :  { %1150 = vmatmul.bf16.gmra.mxu3 %v1447_v46 }
  0xb3   :  { %1239 = vmatmul.bf16.gmra.mxu0 %v1451_v47 }
  0xb4   :  { %v904_v50 = vpop.f32.mrf.mxu2 }
  0xb5   :  { %v2370_v51 = vadd.f32 %v2292_v8, %v904_v50  ;;  %v924_v52 = vpop.f32.mrf.mxu3 }
  0xb6   :  { %v2373_v53 = vadd.f32 %v2292_v8, %v924_v52  ;;  %v886_v54 = vpop.f32.mrf.mxu1 }
  0xb7   :  { %v2376_v55 = vadd.f32 %v2292_v8, %v886_v54 }
  0xb8   :  { %v2378_v56 = vpop.f32.mrf.mxu0 }
  0xbc   :  { %v906_v1 = vpop.f32.mrf.mxu2 }
  0xbd   :  { %v2405_v2 = vadd.f32 %v2292_v8, %v906_v1  ;;  %v926_v3 = vpop.f32.mrf.mxu3  ;;  %v1504_v1 = vld [vmem:[%s2840_s0 + $0x15c] sm:$0xf0] }
  0xbe   :  { %v2408_v6 = vadd.f32 %v2292_v8, %v926_v3  ;;  %v889_v7 = vpop.f32.mrf.mxu1  ;;  %v1510_v3 = vld [vmem:[%s2840_s0 + $0x150] sm:$0xf]  ;;  %v1507_v20 = vor.u32 %v1853_v0, %v1504_v1 }
  0xbf   :  { %v2411_v11 = vadd.f32 %v2292_v8, %v889_v7 }
  0xc0   :  { %v2413_v12 = vpop.f32.mrf.mxu0 }
  0xc1   :  { %977 = vmatmul.bf16.gmra.mxu1 %v1459_v4  ;;  %1066 = vmatmul.bf16.gmra.mxu2 %v1463_v5  ;;  %v1856_v4 = vld [vmem:[%s2840_s0 + $0x160] sm:$0xf0] }
  0xc2   :  { %1155 = vmatmul.bf16.gmra.mxu3 %v1467_v9  ;;  %v1511_v21 = vor.u32 %v1856_v4, %v1510_v3 }
  0xc3   :  { %1244 = vmatmul.bf16.gmra.mxu0 %v1471_v10  ;;  %v1499_v10 = vor.u32 %v1852_v60, %v1496_v61  ;;  %v1530_v60 = vld [vmem:[%s2840_s0 + $0x178] sm:$0xf]  ;;  %v1861_v61 = vld [vmem:[%s2840_s0 + $0x188] sm:$0xf0] }
  0xc4   :  { %v909_v13 = vpop.f32.mrf.mxu2 }
  0xc5   :  { %v2416_v14 = vadd.f32 %v2292_v8, %v909_v13  ;;  %v929_v15 = vpop.f32.mrf.mxu3  ;;  %v1503_v13 = vor.u32 %v1855_v63, %v1502_v62 }
  0xc6   :  { %v2419_v16 = vadd.f32 %v2292_v8, %v929_v15  ;;  %v891_v17 = vpop.f32.mrf.mxu1 }
  0xc7   :  { %v2422_v18 = vadd.f32 %v2292_v8, %v891_v17 }
  0xc8   :  { %v2424_v19 = vpop.f32.mrf.mxu0 }
  0xcc   :  { %v911_v34 = vpop.f32.mrf.mxu2 }
  0xcd   :  { %v2451_v35 = vadd.f32 %v2292_v8, %v911_v34  ;;  %v931_v36 = vpop.f32.mrf.mxu3 }
  0xce   :  { %v2454_v39 = vadd.f32 %v2292_v8, %v931_v36  ;;  %v894_v41 = vpop.f32.mrf.mxu1 }
  0xcf   :  { %v2457_v45 = vadd.f32 %v2292_v8, %v894_v41 }
  0xd0   :  { %v2459_v46 = vpop.f32.mrf.mxu0 }
  0xd1   :  { %982 = vmatmul.bf16.gmra.mxu1 %v1479_v37  ;;  %1071 = vmatmul.bf16.gmra.mxu2 %v1483_v38  ;;  %v862_v38 = vadd.f32 %v2292_v8, %v2332_v30  ;;  %v1858_v30 = vld [vmem:[%s2840_s0 + $0x174] sm:$0xf] }
  0xd2   :  { %1160 = vmatmul.bf16.gmra.mxu3 %v1487_v42  ;;  %v1516_v42 = vld [vmem:[%s2840_s0 + $0x17c] sm:$0xf0] }
  0xd3   :  { %1249 = vmatmul.bf16.gmra.mxu0 %v1491_v43  ;;  %v1522_v43 = vld [vmem:[%s2840_s0 + $0x170] sm:$0xf]  ;;  %v1519_v1 = vor.u32 %v1857_v23, %v1516_v42 }
  0xd4   :  { %v914_v47 = vpop.f32.mrf.mxu2  ;;  %v1544_v23 = vld [vmem:[%s2840_s0 + $0x1ac] sm:$0xf0] }
  0xd5   :  { %v2462_v50 = vadd.f32 %v2292_v8, %v914_v47  ;;  %v934_v52 = vpop.f32.mrf.mxu3  ;;  %v1860_v47 = vld [vmem:[%s2840_s0 + $0x180] sm:$0xf0] }
  0xd6   :  { %v2465_v54 = vadd.f32 %v2292_v8, %v934_v52  ;;  %v896_v57 = vpop.f32.mrf.mxu1  ;;  %v1524_v52 = vld [vmem:[%s2840_s0 + $0x184] sm:$0xf0]  ;;  %v1523_v3 = vor.u32 %v1860_v47, %v1522_v43  ;;  %v1550_v43 = vld [vmem:[%s2840_s0 + $0x1a0] sm:$0xf]  ;;  %v1866_v47 = vld [vmem:[%s2840_s0 + $0x1b0] sm:$0xf0] }
  0xd7   :  { %v2468_v58 = vadd.f32 %v2292_v8, %v896_v57 }
  0xd8   :  { %v2470_v59 = vpop.f32.mrf.mxu0 }
  0xdc   :  { %v916_v5 = vpop.f32.mrf.mxu2 }
  0xdd   :  { %v2497_v7 = vadd.f32 %v2292_v8, %v916_v5  ;;  %v936_v9 = vpop.f32.mrf.mxu3  ;;  %v1527_v5 = vor.u32 %v1858_v30, %v1524_v52 }
  0xde   :  { %v2500_v15 = vadd.f32 %v2292_v8, %v936_v9  ;;  %v948_v17 = vpop.f32.mrf.mxu1  ;;  %v1531_v9 = vor.u32 %v1861_v61, %v1530_v60 }
  0xdf   :  { %v949_v28 = vadd.f32 %v948_v17, %v860_v26  ;;  %v865_v17 = vadd.f32 %v2292_v8, %v2367_v49  ;;  %v867_v49 = vadd.f32 %v2292_v8, %v2378_v56  ;;  %v1863_v56 = vld [vmem:[%s2840_s0 + $0x19c] sm:$0xf] }
  0xe0   :  { %v1215_v24 = vpop.f32.mrf.mxu0 }
  0xe1   :  { %987 = vmatmul.bf16.gmra.mxu1 %v1499_v10  ;;  %1076 = vmatmul.bf16.gmra.mxu2 %v1503_v13 }
  0xe2   :  { %1165 = vmatmul.bf16.gmra.mxu3 %v1507_v20 }
  0xe3   :  { %1254 = vmatmul.bf16.gmra.mxu0 %v1511_v21 }
  0xe4   :  { %v1037_v31 = vpop.f32.mrf.mxu2 }
  0xe5   :  { %v1038_v32 = vadd.f32 %v1037_v31, %v949_v28  ;;  %v1126_v33 = vpop.f32.mrf.mxu3 }
  0xe6   :  { %v950_v34 = vpop.f32.mrf.mxu1 }
  0xe7   :  { %v1127_v36 = vadd.f32 %v1126_v33, %v1038_v32  ;;  %v951_v57 = vadd.f32 %v950_v34, %v862_v38  ;;  %v1542_v38 = vld [vmem:[%s2840_s0 + $0x198] sm:$0xf] }
  0xe8   :  { %v1217_v37 = vpop.f32.mrf.mxu0 }
  0xe9   :  { %v1216_v41 = vadd.f32 %v1215_v24, %v1127_v36  ;;  %v1862_v36 = vld [vmem:[%s2840_s0 + $0x194] sm:$0xf] }
  0xeb   :  { %1296 = vst.msk [vmem:[%s2841_s3] sm:$0xff] %vm1295_vm0, %v1216_v41  ;;  %v1865_v41 = vld [vmem:[%s2840_s0 + $0x1a8] sm:$0xf0] }
  0xec   :  { %v1039_v62 = vpop.f32.mrf.mxu2  ;;  %v1543_v61 = vor.u32 %v1865_v41, %v1542_v38 }
  0xed   :  { %v1040_v63 = vadd.f32 %v1039_v62, %v951_v57  ;;  %v1128_v0 = vpop.f32.mrf.mxu3 }
  0xee   :  { %v953_v4 = vpop.f32.mrf.mxu1 }
  0xef   :  { %v1129_v10 = vadd.f32 %v1128_v0, %v1040_v63  ;;  %v954_v21 = vadd.f32 %v953_v4, %v865_v17  ;;  %v1547_v63 = vor.u32 %v1863_v56, %v1544_v23  ;;  %v1551_v0 = vor.u32 %v1866_v47, %v1550_v43 }
  0xf0   :  { %v1220_v13 = vpop.f32.mrf.mxu0  ;;  %v870_v4 = vadd.f32 %v2292_v8, %v2413_v12  ;;  %v872_v12 = vadd.f32 %v2292_v8, %v2424_v19  ;;  %v1868_v19 = vld [vmem:[%s2840_s0 + $0x1c4] sm:$0xf] }
  0xf1   :  { %v1218_v20 = vadd.f32 %v1217_v37, %v1129_v10  ;;  %992 = vmatmul.bf16.gmra.mxu1 %v1519_v1  ;;  %1081 = vmatmul.bf16.gmra.mxu2 %v1523_v3  ;;  %v1536_v37 = vld [vmem:[%s2840_s0 + $0x1a4] sm:$0xf0] }
  0xf2   :  { %1170 = vmatmul.bf16.gmra.mxu3 %v1527_v5  ;;  %v1539_v60 = vor.u32 %v1862_v36, %v1536_v37  ;;  %v1570_v36 = vld [vmem:[%s2840_s0 + $0x1c8] sm:$0xf]  ;;  %v1871_v37 = vld [vmem:[%s2840_s0 + $0x1d8] sm:$0xf0] }
  0xf3   :  { %1259 = vmatmul.bf16.gmra.mxu0 %v1531_v9  ;;  %1297 = vst.msk [vmem:[%s2841_s3 + $0x8] sm:$0xff] %vm1295_vm0, %v1218_v20 }
  0xf4   :  { %v1042_v24 = vpop.f32.mrf.mxu2 }
  0xf5   :  { %v1043_v26 = vadd.f32 %v1042_v24, %v954_v21  ;;  %v1131_v28 = vpop.f32.mrf.mxu3 }
  0xf6   :  { %v955_v31 = vpop.f32.mrf.mxu1 }
  0xf7   :  { %v1132_v32 = vadd.f32 %v1131_v28, %v1043_v26  ;;  %v956_v42 = vadd.f32 %v955_v31, %v867_v49  ;;  %v1867_v28 = vld [vmem:[%s2840_s0 + $0x1bc] sm:$0xf]  ;;  %v1556_v31 = vld [vmem:[%s2840_s0 + $0x1cc] sm:$0xf0]  ;;  %v1564_v49 = vld [vmem:[%s2840_s0 + $0x1d4] sm:$0xf0] }
  0xf8   :  { %v1222_v33 = vpop.f32.mrf.mxu0  ;;  %v1559_v23 = vor.u32 %v1867_v28, %v1556_v31  ;;  %v1567_v47 = vor.u32 %v1868_v19, %v1564_v49 }
  0xf9   :  { %v1221_v34 = vadd.f32 %v1220_v13, %v1132_v32  ;;  %v1562_v32 = vld [vmem:[%s2840_s0 + $0x1c0] sm:$0xf] }
  0xfb   :  { %1298 = vst.msk [vmem:[%s2841_s3 + $0x10] sm:$0xff] %vm1295_vm0, %v1221_v34 }
  0xfc   :  { %v1044_v30 = vpop.f32.mrf.mxu2 }
  0xfd   :  { %v1045_v52 = vadd.f32 %v1044_v30, %v956_v42  ;;  %v1133_v57 = vpop.f32.mrf.mxu3  ;;  %v1571_v30 = vor.u32 %v1871_v37, %v1570_v36 }
  0xfe   :  { %v958_v62 = vpop.f32.mrf.mxu1 }
  0xff   :  { %v1134_v1 = vadd.f32 %v1133_v57, %v1045_v52  ;;  %v959_v9 = vadd.f32 %v958_v62, %v870_v4 }
 0x100   :  { %v1225_v3 = vpop.f32.mrf.mxu0 }
 0x101   :  { %v1223_v5 = vadd.f32 %v1222_v33, %v1134_v1  ;;  %997 = vmatmul.bf16.gmra.mxu1 %v1539_v60  ;;  %1086 = vmatmul.bf16.gmra.mxu2 %v1543_v61  ;;  %v1870_v33 = vld [vmem:[%s2840_s0 + $0x1d0] sm:$0xf0]  ;;  %v875_v60 = vadd.f32 %v2292_v8, %v2459_v46  ;;  %v877_v46 = vadd.f32 %v2292_v8, %v2470_v59  ;;  %v1873_v8 = vld [vmem:[%s2840_s0 + $0x1ec] sm:$0xf]  ;;  %v1584_v59 = vld [vmem:[%s2840_s0 + $0x1fc] sm:$0xf0] }
 0x102   :  { %1175 = vmatmul.bf16.gmra.mxu3 %v1547_v63  ;;  %v1563_v42 = vor.u32 %v1870_v33, %v1562_v32  ;;  %v1587_v49 = vor.u32 %v1873_v8, %v1584_v59 }
 0x103   :  { %1264 = vmatmul.bf16.gmra.mxu0 %v1551_v0  ;;  %1299 = vst.msk [vmem:[%s2841_s3 + $0x18] sm:$0xff] %vm1295_vm0, %v1223_v5 }
 0x104   :  { %v1047_v10 = vpop.f32.mrf.mxu2 }
 0x105   :  { %v1048_v13 = vadd.f32 %v1047_v10, %v959_v9  ;;  %v1136_v17 = vpop.f32.mrf.mxu3  ;;  %v1872_v10 = vld [vmem:[%s2840_s0 + $0x1e4] sm:$0xf] }
 0x106   :  { %v960_v20 = vpop.f32.mrf.mxu1 }
 0x107   :  { %v1137_v21 = vadd.f32 %v1136_v17, %v1048_v13  ;;  %v961_v34 = vadd.f32 %v960_v20, %v872_v12  ;;  %v1576_v13 = vld [vmem:[%s2840_s0 + $0x1f4] sm:$0xf0]  ;;  %v1582_v17 = vld [vmem:[%s2840_s0 + $0x1e8] sm:$0xf]  ;;  %v1875_v20 = vld [vmem:[%s2840_s0 + $0x1f8] sm:$0xf0] }
 0x108   :  { %v1227_v24 = vpop.f32.mrf.mxu0  ;;  %v1876_v12 = vld [vmem:[%s2840_s0 + $0x200] sm:$0xf0]  ;;  %v1579_v32 = vor.u32 %v1872_v10, %v1576_v13  ;;  %v1583_v33 = vor.u32 %v1875_v20, %v1582_v17 }
 0x109   :  { %v1226_v26 = vadd.f32 %v1225_v3, %v1137_v21 }
 0x10b   :  { %1300 = vst.msk [vmem:[%s2841_s3 + $0x20] sm:$0xff] %vm1295_vm0, %v1226_v26 }
 0x10c   :  { %v1049_v38 = vpop.f32.mrf.mxu2 }
 0x10d   :  { %v1050_v41 = vadd.f32 %v1049_v38, %v961_v34  ;;  %v1138_v56 = vpop.f32.mrf.mxu3 }
 0x10e   :  { %v963_v43 = vpop.f32.mrf.mxu1 }
 0x10f   :  { %v1139_v52 = vadd.f32 %v1138_v56, %v1050_v41  ;;  %v964_v62 = vadd.f32 %v963_v43, %v875_v60  ;;  %v1596_v60 = vld [vmem:[%s2840_s0 + $0x21c] sm:$0xf0] }
 0x110   :  { %v1230_v57 = vpop.f32.mrf.mxu0 }
 0x111   :  { %v1228_v61 = vadd.f32 %v1227_v24, %v1139_v52  ;;  %1002 = vmatmul.bf16.gmra.mxu1 %v1559_v23  ;;  %1091 = vmatmul.bf16.gmra.mxu2 %v1563_v42  ;;  %v1590_v24 = vld [vmem:[%s2840_s0 + $0x1f0] sm:$0xf] }
 0x112   :  { %1180 = vmatmul.bf16.gmra.mxu3 %v1567_v47  ;;  %v1591_v34 = vor.u32 %v1876_v12, %v1590_v24 }
 0x113   :  { %1269 = vmatmul.bf16.gmra.mxu0 %v1571_v30  ;;  %1301 = vst.msk [vmem:[%s2841_s3 + $0x28] sm:$0xff] %vm1295_vm0, %v1228_v61  ;;  %v1602_v61 = vld [vmem:[%s2840_s0 + $0x210] sm:$0xf] }
 0x114   :  { %v1052_v63 = vpop.f32.mrf.mxu2 }
 0x115   :  { %v1053_v0 = vadd.f32 %v1052_v63, %v964_v62  ;;  %v1141_v1 = vpop.f32.mrf.mxu3  ;;  %v1878_v62 = vld [vmem:[%s2840_s0 + $0x214] sm:$0xf]  ;;  %v1604_v63 = vld [vmem:[%s2840_s0 + $0x224] sm:$0xf0] }
 0x116   :  { %v965_v3 = vpop.f32.mrf.mxu1  ;;  %v1607_v17 = vor.u32 %v1878_v62, %v1604_v63 }
 0x117   :  { %v1142_v4 = vadd.f32 %v1141_v1, %v1053_v0  ;;  %v966_v21 = vadd.f32 %v965_v3, %v877_v46  ;;  %v1610_v1 = vld [vmem:[%s2840_s0 + $0x218] sm:$0xf]  ;;  %v1881_v3 = vld [vmem:[%s2840_s0 + $0x228] sm:$0xf0] }
 0x118   :  { %v1232_v5 = vpop.f32.mrf.mxu0  ;;  %v1611_v20 = vor.u32 %v1881_v3, %v1610_v1 }
 0x119   :  { %v1231_v9 = vadd.f32 %v1230_v57, %v1142_v4  ;;  %v1877_v57 = vld [vmem:[%s2840_s0 + $0x20c] sm:$0xf] }
 0x11b   :  { %1302 = vst.msk [vmem:[%s2841_s3 + $0x30] sm:$0xff] %vm1295_vm0, %v1231_v9  ;;  %v1599_v9 = vor.u32 %v1877_v57, %v1596_v60 }
 0x11c   :  { %v1054_v26 = vpop.f32.mrf.mxu2 }
 0x11d   :  { %v1055_v28 = vadd.f32 %v1054_v26, %v966_v21  ;;  %v1143_v31 = vpop.f32.mrf.mxu3 }
 0x11e   :  { %v968_v19 = vpop.f32.mrf.mxu1 }
 0x11f   :  { %v1144_v36 = vadd.f32 %v1143_v31, %v1055_v28  ;;  %v969_v41 = vadd.f32 %v968_v19, %v2319_v22  ;;  %v1880_v22 = vld [vmem:[%s2840_s0 + $0x220] sm:$0xf0]  ;;  %v1882_v19 = vld [vmem:[%s2840_s0 + $0x234] sm:$0xf] }
 0x120   :  { %v1235_v37 = vpop.f32.mrf.mxu0  ;;  %v1603_v10 = vor.u32 %v1880_v22, %v1602_v61 }
 0x121   :  { %v1233_v38 = vadd.f32 %v1232_v5, %v1144_v36  ;;  %1007 = vmatmul.bf16.gmra.mxu1 %v1579_v32  ;;  %1096 = vmatmul.bf16.gmra.mxu2 %v1583_v33  ;;  %v1883_v36 = vld [vmem:[%s2840_s0 + $0x23c] sm:$0xf] }
 0x122   :  { %1185 = vmatmul.bf16.gmra.mxu3 %v1587_v49  ;;  %v1616_v49 = vld [vmem:[%s2840_s0 + $0x244] sm:$0xf0] }
 0x123   :  { %1274 = vmatmul.bf16.gmra.mxu0 %v1591_v34  ;;  %1303 = vst.msk [vmem:[%s2841_s3 + $0x38] sm:$0xff] %vm1295_vm0, %v1233_v38  ;;  %v1622_v34 = vld [vmem:[%s2840_s0 + $0x238] sm:$0xf] }
 0x124   :  { %v1057_v56 = vpop.f32.mrf.mxu2 }
 0x125   :  { %v1058_v23 = vadd.f32 %v1057_v56, %v969_v41  ;;  %v1146_v42 = vpop.f32.mrf.mxu3  ;;  %v1630_v41 = vld [vmem:[%s2840_s0 + $0x240] sm:$0xf]  ;;  %v1886_v56 = vld [vmem:[%s2840_s0 + $0x250] sm:$0xf0] }
 0x126   :  { %v970_v43 = vpop.f32.mrf.mxu1  ;;  %v1631_v60 = vor.u32 %v1886_v56, %v1630_v41 }
 0x127   :  { %v1147_v47 = vadd.f32 %v1146_v42, %v1058_v23  ;;  %v971_v0 = vadd.f32 %v970_v43, %v2330_v29 }
 0x128   :  { %v1237_v30 = vpop.f32.mrf.mxu0 }
 0x129   :  { %v1236_v52 = vadd.f32 %v1235_v37, %v1147_v47  ;;  %v1624_v37 = vld [vmem:[%s2840_s0 + $0x24c] sm:$0xf0]  ;;  %v1619_v47 = vor.u32 %v1882_v19, %v1616_v49 }
 0x12a   :  { %v1627_v57 = vor.u32 %v1883_v36, %v1624_v37 }
 0x12b   :  { %1304 = vst.msk [vmem:[%s2841_s3 + $0x40] sm:$0xff] %vm1295_vm0, %v1236_v52 }
 0x12c   :  { %v1059_v4 = vpop.f32.mrf.mxu2 }
 0x12d   :  { %v1060_v5 = vadd.f32 %v1059_v4, %v971_v0  ;;  %v1148_v46 = vpop.f32.mrf.mxu3 }
 0x12e   :  { %v973_v13 = vpop.f32.mrf.mxu1 }
 0x12f   :  { %v1149_v8 = vadd.f32 %v1148_v46, %v1060_v5  ;;  %v974_v29 = vadd.f32 %v973_v13, %v2365_v48  ;;  %v1885_v48 = vld [vmem:[%s2840_s0 + $0x248] sm:$0xf0]  ;;  %v1642_v13 = vld [vmem:[%s2840_s0 + $0x260] sm:$0xf] }
 0x130   :  { %v1240_v59 = vpop.f32.mrf.mxu0 }
 0x131   :  { %v1238_v21 = vadd.f32 %v1237_v30, %v1149_v8  ;;  %1012 = vmatmul.bf16.gmra.mxu1 %v1599_v9  ;;  %1101 = vmatmul.bf16.gmra.mxu2 %v1603_v10  ;;  %v1623_v30 = vor.u32 %v1885_v48, %v1622_v34  ;;  %v1887_v9 = vld [vmem:[%s2840_s0 + $0x25c] sm:$0xf]  ;;  %v1636_v10 = vld [vmem:[%s2840_s0 + $0x26c] sm:$0xf0] }
 0x132   :  { %1190 = vmatmul.bf16.gmra.mxu3 %v1607_v17  ;;  %v1888_v17 = vld [vmem:[%s2840_s0 + $0x264] sm:$0xf] }
 0x133   :  { %1279 = vmatmul.bf16.gmra.mxu0 %v1611_v20  ;;  %1305 = vst.msk [vmem:[%s2841_s3 + $0x48] sm:$0xff] %vm1295_vm0, %v1238_v21  ;;  %v1644_v20 = vld [vmem:[%s2840_s0 + $0x274] sm:$0xf0]  ;;  %v1891_v21 = vld [vmem:[%s2840_s0 + $0x278] sm:$0xf0] }
 0x134   :  { %v1062_v24 = vpop.f32.mrf.mxu2 }
 0x135   :  { %v1063_v12 = vadd.f32 %v1062_v24, %v974_v29  ;;  %v1151_v26 = vpop.f32.mrf.mxu3 }
 0x136   :  { %v975_v28 = vpop.f32.mrf.mxu1 }
 0x137   :  { %v1152_v31 = vadd.f32 %v1151_v26, %v1063_v12  ;;  %v976_v38 = vadd.f32 %v975_v28, %v2376_v55  ;;  %v1639_v26 = vor.u32 %v1887_v9, %v1636_v10 }
 0x138   :  { %v1242_v32 = vpop.f32.mrf.mxu0 }
 0x139   :  { %v1241_v33 = vadd.f32 %v1240_v59, %v1152_v31  ;;  %v1650_v59 = vld [vmem:[%s2840_s0 + $0x268] sm:$0xf] }
 0x13b   :  { %1306 = vst.msk [vmem:[%s2841_s3 + $0x50] sm:$0xff] %vm1295_vm0, %v1241_v33  ;;  %v1651_v33 = vor.u32 %v1891_v21, %v1650_v59 }
 0x13c   :  { %v1064_v23 = vpop.f32.mrf.mxu2 }
 0x13d   :  { %v1065_v42 = vadd.f32 %v1064_v23, %v976_v38  ;;  %v1153_v43 = vpop.f32.mrf.mxu3 }
 0x13e   :  { %v978_v52 = vpop.f32.mrf.mxu1 }
 0x13f   :  { %v1154_v61 = vadd.f32 %v1153_v43, %v1065_v42  ;;  %v979_v55 = vadd.f32 %v978_v52, %v2411_v11  ;;  %v1890_v11 = vld [vmem:[%s2840_s0 + $0x270] sm:$0xf0] }
 0x140   :  { %v1245_v22 = vpop.f32.mrf.mxu0  ;;  %v1643_v28 = vor.u32 %v1890_v11, %v1642_v13 }
 0x141   :  { %v1243_v62 = vadd.f32 %v1242_v32, %v1154_v61  ;;  %1017 = vmatmul.bf16.gmra.mxu1 %v1619_v47  ;;  %1106 = vmatmul.bf16.gmra.mxu2 %v1623_v30  ;;  %v1647_v32 = vor.u32 %v1888_v17, %v1644_v20 }
 0x142   :  { %1195 = vmatmul.bf16.gmra.mxu3 %v1627_v57 }
 0x143   :  { %1284 = vmatmul.bf16.gmra.mxu0 %v1631_v60  ;;  %1307 = vst.msk [vmem:[%s2841_s3 + $0x58] sm:$0xff] %vm1295_vm0, %v1243_v62 }
 0x144   :  { %v1067_v63 = vpop.f32.mrf.mxu2 }
 0x145   :  { %v1068_v0 = vadd.f32 %v1067_v63, %v979_v55  ;;  %v1156_v1 = vpop.f32.mrf.mxu3 }
 0x146   :  { %v980_v3 = vpop.f32.mrf.mxu1 }
 0x147   :  { %v1157_v4 = vadd.f32 %v1156_v1, %v1068_v0  ;;  %v981_v8 = vadd.f32 %v980_v3, %v2422_v18 }
 0x148   :  { %v1247_v5 = vpop.f32.mrf.mxu0 }
 0x149   :  { %v1246_v46 = vadd.f32 %v1245_v22, %v1157_v4 }
 0x14b   :  { %1308 = vst.msk [vmem:[%s2841_s3 + $0x60] sm:$0xff] %vm1295_vm0, %v1246_v46 }
 0x14c   :  { %v1069_v29 = vpop.f32.mrf.mxu2 }
 0x14d   :  { %v1070_v24 = vadd.f32 %v1069_v29, %v981_v8  ;;  %v1158_v12 = vpop.f32.mrf.mxu3 }
 0x14e   :  { %v983_v31 = vpop.f32.mrf.mxu1 }
 0x14f   :  { %v1159_v19 = vadd.f32 %v1158_v12, %v1070_v24  ;;  %v984_v18 = vadd.f32 %v983_v31, %v2457_v45 }
 0x150   :  { %v1250_v49 = vpop.f32.mrf.mxu0 }
 0x151   :  { %v1248_v34 = vadd.f32 %v1247_v5, %v1159_v19  ;;  %1022 = vmatmul.bf16.gmra.mxu1 %v1639_v26  ;;  %1111 = vmatmul.bf16.gmra.mxu2 %v1643_v28 }
 0x152   :  { %1200 = vmatmul.bf16.gmra.mxu3 %v1647_v32 }
 0x153   :  { %1289 = vmatmul.bf16.gmra.mxu0 %v1651_v33  ;;  %1309 = vst.msk [vmem:[%s2841_s3 + $0x68] sm:$0xff] %vm1295_vm0, %v1248_v34 }
 0x154   :  { %v1072_v48 = vpop.f32.mrf.mxu2 }
 0x155   :  { %v1073_v36 = vadd.f32 %v1072_v48, %v984_v18  ;;  %v1161_v37 = vpop.f32.mrf.mxu3 }
 0x156   :  { %v985_v38 = vpop.f32.mrf.mxu1 }
 0x157   :  { %v1162_v41 = vadd.f32 %v1161_v37, %v1073_v36  ;;  %v986_v42 = vadd.f32 %v985_v38, %v2468_v58 }
 0x158   :  { %v1252_v56 = vpop.f32.mrf.mxu0 }
 0x159   :  { %v1251_v23 = vadd.f32 %v1250_v49, %v1162_v41 }
 0x15b   :  { %1310 = vst.msk [vmem:[%s2841_s3 + $0x70] sm:$0xff] %vm1295_vm0, %v1251_v23 }
 0x15c   :  { %v1074_v43 = vpop.f32.mrf.mxu2 }
 0x15d   :  { %v1075_v47 = vadd.f32 %v1074_v43, %v986_v42  ;;  %v1163_v30 = vpop.f32.mrf.mxu3 }
 0x15e   :  { %v988_v52 = vpop.f32.mrf.mxu1 }
 0x15f   :  { %v1164_v57 = vadd.f32 %v1163_v30, %v1075_v47  ;;  %v989_v61 = vadd.f32 %v988_v52, %v2324_v25 }
 0x160   :  { %v1255_v45 = vpop.f32.mrf.mxu0 }
 0x161   :  { %v1253_v60 = vadd.f32 %v1252_v56, %v1164_v57 }
 0x163   :  { %1311 = vst.msk [vmem:[%s2841_s3 + $0x78] sm:$0xff] %vm1295_vm0, %v1253_v60 }
 0x164   :  { %v1077_v22 = vpop.f32.mrf.mxu2 }
 0x165   :  { %v1078_v62 = vadd.f32 %v1077_v22, %v989_v61  ;;  %v1166_v55 = vpop.f32.mrf.mxu3 }
 0x166   :  { %v990_v63 = vpop.f32.mrf.mxu1 }
 0x167   :  { %v1167_v0 = vadd.f32 %v1166_v55, %v1078_v62  ;;  %v991_v3 = vadd.f32 %v990_v63, %v2359_v40 }
 0x168   :  { %v1257_v58 = vpop.f32.mrf.mxu0 }
 0x169   :  { %v1256_v1 = vadd.f32 %v1255_v45, %v1167_v0 }
 0x16b   :  { %1312 = vst.msk [vmem:[%s2841_s3 + $0x80] sm:$0xff] %vm1295_vm0, %v1256_v1 }
 0x16c   :  { %v1079_v4 = vpop.f32.mrf.mxu2 }
 0x16d   :  { %v1080_v5 = vadd.f32 %v1079_v4, %v991_v3  ;;  %v1168_v46 = vpop.f32.mrf.mxu3 }
 0x16e   :  { %v993_v9 = vpop.f32.mrf.mxu1 }
 0x16f   :  { %v1169_v10 = vadd.f32 %v1168_v46, %v1080_v5  ;;  %v994_v11 = vadd.f32 %v993_v9, %v2370_v51 }
 0x170   :  { %v1260_v25 = vpop.f32.mrf.mxu0 }
 0x171   :  { %v1258_v13 = vadd.f32 %v1257_v58, %v1169_v10 }
 0x173   :  { %1313 = vst.msk [vmem:[%s2841_s3 + $0x88] sm:$0xff] %vm1295_vm0, %v1258_v13 }
 0x174   :  { %v1082_v17 = vpop.f32.mrf.mxu2 }
 0x175   :  { %v1083_v20 = vadd.f32 %v1082_v17, %v994_v11  ;;  %v1171_v8 = vpop.f32.mrf.mxu3 }
 0x176   :  { %v995_v59 = vpop.f32.mrf.mxu1 }
 0x177   :  { %v1172_v21 = vadd.f32 %v1171_v8, %v1083_v20  ;;  %v996_v24 = vadd.f32 %v995_v59, %v2405_v2 }
 0x178   :  { %v1262_v40 = vpop.f32.mrf.mxu0 }
 0x179   :  { %v1261_v29 = vadd.f32 %v1260_v25, %v1172_v21 }
 0x17b   :  { %1314 = vst.msk [vmem:[%s2841_s3 + $0x90] sm:$0xff] %vm1295_vm0, %v1261_v29 }
 0x17c   :  { %v1084_v12 = vpop.f32.mrf.mxu2 }
 0x17d   :  { %v1085_v26 = vadd.f32 %v1084_v12, %v996_v24  ;;  %v1173_v28 = vpop.f32.mrf.mxu3 }
 0x17e   :  { %v998_v31 = vpop.f32.mrf.mxu1 }
 0x17f   :  { %v1174_v32 = vadd.f32 %v1173_v28, %v1085_v26  ;;  %v999_v19 = vadd.f32 %v998_v31, %v2416_v14 }
 0x180   :  { %v1265_v51 = vpop.f32.mrf.mxu0 }
 0x181   :  { %v1263_v33 = vadd.f32 %v1262_v40, %v1174_v32 }
 0x183   :  { %1315 = vst.msk [vmem:[%s2841_s3 + $0x98] sm:$0xff] %vm1295_vm0, %v1263_v33 }
 0x184   :  { %v1087_v49 = vpop.f32.mrf.mxu2 }
 0x185   :  { %v1088_v34 = vadd.f32 %v1087_v49, %v999_v19  ;;  %v1176_v18 = vpop.f32.mrf.mxu3 }
 0x186   :  { %v1000_v48 = vpop.f32.mrf.mxu1 }
 0x187   :  { %v1177_v36 = vadd.f32 %v1176_v18, %v1088_v34  ;;  %v1001_v38 = vadd.f32 %v1000_v48, %v2451_v35 }
 0x188   :  { %v1267_v2 = vpop.f32.mrf.mxu0 }
 0x189   :  { %v1266_v37 = vadd.f32 %v1265_v51, %v1177_v36 }
 0x18b   :  { %1316 = vst.msk [vmem:[%s2841_s3 + $0xa0] sm:$0xff] %vm1295_vm0, %v1266_v37 }
 0x18c   :  { %v1089_v41 = vpop.f32.mrf.mxu2 }
 0x18d   :  { %v1090_v56 = vadd.f32 %v1089_v41, %v1001_v38  ;;  %v1178_v23 = vpop.f32.mrf.mxu3 }
 0x18e   :  { %v1003_v42 = vpop.f32.mrf.mxu1 }
 0x18f   :  { %v1179_v43 = vadd.f32 %v1178_v23, %v1090_v56  ;;  %v1004_v30 = vadd.f32 %v1003_v42, %v2462_v50 }
 0x190   :  { %v1270_v14 = vpop.f32.mrf.mxu0 }
 0x191   :  { %v1268_v47 = vadd.f32 %v1267_v2, %v1179_v43 }
 0x193   :  { %1317 = vst.msk [vmem:[%s2841_s3 + $0xa8] sm:$0xff] %vm1295_vm0, %v1268_v47 }
 0x194   :  { %v1092_v52 = vpop.f32.mrf.mxu2 }
 0x195   :  { %v1093_v57 = vadd.f32 %v1092_v52, %v1004_v30  ;;  %v1181_v45 = vpop.f32.mrf.mxu3 }
 0x196   :  { %v1005_v60 = vpop.f32.mrf.mxu1 }
 0x197   :  { %v1182_v61 = vadd.f32 %v1181_v45, %v1093_v57  ;;  %v1006_v62 = vadd.f32 %v1005_v60, %v2497_v7 }
 0x198   :  { %v1272_v35 = vpop.f32.mrf.mxu0 }
 0x199   :  { %v1271_v22 = vadd.f32 %v1270_v14, %v1182_v61 }
 0x19b   :  { %1318 = vst.msk [vmem:[%s2841_s3 + $0xb0] sm:$0xff] %vm1295_vm0, %v1271_v22 }
 0x19c   :  { %v1094_v55 = vpop.f32.mrf.mxu2 }
 0x19d   :  { %v1095_v63 = vadd.f32 %v1094_v55, %v1006_v62  ;;  %v1183_v0 = vpop.f32.mrf.mxu3 }
 0x19e   :  { %v1008_v58 = vpop.f32.mrf.mxu1 }
 0x19f   :  { %v1184_v1 = vadd.f32 %v1183_v0, %v1095_v63  ;;  %v1009_v4 = vadd.f32 %v1008_v58, %v2327_v27 }
 0x1a0   :  { %v1275_v50 = vpop.f32.mrf.mxu0 }
 0x1a1   :  { %v1273_v3 = vadd.f32 %v1272_v35, %v1184_v1 }
 0x1a3   :  { %1319 = vst.msk [vmem:[%s2841_s3 + $0xb8] sm:$0xff] %vm1295_vm0, %v1273_v3 }
 0x1a4   :  { %v1097_v5 = vpop.f32.mrf.mxu2 }
 0x1a5   :  { %v1098_v46 = vadd.f32 %v1097_v5, %v1009_v4  ;;  %v1186_v9 = vpop.f32.mrf.mxu3 }
 0x1a6   :  { %v1010_v10 = vpop.f32.mrf.mxu1 }
 0x1a7   :  { %v1187_v25 = vadd.f32 %v1186_v9, %v1098_v46  ;;  %v1011_v11 = vadd.f32 %v1010_v10, %v2362_v44 }
 0x1a8   :  { %v1277_v7 = vpop.f32.mrf.mxu0 }
 0x1a9   :  { %v1276_v13 = vadd.f32 %v1275_v50, %v1187_v25 }
 0x1ab   :  { %1320 = vst.msk [vmem:[%s2841_s3 + $0xc0] sm:$0xff] %vm1295_vm0, %v1276_v13 }
 0x1ac   :  { %v1099_v17 = vpop.f32.mrf.mxu2 }
 0x1ad   :  { %v1100_v20 = vadd.f32 %v1099_v17, %v1011_v11  ;;  %v1188_v8 = vpop.f32.mrf.mxu3 }
 0x1ae   :  { %v1013_v59 = vpop.f32.mrf.mxu1 }
 0x1af   :  { %v1189_v21 = vadd.f32 %v1188_v8, %v1100_v20  ;;  %v1014_v29 = vadd.f32 %v1013_v59, %v2373_v53 }
 0x1b0   :  { %v1280_v27 = vpop.f32.mrf.mxu0 }
 0x1b1   :  { %v1278_v40 = vadd.f32 %v1277_v7, %v1189_v21 }
 0x1b3   :  { %1321 = vst.msk [vmem:[%s2841_s3 + $0xc8] sm:$0xff] %vm1295_vm0, %v1278_v40 }
 0x1b4   :  { %v1102_v24 = vpop.f32.mrf.mxu2 }
 0x1b5   :  { %v1103_v12 = vadd.f32 %v1102_v24, %v1014_v29  ;;  %v1191_v26 = vpop.f32.mrf.mxu3 }
 0x1b6   :  { %v1015_v28 = vpop.f32.mrf.mxu1 }
 0x1b7   :  { %v1192_v31 = vadd.f32 %v1191_v26, %v1103_v12  ;;  %v1016_v51 = vadd.f32 %v1015_v28, %v2408_v6 }
 0x1b8   :  { %v1282_v44 = vpop.f32.mrf.mxu0 }
 0x1b9   :  { %v1281_v32 = vadd.f32 %v1280_v27, %v1192_v31 }
 0x1bb   :  { %1322 = vst.msk [vmem:[%s2841_s3 + $0xd0] sm:$0xff] %vm1295_vm0, %v1281_v32 }
 0x1bc   :  { %v1104_v33 = vpop.f32.mrf.mxu2 }
 0x1bd   :  { %v1105_v19 = vadd.f32 %v1104_v33, %v1016_v51  ;;  %v1193_v49 = vpop.f32.mrf.mxu3 }
 0x1be   :  { %v1018_v34 = vpop.f32.mrf.mxu1 }
 0x1bf   :  { %v1194_v18 = vadd.f32 %v1193_v49, %v1105_v19  ;;  %v1019_v36 = vadd.f32 %v1018_v34, %v2419_v16 }
 0x1c0   :  { %v1285_v48 = vpop.f32.mrf.mxu0 }
 0x1c1   :  { %v1283_v53 = vadd.f32 %v1282_v44, %v1194_v18 }
 0x1c3   :  { %1323 = vst.msk [vmem:[%s2841_s3 + $0xd8] sm:$0xff] %vm1295_vm0, %v1283_v53 }
 0x1c4   :  { %v1107_v2 = vpop.f32.mrf.mxu2 }
 0x1c5   :  { %v1108_v37 = vadd.f32 %v1107_v2, %v1019_v36  ;;  %v1196_v38 = vpop.f32.mrf.mxu3 }
 0x1c6   :  { %v1020_v41 = vpop.f32.mrf.mxu1 }
 0x1c7   :  { %v1197_v56 = vadd.f32 %v1196_v38, %v1108_v37  ;;  %v1021_v23 = vadd.f32 %v1020_v41, %v2454_v39 }
 0x1c8   :  { %v1287_v42 = vpop.f32.mrf.mxu0 }
 0x1c9   :  { %v1286_v6 = vadd.f32 %v1285_v48, %v1197_v56 }
 0x1cb   :  { %1324 = vst.msk [vmem:[%s2841_s3 + $0xe0] sm:$0xff] %vm1295_vm0, %v1286_v6 }
 0x1cc   :  { %v1109_v43 = vpop.f32.mrf.mxu2 }
 0x1cd   :  { %v1110_v14 = vadd.f32 %v1109_v43, %v1021_v23  ;;  %v1198_v47 = vpop.f32.mrf.mxu3 }
 0x1ce   :  { %v1023_v30 = vpop.f32.mrf.mxu1 }
 0x1cf   :  { %v1199_v52 = vadd.f32 %v1198_v47, %v1110_v14  ;;  %v1024_v57 = vadd.f32 %v1023_v30, %v2465_v54 }
 0x1d0   :  { %v1290_v35 = vpop.f32.mrf.mxu0 }
 0x1d1   :  { %v1288_v16 = vadd.f32 %v1287_v42, %v1199_v52 }
 0x1d3   :  { %1325 = vst.msk [vmem:[%s2841_s3 + $0xe8] sm:$0xff] %vm1295_vm0, %v1288_v16 }
 0x1d4   :  { %v1112_v45 = vpop.f32.mrf.mxu2 }
 0x1d5   :  { %v1113_v60 = vadd.f32 %v1112_v45, %v1024_v57  ;;  %v1201_v61 = vpop.f32.mrf.mxu3 }
 0x1d6   :  { %v1025_v39 = vpop.f32.mrf.mxu1 }
 0x1d7   :  { %v1202_v22 = vadd.f32 %v1201_v61, %v1113_v60  ;;  %v1026_v55 = vadd.f32 %v1025_v39, %v2500_v15 }
 0x1d8   :  { %v1292_v50 = vpop.f32.mrf.mxu0 }
 0x1d9   :  { %v1291_v62 = vadd.f32 %v1290_v35, %v1202_v22 }
 0x1db   :  { %1326 = vst.msk [vmem:[%s2841_s3 + $0xf0] sm:$0xff] %vm1295_vm0, %v1291_v62 }
 0x1dc   :  { %v1114_v63 = vpop.f32.mrf.mxu2 }
 0x1dd   :  { %v1115_v0 = vadd.f32 %v1114_v63, %v1026_v55  ;;  %v1203_v58 = vpop.f32.mrf.mxu3 }
 0x1df   :  { %v1204_v1 = vadd.f32 %v1203_v58, %v1115_v0 }
 0x1e1   :  { %v1293_v54 = vadd.f32 %v1292_v50, %v1204_v1 }
 0x1e3   :  { %1327 = vst.msk [vmem:[%s2841_s3 + $0xf8] sm:$0xff] %vm1295_vm0, %v1293_v54 }

</bundles_post_ra>
